<compile_context>
chip_gen: v7x
topology: tpu7x:2x2x1
jax: 0.10.0
libtpu: 0.0.40
codegen_flags: <defaults>
</compile_context>

<pallas_src>
import functools

import jax
import jax.numpy as jnp
from jax.experimental import pallas as pl
from jax.experimental.pallas import tpu as pltpu


# ----------------------------------------------------------------------------
# helpers
# ----------------------------------------------------------------------------
def _round_up(x, m):
    return ((x + m - 1) // m) * m


# ----------------------------------------------------------------------------
# Pallas kernels
# ----------------------------------------------------------------------------
def _conv3x3_kernel(x_ref, scale_ref, shift_ref, w_ref, bias_ref,
                    y_ref, sum_ref, sq_ref, xpad_ref, acc_ref,
                    *, H, W, fuse_bn_relu):
    """Per-image 3x3 conv (pad=1) + bias, with:
       - optional fused BN+ReLU of the *previous* layer applied to the input,
       - BN batch-stats partials (sum / sum-of-squares) emitted from the epilogue.

    x_ref:     (1, H, W, Cpi)   bf16
    scale_ref: (1, Cpi)         f32   (previous layer's BN scale; unused if not fused)
    shift_ref: (1, Cpi)         f32
    w_ref:     (9, Cpi, Cpo)    bf16  (tap-major: t = 3*kh + kw)
    bias_ref:  (1, Cpo)         f32
    y_ref:     (1, H, W, Cpo)   bf16/f32 (pre-BN conv output)
    sum_ref:   (1, 1, Cpo)      f32   per-image partial sum
    sq_ref:    (1, 1, Cpo)      f32   per-image partial sum of squares
    xpad_ref:  (H+2, W+2, Cpi)  f32   VMEM scratch (spatially zero-padded input)
    acc_ref:   (H*W, Cpo)       f32   VMEM accumulator
    """
    # --- input activation (fuse previous BN + ReLU here instead of a separate pass)
    xin = x_ref[0].astype(jnp.float32)                       # (H, W, Cpi)
    if fuse_bn_relu:
        xin = jnp.maximum(xin * scale_ref[...] + shift_ref[...], 0.0)

    # --- zero-padded copy of this image in VMEM (replaces the HBM im2col tensor)
    xpad_ref[...] = jnp.zeros_like(xpad_ref)
    xpad_ref[pl.ds(1, H), pl.ds(1, W), :] = xin

    # --- 9 accumulating MXU matmuls over shifted VMEM windows (bf16 x bf16 -> f32)
    acc_ref[...] = jnp.zeros_like(acc_ref)
    cpi = xpad_ref.shape[-1]
    for t in range(9):
        dh, dw = divmod(t, 3)
        a = xpad_ref[pl.ds(dh, H), pl.ds(dw, W), :]           # (H, W, Cpi) f32
        a = a.reshape(H * W, cpi).astype(jnp.bfloat16)
        acc_ref[...] += jnp.dot(a, w_ref[t],
                                preferred_element_type=jnp.float32)

    # --- epilogue: bias, store pre-BN activation, emit BN partial statistics
    yf = acc_ref[...] + bias_ref[...]                         # (H*W, Cpo) f32
    y_ref[...] = yf.reshape(y_ref.shape).astype(y_ref.dtype)
    sum_ref[...] = jnp.sum(yf, axis=0, keepdims=True).reshape(sum_ref.shape)
    sq_ref[...] = jnp.sum(yf * yf, axis=0, keepdims=True).reshape(sq_ref.shape)


def _scale_shift_relu_kernel(x_ref, scale_ref, shift_ref, o_ref):
    o_ref[...] = jnp.maximum(x_ref[...] * scale_ref[...] + shift_ref[...], 0.0)


# ----------------------------------------------------------------------------
# Pallas wrappers
# ----------------------------------------------------------------------------
def conv3x3_bn_fused(x, w, bias, scale, shift, *, fuse_bn_relu, out_dtype):
    """x: (B, H, W, Cpi) bf16 NHWC (channels pre-padded to a multiple of 128).
    Returns (pre-BN conv output (B,H,W,Cpo), per-channel sum (1,Cpo), sumsq (1,Cpo))."""
    B, H, W, Cpi = x.shape
    Cpo = w.shape[-1]

    kern = functools.partial(_conv3x3_kernel, H=H, W=W, fuse_bn_relu=fuse_bn_relu)
    y, s, sq = pl.pallas_call(
        kern,
        out_shape=(jax.ShapeDtypeStruct((B, H, W, Cpo), out_dtype),
                   jax.ShapeDtypeStruct((B, 1, Cpo), jnp.float32),
                   jax.ShapeDtypeStruct((B, 1, Cpo), jnp.float32)),
        grid_spec=pltpu.PrefetchScalarGridSpec(
            num_scalar_prefetch=0,
            grid=(B,),
            in_specs=[
                pl.BlockSpec((1, H, W, Cpi), lambda b: (b, 0, 0, 0)),
                pl.BlockSpec((1, Cpi), lambda b: (0, 0)),
                pl.BlockSpec((1, Cpi), lambda b: (0, 0)),
                pl.BlockSpec((9, Cpi, Cpo), lambda b: (0, 0, 0)),
                pl.BlockSpec((1, Cpo), lambda b: (0, 0)),
            ],
            out_specs=(
                pl.BlockSpec((1, H, W, Cpo), lambda b: (b, 0, 0, 0)),
                pl.BlockSpec((1, 1, Cpo), lambda b: (b, 0, 0)),
                pl.BlockSpec((1, 1, Cpo), lambda b: (b, 0, 0)),
            ),
            scratch_shapes=[
                pltpu.VMEM((H + 2, W + 2, Cpi), jnp.float32),
                pltpu.VMEM((H * W, Cpo), jnp.float32),
            ]),
        compiler_params=pltpu.CompilerParams(
            dimension_semantics=("parallel",),
            vmem_limit_bytes=32 * 1024 * 1024),
    )(x, scale, shift, w, bias)

    # reduce per-image partials to global batch statistics (tiny, plain JAX)
    return y, jnp.sum(s, axis=0), jnp.sum(sq, axis=0)


def scale_shift_relu(y, scale, shift):
    """Lane-dense elementwise y*scale+shift then ReLU on (M, C) with large row tiles."""
    M, C = y.shape
    tm = min(_round_up(M, 8), 1024)
    Mp = _round_up(M, tm)
    yp = jnp.pad(y, ((0, Mp - M), (0, 0))) if Mp != M else y

    out = pl.pallas_call(
        _scale_shift_relu_kernel,
        out_shape=jax.ShapeDtypeStruct((Mp, C), jnp.float32),
        grid_spec=pltpu.PrefetchScalarGridSpec(
            num_scalar_prefetch=0,
            grid=(Mp // tm,),
            in_specs=[pl.BlockSpec((tm, C), lambda i: (i, 0)),
                      pl.BlockSpec((1, C), lambda i: (0, 0)),
                      pl.BlockSpec((1, C), lambda i: (0, 0))],
            out_specs=pl.BlockSpec((tm, C), lambda i: (i, 0))),
        compiler_params=pltpu.CompilerParams(
            dimension_semantics=("parallel",)),
    )(yp, scale, shift)
    return out[:M]


# ----------------------------------------------------------------------------
# BatchNorm affine factors (tiny per-channel math, plain JAX between kernels)
# ----------------------------------------------------------------------------
def _bn_affine(s, sq, gamma, beta, count, eps=1e-5):
    mean = s / count
    var = jnp.maximum(sq / count - mean * mean, 0.0)   # clamp (E[x^2]-m^2 can go <0)
    inv = 1.0 / jnp.sqrt(var + eps)
    scale = gamma * inv
    shift = beta - mean * scale
    return scale, shift


# ----------------------------------------------------------------------------
# parameters
# ----------------------------------------------------------------------------
def init_double_conv_params(key, in_ch, out_ch):
    """Raw parameters in PyTorch layout: Conv2d weight (Cout, Cin, 3, 3), BN gamma/beta."""
    k1, k2, k3, k4 = jax.random.split(key, 4)

    def conv_wb(kw, kb, cout, cin):
        fan = cin * 9
        bound = 1.0 / jnp.sqrt(fan)
        w = jax.random.uniform(kw, (cout, cin, 3, 3), jnp.float32, -bound, bound)
        b = jax.random.uniform(kb, (cout,), jnp.float32, -bound, bound)
        return w, b

    w1, b1 = conv_wb(k1, k2, out_ch, in_ch)
    w2, b2 = conv_wb(k3, k4, out_ch, out_ch)
    ones = jnp.ones((out_ch,), jnp.float32)
    zeros = jnp.zeros((out_ch,), jnp.float32)
    return dict(w1=w1, b1=b1, g1=ones, be1=zeros,
                w2=w2, b2=b2, g2=ones, be2=zeros)


def prepare_params(p):
    """One-time prep: tap-major weight layout, channel padding to 128 lanes, bf16 cast."""
    in_ch, out_ch = p["w1"].shape[1], p["w1"].shape[0]
    cpi = _round_up(in_ch, 128)
    cpm = _round_up(out_ch, 128)

    def prep(w, b, g, be, ci_pad, co_pad):
        cout, cin = w.shape[0], w.shape[1]
        wt = jnp.transpose(w, (2, 3, 1, 0)).reshape(9, cin, cout)        # (kh,kw,Ci,Co)
        wt = jnp.pad(wt, ((0, 0), (0, ci_pad - cin), (0, co_pad - cout))
                     ).astype(jnp.bfloat16)
        pad1 = lambda v: jnp.pad(v, (0, co_pad - cout)).reshape(1, co_pad).astype(jnp.float32)
        return dict(w=wt, b=pad1(b), g=pad1(g), be=pad1(be))

    return dict(c1=prep(p["w1"], p["b1"], p["g1"], p["be1"], cpi, cpm),
                c2=prep(p["w2"], p["b2"], p["g2"], p["be2"], cpm, cpm))


# ----------------------------------------------------------------------------
# forward (NCHW in / NCHW out, same semantics as the PyTorch DoubleConv module)
# ----------------------------------------------------------------------------
def double_conv_forward(prepped, x_nchw, *, out_ch):
    B, Cin, H, W = x_nchw.shape
    c1, c2 = prepped["c1"], prepped["c2"]
    Cpi = c1["w"].shape[1]
    Cpm = c1["w"].shape[2]
    count = B * H * W

    x = jnp.transpose(x_nchw, (0, 2, 3, 1))                      # NHWC
    x = jnp.pad(x, ((0, 0), (0, 0), (0, 0), (0, Cpi - Cin))).astype(jnp.bfloat16)

    # conv1 + bias; BN1 batch-stats emitted from the epilogue
    ones = jnp.ones((1, Cpi), jnp.float32)
    zeros = jnp.zeros((1, Cpi), jnp.float32)
    y1, s1, q1 = conv3x3_bn_fused(x, c1["w"], c1["b"], ones, zeros,
                                  fuse_bn_relu=False, out_dtype=jnp.bfloat16)
    scale1, shift1 = _bn_affine(s1, q1, c1["g"], c1["be"], count)

    # BN1+ReLU fused into conv2's input load; conv2 + bias; BN2 stats from epilogue
    y2, s2, q2 = conv3x3_bn_fused(y1, c2["w"], c2["b"], scale1, shift1,
                                  fuse_bn_relu=True, out_dtype=jnp.float32)
    scale2, shift2 = _bn_affine(s2, q2, c2["g"], c2["be"], count)

    # final BN2 + ReLU (module output -> standalone lane-dense elementwise pass)
    out = scale_shift_relu(y2.reshape(B * H * W, Cpm), scale2, shift2)
    out = out.reshape(B, H, W, Cpm)[:, :, :, :out_ch]
    return jnp.transpose(out, (0, 3, 1, 2))                      # NCHW


# ----------------------------------------------------------------------------
# pure-JAX f32 reference (for a loose numerical sanity check)
# ----------------------------------------------------------------------------
def _ref_double_conv(p, x):
    def block(x, w, b, g, be):
        y = jax.lax.conv_general_dilated(
            x, w, window_strides=(1, 1), padding=((1, 1), (1, 1)),
            dimension_numbers=("NCHW", "OIHW", "NCHW"))
        y = y + b.reshape(1, -1, 1, 1)
        mean = jnp.mean(y, axis=(0, 2, 3), keepdims=True)
        var = jnp.mean(jnp.square(y - mean), axis=(0, 2, 3), keepdims=True)
        y = (y - mean) / jnp.sqrt(var + 1e-5)
        return jnp.maximum(y * g.reshape(1, -1, 1, 1) + be.reshape(1, -1, 1, 1), 0.0)

    x = block(x, p["w1"], p["b1"], p["g1"], p["be1"])
    return block(x, p["w2"], p["b2"], p["g2"], p["be2"])


# ----------------------------------------------------------------------------
if __name__ == "__main__":
    key = jax.random.PRNGKey(0)
    pkey, xkey = jax.random.split(key)

    B, in_ch, out_ch, H, W = 2, 4, 8, 16, 16
    raw = init_double_conv_params(pkey, in_ch, out_ch)
    prepped = prepare_params(raw)
    x = jax.random.normal(xkey, (B, in_ch, H, W), jnp.float32)

    fwd = jax.jit(double_conv_forward, static_argnames=("out_ch",))
    out = jax.block_until_ready(fwd(prepped, x, out_ch=out_ch))

    assert out.shape == (B, out_ch, H, W), out.shape
    assert bool(jnp.all(jnp.isfinite(out)))

    # loose tolerance: Pallas path uses bf16 activations/weights on the MXU
    ref = _ref_double_conv(raw, x)
    max_err = float(jnp.max(jnp.abs(out - ref)))
    assert max_err < 0.25, f"max abs err vs f32 reference: {max_err}"

    print("KERNEL_OK")
</pallas_src>

<mosaic_0001>
module attributes {stable_mosaic.version = 11 : i64} {
  func.func @_conv3x3_kernel(%arg0: i32, %arg1: memref<1x16x16x128xbf16, #tpu.memory_space<vmem>>, %arg2: memref<1x128xf32, #tpu.memory_space<vmem>>, %arg3: memref<1x128xf32, #tpu.memory_space<vmem>>, %arg4: memref<9x128x128xbf16, #tpu.memory_space<vmem>>, %arg5: memref<1x128xf32, #tpu.memory_space<vmem>>, %arg6: memref<1x16x16x128xbf16, #tpu.memory_space<vmem>>, %arg7: memref<1x1x128xf32, #tpu.memory_space<vmem>>, %arg8: memref<1x1x128xf32, #tpu.memory_space<vmem>>, %arg9: memref<18x18x128xf32, #tpu.memory_space<vmem>>, %arg10: memref<256x128xf32, #tpu.memory_space<vmem>>) attributes {dimension_semantics = [#tpu.dimension_semantics<parallel>], iteration_bounds = array<i64: 2>, scalar_prefetch = 0 : i64, scratch_operands = 2 : i64, tpu.core_type = #tpu.core_type<tc>, window_params = [{transform_indices = @transform_0, window_bounds = array<i64: 1, 16, 16, 128>}, {pipeline_mode = #tpu.pipeline_mode<synchronous>, transform_indices = @transform_1, window_bounds = array<i64: 1, 128>}, {pipeline_mode = #tpu.pipeline_mode<synchronous>, transform_indices = @transform_2, window_bounds = array<i64: 1, 128>}, {pipeline_mode = #tpu.pipeline_mode<synchronous>, transform_indices = @transform_3, window_bounds = array<i64: 9, 128, 128>}, {pipeline_mode = #tpu.pipeline_mode<synchronous>, transform_indices = @transform_4, window_bounds = array<i64: 1, 128>}, {transform_indices = @transform_5, window_bounds = array<i64: 1, 16, 16, 128>}, {transform_indices = @transform_6, window_bounds = array<i64: 1, 1, 128>}, {transform_indices = @transform_7, window_bounds = array<i64: 1, 1, 128>}]} {
    %c0 = arith.constant 0 : index
    %c0_0 = arith.constant 0 : index
    %c0_1 = arith.constant 0 : index
    %c0_2 = arith.constant 0 : index
    %0 = vector.load %arg1[%c0, %c0_0, %c0_1, %c0_2] : memref<1x16x16x128xbf16, #tpu.memory_space<vmem>>, vector<1x16x16x128xbf16>
    %1 = vector.shape_cast %0 : vector<1x16x16x128xbf16> to vector<16x16x128xbf16>
    %2 = arith.extf %1 : vector<16x16x128xbf16> to vector<16x16x128xf32>
    %cst = arith.constant 0.000000e+00 : f32
    %3 = vector.broadcast %cst : f32 to vector<18x18x128xf32>
    %c0_3 = arith.constant 0 : index
    %c0_4 = arith.constant 0 : index
    %c0_5 = arith.constant 0 : index
    %4 = vector.load %arg9[%c0_3, %c0_4, %c0_5] : memref<18x18x128xf32, #tpu.memory_space<vmem>>, vector<18x18x128xf32>
    tpu.vector_store %arg9[%c0_3, %c0_4, %c0_5], %3 {strides = array<i32>} : memref<18x18x128xf32, #tpu.memory_space<vmem>>, vector<18x18x128xf32>,
    %c1 = arith.constant 1 : index
    %c1_6 = arith.constant 1 : index
    %c0_7 = arith.constant 0 : index
    %5 = vector.load %arg9[%c1, %c1_6, %c0_7] : memref<18x18x128xf32, #tpu.memory_space<vmem>>, vector<16x16x128xf32>
    tpu.vector_store %arg9[%c1, %c1_6, %c0_7], %2 {strides = array<i32>} : memref<18x18x128xf32, #tpu.memory_space<vmem>>, vector<16x16x128xf32>,
    %cst_8 = arith.constant 0.000000e+00 : f32
    %6 = vector.broadcast %cst_8 : f32 to vector<256x128xf32>
    %c0_9 = arith.constant 0 : index
    %c0_10 = arith.constant 0 : index
    %7 = vector.load %arg10[%c0_9, %c0_10] : memref<256x128xf32, #tpu.memory_space<vmem>>, vector<256x128xf32>
    tpu.vector_store %arg10[%c0_9, %c0_10], %6 {strides = array<i32>} : memref<256x128xf32, #tpu.memory_space<vmem>>, vector<256x128xf32>,
    %c0_11 = arith.constant 0 : index
    %c0_12 = arith.constant 0 : index
    %c0_13 = arith.constant 0 : index
    %8 = vector.load %arg9[%c0_11, %c0_12, %c0_13] : memref<18x18x128xf32, #tpu.memory_space<vmem>>, vector<16x16x128xf32>
    %9 = vector.shape_cast %8 : vector<16x16x128xf32> to vector<256x128xf32>
    %10 = arith.truncf %9 : vector<256x128xf32> to vector<256x128xbf16>
    %c0_14 = arith.constant 0 : index
    %c0_15 = arith.constant 0 : index
    %11 = vector.load %arg10[%c0_14, %c0_15] : memref<256x128xf32, #tpu.memory_space<vmem>>, vector<256x128xf32>
    %c0_16 = arith.constant 0 : index
    %c0_17 = arith.constant 0 : index
    %c0_18 = arith.constant 0 : index
    %12 = vector.load %arg4[%c0_16, %c0_17, %c0_18] : memref<9x128x128xbf16, #tpu.memory_space<vmem>>, vector<1x128x128xbf16>
    %13 = vector.shape_cast %12 : vector<1x128x128xbf16> to vector<128x128xbf16>
    %cst_19 = arith.constant dense<0.000000e+00> : vector<256x128xf32>
    %14 = tpu.matmul %10, %13, %cst_19 {dimension_numbers = #tpu.dot_dimension_numbers<[1], [0], [0], [1], [0, 0, 1, 1], [], []>} : vector<256x128xbf16>, vector<128x128xbf16>, vector<256x128xf32> -> vector<256x128xf32>
    %15 = arith.addf %11, %14 : vector<256x128xf32>
    %c0_20 = arith.constant 0 : index
    %c0_21 = arith.constant 0 : index
    %16 = vector.load %arg10[%c0_20, %c0_21] : memref<256x128xf32, #tpu.memory_space<vmem>>, vector<256x128xf32>
    tpu.vector_store %arg10[%c0_20, %c0_21], %15 {strides = array<i32>} : memref<256x128xf32, #tpu.memory_space<vmem>>, vector<256x128xf32>,
    %c0_22 = arith.constant 0 : index
    %c1_23 = arith.constant 1 : index
    %c0_24 = arith.constant 0 : index
    %17 = vector.load %arg9[%c0_22, %c1_23, %c0_24] : memref<18x18x128xf32, #tpu.memory_space<vmem>>, vector<16x16x128xf32>
    %18 = vector.shape_cast %17 : vector<16x16x128xf32> to vector<256x128xf32>
    %19 = arith.truncf %18 : vector<256x128xf32> to vector<256x128xbf16>
    %c0_25 = arith.constant 0 : index
    %c0_26 = arith.constant 0 : index
    %20 = vector.load %arg10[%c0_25, %c0_26] : memref<256x128xf32, #tpu.memory_space<vmem>>, vector<256x128xf32>
    %c1_27 = arith.constant 1 : index
    %c0_28 = arith.constant 0 : index
    %c0_29 = arith.constant 0 : index
    %21 = vector.load %arg4[%c1_27, %c0_28, %c0_29] : memref<9x128x128xbf16, #tpu.memory_space<vmem>>, vector<1x128x128xbf16>
    %22 = vector.shape_cast %21 : vector<1x128x128xbf16> to vector<128x128xbf16>
    %cst_30 = arith.constant dense<0.000000e+00> : vector<256x128xf32>
    %23 = tpu.matmul %19, %22, %cst_30 {dimension_numbers = #tpu.dot_dimension_numbers<[1], [0], [0], [1], [0, 0, 1, 1], [], []>} : vector<256x128xbf16>, vector<128x128xbf16>, vector<256x128xf32> -> vector<256x128xf32>
    %24 = arith.addf %20, %23 : vector<256x128xf32>
    %c0_31 = arith.constant 0 : index
    %c0_32 = arith.constant 0 : index
    %25 = vector.load %arg10[%c0_31, %c0_32] : memref<256x128xf32, #tpu.memory_space<vmem>>, vector<256x128xf32>
    tpu.vector_store %arg10[%c0_31, %c0_32], %24 {strides = array<i32>} : memref<256x128xf32, #tpu.memory_space<vmem>>, vector<256x128xf32>,
    %c0_33 = arith.constant 0 : index
    %c2 = arith.constant 2 : index
    %c0_34 = arith.constant 0 : index
    %26 = vector.load %arg9[%c0_33, %c2, %c0_34] : memref<18x18x128xf32, #tpu.memory_space<vmem>>, vector<16x16x128xf32>
    %27 = vector.shape_cast %26 : vector<16x16x128xf32> to vector<256x128xf32>
    %28 = arith.truncf %27 : vector<256x128xf32> to vector<256x128xbf16>
    %c0_35 = arith.constant 0 : index
    %c0_36 = arith.constant 0 : index
    %29 = vector.load %arg10[%c0_35, %c0_36] : memref<256x128xf32, #tpu.memory_space<vmem>>, vector<256x128xf32>
    %c2_37 = arith.constant 2 : index
    %c0_38 = arith.constant 0 : index
    %c0_39 = arith.constant 0 : index
    %30 = vector.load %arg4[%c2_37, %c0_38, %c0_39] : memref<9x128x128xbf16, #tpu.memory_space<vmem>>, vector<1x128x128xbf16>
    %31 = vector.shape_cast %30 : vector<1x128x128xbf16> to vector<128x128xbf16>
    %cst_40 = arith.constant dense<0.000000e+00> : vector<256x128xf32>
    %32 = tpu.matmul %28, %31, %cst_40 {dimension_numbers = #tpu.dot_dimension_numbers<[1], [0], [0], [1], [0, 0, 1, 1], [], []>} : vector<256x128xbf16>, vector<128x128xbf16>, vector<256x128xf32> -> vector<256x128xf32>
    %33 = arith.addf %29, %32 : vector<256x128xf32>
    %c0_41 = arith.constant 0 : index
    %c0_42 = arith.constant 0 : index
    %34 = vector.load %arg10[%c0_41, %c0_42] : memref<256x128xf32, #tpu.memory_space<vmem>>, vector<256x128xf32>
    tpu.vector_store %arg10[%c0_41, %c0_42], %33 {strides = array<i32>} : memref<256x128xf32, #tpu.memory_space<vmem>>, vector<256x128xf32>,
    %c1_43 = arith.constant 1 : index
    %c0_44 = arith.constant 0 : index
    %c0_45 = arith.constant 0 : index
    %35 = vector.load %arg9[%c1_43, %c0_44, %c0_45] : memref<18x18x128xf32, #tpu.memory_space<vmem>>, vector<16x16x128xf32>
    %36 = vector.shape_cast %35 : vector<16x16x128xf32> to vector<256x128xf32>
    %37 = arith.truncf %36 : vector<256x128xf32> to vector<256x128xbf16>
    %c0_46 = arith.constant 0 : index
    %c0_47 = arith.constant 0 : index
    %38 = vector.load %arg10[%c0_46, %c0_47] : memref<256x128xf32, #tpu.memory_space<vmem>>, vector<256x128xf32>
    %c3 = arith.constant 3 : index
    %c0_48 = arith.constant 0 : index
    %c0_49 = arith.constant 0 : index
    %39 = vector.load %arg4[%c3, %c0_48, %c0_49] : memref<9x128x128xbf16, #tpu.memory_space<vmem>>, vector<1x128x128xbf16>
    %40 = vector.shape_cast %39 : vector<1x128x128xbf16> to vector<128x128xbf16>
    %cst_50 = arith.constant dense<0.000000e+00> : vector<256x128xf32>
    %41 = tpu.matmul %37, %40, %cst_50 {dimension_numbers = #tpu.dot_dimension_numbers<[1], [0], [0], [1], [0, 0, 1, 1], [], []>} : vector<256x128xbf16>, vector<128x128xbf16>, vector<256x128xf32> -> vector<256x128xf32>
    %42 = arith.addf %38, %41 : vector<256x128xf32>
    %c0_51 = arith.constant 0 : index
    %c0_52 = arith.constant 0 : index
    %43 = vector.load %arg10[%c0_51, %c0_52] : memref<256x128xf32, #tpu.memory_space<vmem>>, vector<256x128xf32>
    tpu.vector_store %arg10[%c0_51, %c0_52], %42 {strides = array<i32>} : memref<256x128xf32, #tpu.memory_space<vmem>>, vector<256x128xf32>,
    %c1_53 = arith.constant 1 : index
    %c1_54 = arith.constant 1 : index
    %c0_55 = arith.constant 0 : index
    %44 = vector.load %arg9[%c1_53, %c1_54, %c0_55] : memref<18x18x128xf32, #tpu.memory_space<vmem>>, vector<16x16x128xf32>
    %45 = vector.shape_cast %44 : vector<16x16x128xf32> to vector<256x128xf32>
    %46 = arith.truncf %45 : vector<256x128xf32> to vector<256x128xbf16>
    %c0_56 = arith.constant 0 : index
    %c0_57 = arith.constant 0 : index
    %47 = vector.load %arg10[%c0_56, %c0_57] : memref<256x128xf32, #tpu.memory_space<vmem>>, vector<256x128xf32>
    %c4 = arith.constant 4 : index
    %c0_58 = arith.constant 0 : index
    %c0_59 = arith.constant 0 : index
    %48 = vector.load %arg4[%c4, %c0_58, %c0_59] : memref<9x128x128xbf16, #tpu.memory_space<vmem>>, vector<1x128x128xbf16>
    %49 = vector.shape_cast %48 : vector<1x128x128xbf16> to vector<128x128xbf16>
    %cst_60 = arith.constant dense<0.000000e+00> : vector<256x128xf32>
    %50 = tpu.matmul %46, %49, %cst_60 {dimension_numbers = #tpu.dot_dimension_numbers<[1], [0], [0], [1], [0, 0, 1, 1], [], []>} : vector<256x128xbf16>, vector<128x128xbf16>, vector<256x128xf32> -> vector<256x128xf32>
    %51 = arith.addf %47, %50 : vector<256x128xf32>
    %c0_61 = arith.constant 0 : index
    %c0_62 = arith.constant 0 : index
    %52 = vector.load %arg10[%c0_61, %c0_62] : memref<256x128xf32, #tpu.memory_space<vmem>>, vector<256x128xf32>
    tpu.vector_store %arg10[%c0_61, %c0_62], %51 {strides = array<i32>} : memref<256x128xf32, #tpu.memory_space<vmem>>, vector<256x128xf32>,
    %c1_63 = arith.constant 1 : index
    %c2_64 = arith.constant 2 : index
    %c0_65 = arith.constant 0 : index
    %53 = vector.load %arg9[%c1_63, %c2_64, %c0_65] : memref<18x18x128xf32, #tpu.memory_space<vmem>>, vector<16x16x128xf32>
    %54 = vector.shape_cast %53 : vector<16x16x128xf32> to vector<256x128xf32>
    %55 = arith.truncf %54 : vector<256x128xf32> to vector<256x128xbf16>
    %c0_66 = arith.constant 0 : index
    %c0_67 = arith.constant 0 : index
    %56 = vector.load %arg10[%c0_66, %c0_67] : memref<256x128xf32, #tpu.memory_space<vmem>>, vector<256x128xf32>
    %c5 = arith.constant 5 : index
    %c0_68 = arith.constant 0 : index
    %c0_69 = arith.constant 0 : index
    %57 = vector.load %arg4[%c5, %c0_68, %c0_69] : memref<9x128x128xbf16, #tpu.memory_space<vmem>>, vector<1x128x128xbf16>
    %58 = vector.shape_cast %57 : vector<1x128x128xbf16> to vector<128x128xbf16>
    %cst_70 = arith.constant dense<0.000000e+00> : vector<256x128xf32>
    %59 = tpu.matmul %55, %58, %cst_70 {dimension_numbers = #tpu.dot_dimension_numbers<[1], [0], [0], [1], [0, 0, 1, 1], [], []>} : vector<256x128xbf16>, vector<128x128xbf16>, vector<256x128xf32> -> vector<256x128xf32>
    %60 = arith.addf %56, %59 : vector<256x128xf32>
    %c0_71 = arith.constant 0 : index
    %c0_72 = arith.constant 0 : index
    %61 = vector.load %arg10[%c0_71, %c0_72] : memref<256x128xf32, #tpu.memory_space<vmem>>, vector<256x128xf32>
    tpu.vector_store %arg10[%c0_71, %c0_72], %60 {strides = array<i32>} : memref<256x128xf32, #tpu.memory_space<vmem>>, vector<256x128xf32>,
    %c2_73 = arith.constant 2 : index
    %c0_74 = arith.constant 0 : index
    %c0_75 = arith.constant 0 : index
    %62 = vector.load %arg9[%c2_73, %c0_74, %c0_75] : memref<18x18x128xf32, #tpu.memory_space<vmem>>, vector<16x16x128xf32>
    %63 = vector.shape_cast %62 : vector<16x16x128xf32> to vector<256x128xf32>
    %64 = arith.truncf %63 : vector<256x128xf32> to vector<256x128xbf16>
    %c0_76 = arith.constant 0 : index
    %c0_77 = arith.constant 0 : index
    %65 = vector.load %arg10[%c0_76, %c0_77] : memref<256x128xf32, #tpu.memory_space<vmem>>, vector<256x128xf32>
    %c6 = arith.constant 6 : index
    %c0_78 = arith.constant 0 : index
    %c0_79 = arith.constant 0 : index
    %66 = vector.load %arg4[%c6, %c0_78, %c0_79] : memref<9x128x128xbf16, #tpu.memory_space<vmem>>, vector<1x128x128xbf16>
    %67 = vector.shape_cast %66 : vector<1x128x128xbf16> to vector<128x128xbf16>
    %cst_80 = arith.constant dense<0.000000e+00> : vector<256x128xf32>
    %68 = tpu.matmul %64, %67, %cst_80 {dimension_numbers = #tpu.dot_dimension_numbers<[1], [0], [0], [1], [0, 0, 1, 1], [], []>} : vector<256x128xbf16>, vector<128x128xbf16>, vector<256x128xf32> -> vector<256x128xf32>
    %69 = arith.addf %65, %68 : vector<256x128xf32>
    %c0_81 = arith.constant 0 : index
    %c0_82 = arith.constant 0 : index
    %70 = vector.load %arg10[%c0_81, %c0_82] : memref<256x128xf32, #tpu.memory_space<vmem>>, vector<256x128xf32>
    tpu.vector_store %arg10[%c0_81, %c0_82], %69 {strides = array<i32>} : memref<256x128xf32, #tpu.memory_space<vmem>>, vector<256x128xf32>,
    %c2_83 = arith.constant 2 : index
    %c1_84 = arith.constant 1 : index
    %c0_85 = arith.constant 0 : index
    %71 = vector.load %arg9[%c2_83, %c1_84, %c0_85] : memref<18x18x128xf32, #tpu.memory_space<vmem>>, vector<16x16x128xf32>
    %72 = vector.shape_cast %71 : vector<16x16x128xf32> to vector<256x128xf32>
    %73 = arith.truncf %72 : vector<256x128xf32> to vector<256x128xbf16>
    %c0_86 = arith.constant 0 : index
    %c0_87 = arith.constant 0 : index
    %74 = vector.load %arg10[%c0_86, %c0_87] : memref<256x128xf32, #tpu.memory_space<vmem>>, vector<256x128xf32>
    %c7 = arith.constant 7 : index
    %c0_88 = arith.constant 0 : index
    %c0_89 = arith.constant 0 : index
    %75 = vector.load %arg4[%c7, %c0_88, %c0_89] : memref<9x128x128xbf16, #tpu.memory_space<vmem>>, vector<1x128x128xbf16>
    %76 = vector.shape_cast %75 : vector<1x128x128xbf16> to vector<128x128xbf16>
    %cst_90 = arith.constant dense<0.000000e+00> : vector<256x128xf32>
    %77 = tpu.matmul %73, %76, %cst_90 {dimension_numbers = #tpu.dot_dimension_numbers<[1], [0], [0], [1], [0, 0, 1, 1], [], []>} : vector<256x128xbf16>, vector<128x128xbf16>, vector<256x128xf32> -> vector<256x128xf32>
    %78 = arith.addf %74, %77 : vector<256x128xf32>
    %c0_91 = arith.constant 0 : index
    %c0_92 = arith.constant 0 : index
    %79 = vector.load %arg10[%c0_91, %c0_92] : memref<256x128xf32, #tpu.memory_space<vmem>>, vector<256x128xf32>
    tpu.vector_store %arg10[%c0_91, %c0_92], %78 {strides = array<i32>} : memref<256x128xf32, #tpu.memory_space<vmem>>, vector<256x128xf32>,
    %c2_93 = arith.constant 2 : index
    %c2_94 = arith.constant 2 : index
    %c0_95 = arith.constant 0 : index
    %80 = vector.load %arg9[%c2_93, %c2_94, %c0_95] : memref<18x18x128xf32, #tpu.memory_space<vmem>>, vector<16x16x128xf32>
    %81 = vector.shape_cast %80 : vector<16x16x128xf32> to vector<256x128xf32>
    %82 = arith.truncf %81 : vector<256x128xf32> to vector<256x128xbf16>
    %c0_96 = arith.constant 0 : index
    %c0_97 = arith.constant 0 : index
    %83 = vector.load %arg10[%c0_96, %c0_97] : memref<256x128xf32, #tpu.memory_space<vmem>>, vector<256x128xf32>
    %c8 = arith.constant 8 : index
    %c0_98 = arith.constant 0 : index
    %c0_99 = arith.constant 0 : index
    %84 = vector.load %arg4[%c8, %c0_98, %c0_99] : memref<9x128x128xbf16, #tpu.memory_space<vmem>>, vector<1x128x128xbf16>
    %85 = vector.shape_cast %84 : vector<1x128x128xbf16> to vector<128x128xbf16>
    %cst_100 = arith.constant dense<0.000000e+00> : vector<256x128xf32>
    %86 = tpu.matmul %82, %85, %cst_100 {dimension_numbers = #tpu.dot_dimension_numbers<[1], [0], [0], [1], [0, 0, 1, 1], [], []>} : vector<256x128xbf16>, vector<128x128xbf16>, vector<256x128xf32> -> vector<256x128xf32>
    %87 = arith.addf %83, %86 : vector<256x128xf32>
    %c0_101 = arith.constant 0 : index
    %c0_102 = arith.constant 0 : index
    %88 = vector.load %arg10[%c0_101, %c0_102] : memref<256x128xf32, #tpu.memory_space<vmem>>, vector<256x128xf32>
    tpu.vector_store %arg10[%c0_101, %c0_102], %87 {strides = array<i32>} : memref<256x128xf32, #tpu.memory_space<vmem>>, vector<256x128xf32>,
    %c0_103 = arith.constant 0 : index
    %c0_104 = arith.constant 0 : index
    %89 = vector.load %arg10[%c0_103, %c0_104] : memref<256x128xf32, #tpu.memory_space<vmem>>, vector<256x128xf32>
    %c0_105 = arith.constant 0 : index
    %c0_106 = arith.constant 0 : index
    %90 = vector.load %arg5[%c0_105, %c0_106] : memref<1x128xf32, #tpu.memory_space<vmem>>, vector<1x128xf32>
    %91 = vector.broadcast %90 : vector<1x128xf32> to vector<256x128xf32>
    %92 = arith.addf %89, %91 : vector<256x128xf32>
    %93 = vector.shape_cast %92 : vector<256x128xf32> to vector<1x16x16x128xf32>
    %94 = arith.truncf %93 : vector<1x16x16x128xf32> to vector<1x16x16x128xbf16>
    %c0_107 = arith.constant 0 : index
    %c0_108 = arith.constant 0 : index
    %c0_109 = arith.constant 0 : index
    %c0_110 = arith.constant 0 : index
    %95 = vector.load %arg6[%c0_107, %c0_108, %c0_109, %c0_110] : memref<1x16x16x128xbf16, #tpu.memory_space<vmem>>, vector<1x16x16x128xbf16>
    tpu.vector_store %arg6[%c0_107, %c0_108, %c0_109, %c0_110], %94 {strides = array<i32>} : memref<1x16x16x128xbf16, #tpu.memory_space<vmem>>, vector<1x16x16x128xbf16>,
    %cst_111 = arith.constant dense<0.000000e+00> : vector<128xf32>
    %96 = vector.multi_reduction <add>, %92, %cst_111 [0] : vector<256x128xf32> to vector<128xf32>
    %97 = vector.shape_cast %96 : vector<128xf32> to vector<1x128xf32>
    %98 = vector.shape_cast %97 : vector<1x128xf32> to vector<1x1x128xf32>
    %c0_112 = arith.constant 0 : index
    %c0_113 = arith.constant 0 : index
    %c0_114 = arith.constant 0 : index
    %99 = vector.load %arg7[%c0_112, %c0_113, %c0_114] : memref<1x1x128xf32, #tpu.memory_space<vmem>>, vector<1x1x128xf32>
    tpu.vector_store %arg7[%c0_112, %c0_113, %c0_114], %98 {strides = array<i32>} : memref<1x1x128xf32, #tpu.memory_space<vmem>>, vector<1x1x128xf32>,
    %100 = arith.mulf %92, %92 : vector<256x128xf32>
    %cst_115 = arith.constant dense<0.000000e+00> : vector<128xf32>
    %101 = vector.multi_reduction <add>, %100, %cst_115 [0] : vector<256x128xf32> to vector<128xf32>
    %102 = vector.shape_cast %101 : vector<128xf32> to vector<1x128xf32>
    %103 = vector.shape_cast %102 : vector<1x128xf32> to vector<1x1x128xf32>
    %c0_116 = arith.constant 0 : index
    %c0_117 = arith.constant 0 : index
    %c0_118 = arith.constant 0 : index
    %104 = vector.load %arg8[%c0_116, %c0_117, %c0_118] : memref<1x1x128xf32, #tpu.memory_space<vmem>>, vector<1x1x128xf32>
    tpu.vector_store %arg8[%c0_116, %c0_117, %c0_118], %103 {strides = array<i32>} : memref<1x1x128xf32, #tpu.memory_space<vmem>>, vector<1x1x128xf32>,
    return
  }
  func.func @transform_0(%arg0: i32) -> (i32, i32, i32, i32) {
    %c0_i32 = arith.constant 0 : i32
    %c0_i32_0 = arith.constant 0 : i32
    %c0_i32_1 = arith.constant 0 : i32
    %c0_i32_2 = arith.constant 0 : i32
    return %arg0, %c0_i32, %c0_i32_0, %c0_i32_1 : i32, i32, i32, i32
  }
  func.func @transform_1(%arg0: i32) -> (i32, i32) {
    %c0_i32 = arith.constant 0 : i32
    %c0_i32_0 = arith.constant 0 : i32
    %c0_i32_1 = arith.constant 0 : i32
    return %c0_i32, %c0_i32_0 : i32, i32
  }
  func.func @transform_2(%arg0: i32) -> (i32, i32) {
    %c0_i32 = arith.constant 0 : i32
    %c0_i32_0 = arith.constant 0 : i32
    %c0_i32_1 = arith.constant 0 : i32
    return %c0_i32, %c0_i32_0 : i32, i32
  }
  func.func @transform_3(%arg0: i32) -> (i32, i32, i32) {
    %c0_i32 = arith.constant 0 : i32
    %c0_i32_0 = arith.constant 0 : i32
    %c0_i32_1 = arith.constant 0 : i32
    %c0_i32_2 = arith.constant 0 : i32
    return %c0_i32, %c0_i32_0, %c0_i32_1 : i32, i32, i32
  }
  func.func @transform_4(%arg0: i32) -> (i32, i32) {
    %c0_i32 = arith.constant 0 : i32
    %c0_i32_0 = arith.constant 0 : i32
    %c0_i32_1 = arith.constant 0 : i32
    return %c0_i32, %c0_i32_0 : i32, i32
  }
  func.func @transform_5(%arg0: i32) -> (i32, i32, i32, i32) {
    %c0_i32 = arith.constant 0 : i32
    %c0_i32_0 = arith.constant 0 : i32
    %c0_i32_1 = arith.constant 0 : i32
    %c0_i32_2 = arith.constant 0 : i32
    return %arg0, %c0_i32, %c0_i32_0, %c0_i32_1 : i32, i32, i32, i32
  }
  func.func @transform_6(%arg0: i32) -> (i32, i32, i32) {
    %c0_i32 = arith.constant 0 : i32
    %c0_i32_0 = arith.constant 0 : i32
    %c0_i32_1 = arith.constant 0 : i32
    return %arg0, %c0_i32, %c0_i32_0 : i32, i32, i32
  }
  func.func @transform_7(%arg0: i32) -> (i32, i32, i32) {
    %c0_i32 = arith.constant 0 : i32
    %c0_i32_0 = arith.constant 0 : i32
    %c0_i32_1 = arith.constant 0 : i32
    return %arg0, %c0_i32, %c0_i32_0 : i32, i32, i32
  }
}

module attributes {stable_mosaic.version = 11 : i64} {
  func.func @_scale_shift_relu_kernel(%arg0: i32, %arg1: memref<512x128xf32, #tpu.memory_space<vmem>>, %arg2: memref<1x128xf32, #tpu.memory_space<vmem>>, %arg3: memref<1x128xf32, #tpu.memory_space<vmem>>, %arg4: memref<512x128xf32, #tpu.memory_space<vmem>>) attributes {dimension_semantics = [#tpu.dimension_semantics<parallel>], iteration_bounds = array<i64: 1>, scalar_prefetch = 0 : i64, scratch_operands = 0 : i64, tpu.core_type = #tpu.core_type<tc>, window_params = [{transform_indices = @transform_0, window_bounds = array<i64: 512, 128>}, {pipeline_mode = #tpu.pipeline_mode<synchronous>, transform_indices = @transform_1, window_bounds = array<i64: 1, 128>}, {pipeline_mode = #tpu.pipeline_mode<synchronous>, transform_indices = @transform_2, window_bounds = array<i64: 1, 128>}, {transform_indices = @transform_3, window_bounds = array<i64: 512, 128>}]} {
    %c0 = arith.constant 0 : index
    %c0_0 = arith.constant 0 : index
    %0 = vector.load %arg1[%c0, %c0_0] : memref<512x128xf32, #tpu.memory_space<vmem>>, vector<512x128xf32>
    %c0_1 = arith.constant 0 : index
    %c0_2 = arith.constant 0 : index
    %1 = vector.load %arg2[%c0_1, %c0_2] : memref<1x128xf32, #tpu.memory_space<vmem>>, vector<1x128xf32>
    %2 = vector.broadcast %1 : vector<1x128xf32> to vector<512x128xf32>
    %3 = arith.mulf %0, %2 : vector<512x128xf32>
    %c0_3 = arith.constant 0 : index
    %c0_4 = arith.constant 0 : index
    %4 = vector.load %arg3[%c0_3, %c0_4] : memref<1x128xf32, #tpu.memory_space<vmem>>, vector<1x128xf32>
    %5 = vector.broadcast %4 : vector<1x128xf32> to vector<512x128xf32>
    %6 = arith.addf %3, %5 : vector<512x128xf32>
    %cst = arith.constant 0.000000e+00 : f32
    %7 = vector.broadcast %cst : f32 to vector<512x128xf32>
    %8 = arith.maximumf %6, %7 : vector<512x128xf32>
    %c0_5 = arith.constant 0 : index
    %c0_6 = arith.constant 0 : index
    %9 = vector.load %arg4[%c0_5, %c0_6] : memref<512x128xf32, #tpu.memory_space<vmem>>, vector<512x128xf32>
    tpu.vector_store %arg4[%c0_5, %c0_6], %8 {strides = array<i32>} : memref<512x128xf32, #tpu.memory_space<vmem>>, vector<512x128xf32>,
    return
  }
  func.func @transform_0(%arg0: i32) -> (i32, i32) {
    %c0_i32 = arith.constant 0 : i32
    %c0_i32_0 = arith.constant 0 : i32
    return %arg0, %c0_i32 : i32, i32
  }
  func.func @transform_1(%arg0: i32) -> (i32, i32) {
    %c0_i32 = arith.constant 0 : i32
    %c0_i32_0 = arith.constant 0 : i32
    %c0_i32_1 = arith.constant 0 : i32
    return %c0_i32, %c0_i32_0 : i32, i32
  }
  func.func @transform_2(%arg0: i32) -> (i32, i32) {
    %c0_i32 = arith.constant 0 : i32
    %c0_i32_0 = arith.constant 0 : i32
    %c0_i32_1 = arith.constant 0 : i32
    return %c0_i32, %c0_i32_0 : i32, i32
  }
  func.func @transform_3(%arg0: i32) -> (i32, i32) {
    %c0_i32 = arith.constant 0 : i32
    %c0_i32_0 = arith.constant 0 : i32
    return %arg0, %c0_i32 : i32, i32
  }
}

module attributes {stable_mosaic.version = 11 : i64} {
  func.func @_conv3x3_kernel(%arg0: i32, %arg1: memref<1x16x16x128xbf16, #tpu.memory_space<vmem>>, %arg2: memref<1x128xf32, #tpu.memory_space<vmem>>, %arg3: memref<1x128xf32, #tpu.memory_space<vmem>>, %arg4: memref<9x128x128xbf16, #tpu.memory_space<vmem>>, %arg5: memref<1x128xf32, #tpu.memory_space<vmem>>, %arg6: memref<1x16x16x128xf32, #tpu.memory_space<vmem>>, %arg7: memref<1x1x128xf32, #tpu.memory_space<vmem>>, %arg8: memref<1x1x128xf32, #tpu.memory_space<vmem>>, %arg9: memref<18x18x128xf32, #tpu.memory_space<vmem>>, %arg10: memref<256x128xf32, #tpu.memory_space<vmem>>) attributes {dimension_semantics = [#tpu.dimension_semantics<parallel>], iteration_bounds = array<i64: 2>, scalar_prefetch = 0 : i64, scratch_operands = 2 : i64, tpu.core_type = #tpu.core_type<tc>, window_params = [{transform_indices = @transform_0, window_bounds = array<i64: 1, 16, 16, 128>}, {pipeline_mode = #tpu.pipeline_mode<synchronous>, transform_indices = @transform_1, window_bounds = array<i64: 1, 128>}, {pipeline_mode = #tpu.pipeline_mode<synchronous>, transform_indices = @transform_2, window_bounds = array<i64: 1, 128>}, {pipeline_mode = #tpu.pipeline_mode<synchronous>, transform_indices = @transform_3, window_bounds = array<i64: 9, 128, 128>}, {pipeline_mode = #tpu.pipeline_mode<synchronous>, transform_indices = @transform_4, window_bounds = array<i64: 1, 128>}, {transform_indices = @transform_5, window_bounds = array<i64: 1, 16, 16, 128>}, {transform_indices = @transform_6, window_bounds = array<i64: 1, 1, 128>}, {transform_indices = @transform_7, window_bounds = array<i64: 1, 1, 128>}]} {
    %c0 = arith.constant 0 : index
    %c0_0 = arith.constant 0 : index
    %c0_1 = arith.constant 0 : index
    %c0_2 = arith.constant 0 : index
    %0 = vector.load %arg1[%c0, %c0_0, %c0_1, %c0_2] : memref<1x16x16x128xbf16, #tpu.memory_space<vmem>>, vector<1x16x16x128xbf16>
    %1 = vector.shape_cast %0 : vector<1x16x16x128xbf16> to vector<16x16x128xbf16>
    %2 = arith.extf %1 : vector<16x16x128xbf16> to vector<16x16x128xf32>
    %c0_3 = arith.constant 0 : index
    %c0_4 = arith.constant 0 : index
    %3 = vector.load %arg2[%c0_3, %c0_4] : memref<1x128xf32, #tpu.memory_space<vmem>>, vector<1x128xf32>
    %4 = vector.shape_cast %3 : vector<1x128xf32> to vector<1x1x128xf32>
    %5 = vector.broadcast %4 : vector<1x1x128xf32> to vector<16x16x128xf32>
    %6 = arith.mulf %2, %5 : vector<16x16x128xf32>
    %c0_5 = arith.constant 0 : index
    %c0_6 = arith.constant 0 : index
    %7 = vector.load %arg3[%c0_5, %c0_6] : memref<1x128xf32, #tpu.memory_space<vmem>>, vector<1x128xf32>
    %8 = vector.shape_cast %7 : vector<1x128xf32> to vector<1x1x128xf32>
    %9 = vector.broadcast %8 : vector<1x1x128xf32> to vector<16x16x128xf32>
    %10 = arith.addf %6, %9 : vector<16x16x128xf32>
    %cst = arith.constant 0.000000e+00 : f32
    %11 = vector.broadcast %cst : f32 to vector<16x16x128xf32>
    %12 = arith.maximumf %10, %11 : vector<16x16x128xf32>
    %cst_7 = arith.constant 0.000000e+00 : f32
    %13 = vector.broadcast %cst_7 : f32 to vector<18x18x128xf32>
    %c0_8 = arith.constant 0 : index
    %c0_9 = arith.constant 0 : index
    %c0_10 = arith.constant 0 : index
    %14 = vector.load %arg9[%c0_8, %c0_9, %c0_10] : memref<18x18x128xf32, #tpu.memory_space<vmem>>, vector<18x18x128xf32>
    tpu.vector_store %arg9[%c0_8, %c0_9, %c0_10], %13 {strides = array<i32>} : memref<18x18x128xf32, #tpu.memory_space<vmem>>, vector<18x18x128xf32>,
    %c1 = arith.constant 1 : index
    %c1_11 = arith.constant 1 : index
    %c0_12 = arith.constant 0 : index
    %15 = vector.load %arg9[%c1, %c1_11, %c0_12] : memref<18x18x128xf32, #tpu.memory_space<vmem>>, vector<16x16x128xf32>
    tpu.vector_store %arg9[%c1, %c1_11, %c0_12], %12 {strides = array<i32>} : memref<18x18x128xf32, #tpu.memory_space<vmem>>, vector<16x16x128xf32>,
    %cst_13 = arith.constant 0.000000e+00 : f32
    %16 = vector.broadcast %cst_13 : f32 to vector<256x128xf32>
    %c0_14 = arith.constant 0 : index
    %c0_15 = arith.constant 0 : index
    %17 = vector.load %arg10[%c0_14, %c0_15] : memref<256x128xf32, #tpu.memory_space<vmem>>, vector<256x128xf32>
    tpu.vector_store %arg10[%c0_14, %c0_15], %16 {strides = array<i32>} : memref<256x128xf32, #tpu.memory_space<vmem>>, vector<256x128xf32>,
    %c0_16 = arith.constant 0 : index
    %c0_17 = arith.constant 0 : index
    %c0_18 = arith.constant 0 : index
    %18 = vector.load %arg9[%c0_16, %c0_17, %c0_18] : memref<18x18x128xf32, #tpu.memory_space<vmem>>, vector<16x16x128xf32>
    %19 = vector.shape_cast %18 : vector<16x16x128xf32> to vector<256x128xf32>
    %20 = arith.truncf %19 : vector<256x128xf32> to vector<256x128xbf16>
    %c0_19 = arith.constant 0 : index
    %c0_20 = arith.constant 0 : index
    %21 = vector.load %arg10[%c0_19, %c0_20] : memref<256x128xf32, #tpu.memory_space<vmem>>, vector<256x128xf32>
    %c0_21 = arith.constant 0 : index
    %c0_22 = arith.constant 0 : index
    %c0_23 = arith.constant 0 : index
    %22 = vector.load %arg4[%c0_21, %c0_22, %c0_23] : memref<9x128x128xbf16, #tpu.memory_space<vmem>>, vector<1x128x128xbf16>
    %23 = vector.shape_cast %22 : vector<1x128x128xbf16> to vector<128x128xbf16>
    %cst_24 = arith.constant dense<0.000000e+00> : vector<256x128xf32>
    %24 = tpu.matmul %20, %23, %cst_24 {dimension_numbers = #tpu.dot_dimension_numbers<[1], [0], [0], [1], [0, 0, 1, 1], [], []>} : vector<256x128xbf16>, vector<128x128xbf16>, vector<256x128xf32> -> vector<256x128xf32>
    %25 = arith.addf %21, %24 : vector<256x128xf32>
    %c0_25 = arith.constant 0 : index
    %c0_26 = arith.constant 0 : index
    %26 = vector.load %arg10[%c0_25, %c0_26] : memref<256x128xf32, #tpu.memory_space<vmem>>, vector<256x128xf32>
    tpu.vector_store %arg10[%c0_25, %c0_26], %25 {strides = array<i32>} : memref<256x128xf32, #tpu.memory_space<vmem>>, vector<256x128xf32>,
    %c0_27 = arith.constant 0 : index
    %c1_28 = arith.constant 1 : index
    %c0_29 = arith.constant 0 : index
    %27 = vector.load %arg9[%c0_27, %c1_28, %c0_29] : memref<18x18x128xf32, #tpu.memory_space<vmem>>, vector<16x16x128xf32>
    %28 = vector.shape_cast %27 : vector<16x16x128xf32> to vector<256x128xf32>
    %29 = arith.truncf %28 : vector<256x128xf32> to vector<256x128xbf16>
    %c0_30 = arith.constant 0 : index
    %c0_31 = arith.constant 0 : index
    %30 = vector.load %arg10[%c0_30, %c0_31] : memref<256x128xf32, #tpu.memory_space<vmem>>, vector<256x128xf32>
    %c1_32 = arith.constant 1 : index
    %c0_33 = arith.constant 0 : index
    %c0_34 = arith.constant 0 : index
    %31 = vector.load %arg4[%c1_32, %c0_33, %c0_34] : memref<9x128x128xbf16, #tpu.memory_space<vmem>>, vector<1x128x128xbf16>
    %32 = vector.shape_cast %31 : vector<1x128x128xbf16> to vector<128x128xbf16>
    %cst_35 = arith.constant dense<0.000000e+00> : vector<256x128xf32>
    %33 = tpu.matmul %29, %32, %cst_35 {dimension_numbers = #tpu.dot_dimension_numbers<[1], [0], [0], [1], [0, 0, 1, 1], [], []>} : vector<256x128xbf16>, vector<128x128xbf16>, vector<256x128xf32> -> vector<256x128xf32>
    %34 = arith.addf %30, %33 : vector<256x128xf32>
    %c0_36 = arith.constant 0 : index
    %c0_37 = arith.constant 0 : index
    %35 = vector.load %arg10[%c0_36, %c0_37] : memref<256x128xf32, #tpu.memory_space<vmem>>, vector<256x128xf32>
    tpu.vector_store %arg10[%c0_36, %c0_37], %34 {strides = array<i32>} : memref<256x128xf32, #tpu.memory_space<vmem>>, vector<256x128xf32>,
    %c0_38 = arith.constant 0 : index
    %c2 = arith.constant 2 : index
    %c0_39 = arith.constant 0 : index
    %36 = vector.load %arg9[%c0_38, %c2, %c0_39] : memref<18x18x128xf32, #tpu.memory_space<vmem>>, vector<16x16x128xf32>
    %37 = vector.shape_cast %36 : vector<16x16x128xf32> to vector<256x128xf32>
    %38 = arith.truncf %37 : vector<256x128xf32> to vector<256x128xbf16>
    %c0_40 = arith.constant 0 : index
    %c0_41 = arith.constant 0 : index
    %39 = vector.load %arg10[%c0_40, %c0_41] : memref<256x128xf32, #tpu.memory_space<vmem>>, vector<256x128xf32>
    %c2_42 = arith.constant 2 : index
    %c0_43 = arith.constant 0 : index
    %c0_44 = arith.constant 0 : index
    %40 = vector.load %arg4[%c2_42, %c0_43, %c0_44] : memref<9x128x128xbf16, #tpu.memory_space<vmem>>, vector<1x128x128xbf16>
    %41 = vector.shape_cast %40 : vector<1x128x128xbf16> to vector<128x128xbf16>
    %cst_45 = arith.constant dense<0.000000e+00> : vector<256x128xf32>
    %42 = tpu.matmul %38, %41, %cst_45 {dimension_numbers = #tpu.dot_dimension_numbers<[1], [0], [0], [1], [0, 0, 1, 1], [], []>} : vector<256x128xbf16>, vector<128x128xbf16>, vector<256x128xf32> -> vector<256x128xf32>
    %43 = arith.addf %39, %42 : vector<256x128xf32>
    %c0_46 = arith.constant 0 : index
    %c0_47 = arith.constant 0 : index
    %44 = vector.load %arg10[%c0_46, %c0_47] : memref<256x128xf32, #tpu.memory_space<vmem>>, vector<256x128xf32>
    tpu.vector_store %arg10[%c0_46, %c0_47], %43 {strides = array<i32>} : memref<256x128xf32, #tpu.memory_space<vmem>>, vector<256x128xf32>,
    %c1_48 = arith.constant 1 : index
    %c0_49 = arith.constant 0 : index
    %c0_50 = arith.constant 0 : index
    %45 = vector.load %arg9[%c1_48, %c0_49, %c0_50] : memref<18x18x128xf32, #tpu.memory_space<vmem>>, vector<16x16x128xf32>
    %46 = vector.shape_cast %45 : vector<16x16x128xf32> to vector<256x128xf32>
    %47 = arith.truncf %46 : vector<256x128xf32> to vector<256x128xbf16>
    %c0_51 = arith.constant 0 : index
    %c0_52 = arith.constant 0 : index
    %48 = vector.load %arg10[%c0_51, %c0_52] : memref<256x128xf32, #tpu.memory_space<vmem>>, vector<256x128xf32>
    %c3 = arith.constant 3 : index
    %c0_53 = arith.constant 0 : index
    %c0_54 = arith.constant 0 : index
    %49 = vector.load %arg4[%c3, %c0_53, %c0_54] : memref<9x128x128xbf16, #tpu.memory_space<vmem>>, vector<1x128x128xbf16>
    %50 = vector.shape_cast %49 : vector<1x128x128xbf16> to vector<128x128xbf16>
    %cst_55 = arith.constant dense<0.000000e+00> : vector<256x128xf32>
    %51 = tpu.matmul %47, %50, %cst_55 {dimension_numbers = #tpu.dot_dimension_numbers<[1], [0], [0], [1], [0, 0, 1, 1], [], []>} : vector<256x128xbf16>, vector<128x128xbf16>, vector<256x128xf32> -> vector<256x128xf32>
    %52 = arith.addf %48, %51 : vector<256x128xf32>
    %c0_56 = arith.constant 0 : index
    %c0_57 = arith.constant 0 : index
    %53 = vector.load %arg10[%c0_56, %c0_57] : memref<256x128xf32, #tpu.memory_space<vmem>>, vector<256x128xf32>
    tpu.vector_store %arg10[%c0_56, %c0_57], %52 {strides = array<i32>} : memref<256x128xf32, #tpu.memory_space<vmem>>, vector<256x128xf32>,
    %c1_58 = arith.constant 1 : index
    %c1_59 = arith.constant 1 : index
    %c0_60 = arith.constant 0 : index
    %54 = vector.load %arg9[%c1_58, %c1_59, %c0_60] : memref<18x18x128xf32, #tpu.memory_space<vmem>>, vector<16x16x128xf32>
    %55 = vector.shape_cast %54 : vector<16x16x128xf32> to vector<256x128xf32>
    %56 = arith.truncf %55 : vector<256x128xf32> to vector<256x128xbf16>
    %c0_61 = arith.constant 0 : index
    %c0_62 = arith.constant 0 : index
    %57 = vector.load %arg10[%c0_61, %c0_62] : memref<256x128xf32, #tpu.memory_space<vmem>>, vector<256x128xf32>
    %c4 = arith.constant 4 : index
    %c0_63 = arith.constant 0 : index
    %c0_64 = arith.constant 0 : index
    %58 = vector.load %arg4[%c4, %c0_63, %c0_64] : memref<9x128x128xbf16, #tpu.memory_space<vmem>>, vector<1x128x128xbf16>
    %59 = vector.shape_cast %58 : vector<1x128x128xbf16> to vector<128x128xbf16>
    %cst_65 = arith.constant dense<0.000000e+00> : vector<256x128xf32>
    %60 = tpu.matmul %56, %59, %cst_65 {dimension_numbers = #tpu.dot_dimension_numbers<[1], [0], [0], [1], [0, 0, 1, 1], [], []>} : vector<256x128xbf16>, vector<128x128xbf16>, vector<256x128xf32> -> vector<256x128xf32>
    %61 = arith.addf %57, %60 : vector<256x128xf32>
    %c0_66 = arith.constant 0 : index
    %c0_67 = arith.constant 0 : index
    %62 = vector.load %arg10[%c0_66, %c0_67] : memref<256x128xf32, #tpu.memory_space<vmem>>, vector<256x128xf32>
    tpu.vector_store %arg10[%c0_66, %c0_67], %61 {strides = array<i32>} : memref<256x128xf32, #tpu.memory_space<vmem>>, vector<256x128xf32>,
    %c1_68 = arith.constant 1 : index
    %c2_69 = arith.constant 2 : index
    %c0_70 = arith.constant 0 : index
    %63 = vector.load %arg9[%c1_68, %c2_69, %c0_70] : memref<18x18x128xf32, #tpu.memory_space<vmem>>, vector<16x16x128xf32>
    %64 = vector.shape_cast %63 : vector<16x16x128xf32> to vector<256x128xf32>
    %65 = arith.truncf %64 : vector<256x128xf32> to vector<256x128xbf16>
    %c0_71 = arith.constant 0 : index
    %c0_72 = arith.constant 0 : index
    %66 = vector.load %arg10[%c0_71, %c0_72] : memref<256x128xf32, #tpu.memory_space<vmem>>, vector<256x128xf32>
    %c5 = arith.constant 5 : index
    %c0_73 = arith.constant 0 : index
    %c0_74 = arith.constant 0 : index
    %67 = vector.load %arg4[%c5, %c0_73, %c0_74] : memref<9x128x128xbf16, #tpu.memory_space<vmem>>, vector<1x128x128xbf16>
    %68 = vector.shape_cast %67 : vector<1x128x128xbf16> to vector<128x128xbf16>
    %cst_75 = arith.constant dense<0.000000e+00> : vector<256x128xf32>
    %69 = tpu.matmul %65, %68, %cst_75 {dimension_numbers = #tpu.dot_dimension_numbers<[1], [0], [0], [1], [0, 0, 1, 1], [], []>} : vector<256x128xbf16>, vector<128x128xbf16>, vector<256x128xf32> -> vector<256x128xf32>
    %70 = arith.addf %66, %69 : vector<256x128xf32>
    %c0_76 = arith.constant 0 : index
    %c0_77 = arith.constant 0 : index
    %71 = vector.load %arg10[%c0_76, %c0_77] : memref<256x128xf32, #tpu.memory_space<vmem>>, vector<256x128xf32>
    tpu.vector_store %arg10[%c0_76, %c0_77], %70 {strides = array<i32>} : memref<256x128xf32, #tpu.memory_space<vmem>>, vector<256x128xf32>,
    %c2_78 = arith.constant 2 : index
    %c0_79 = arith.constant 0 : index
    %c0_80 = arith.constant 0 : index
    %72 = vector.load %arg9[%c2_78, %c0_79, %c0_80] : memref<18x18x128xf32, #tpu.memory_space<vmem>>, vector<16x16x128xf32>
    %73 = vector.shape_cast %72 : vector<16x16x128xf32> to vector<256x128xf32>
    %74 = arith.truncf %73 : vector<256x128xf32> to vector<256x128xbf16>
    %c0_81 = arith.constant 0 : index
    %c0_82 = arith.constant 0 : index
    %75 = vector.load %arg10[%c0_81, %c0_82] : memref<256x128xf32, #tpu.memory_space<vmem>>, vector<256x128xf32>
    %c6 = arith.constant 6 : index
    %c0_83 = arith.constant 0 : index
    %c0_84 = arith.constant 0 : index
    %76 = vector.load %arg4[%c6, %c0_83, %c0_84] : memref<9x128x128xbf16, #tpu.memory_space<vmem>>, vector<1x128x128xbf16>
    %77 = vector.shape_cast %76 : vector<1x128x128xbf16> to vector<128x128xbf16>
    %cst_85 = arith.constant dense<0.000000e+00> : vector<256x128xf32>
    %78 = tpu.matmul %74, %77, %cst_85 {dimension_numbers = #tpu.dot_dimension_numbers<[1], [0], [0], [1], [0, 0, 1, 1], [], []>} : vector<256x128xbf16>, vector<128x128xbf16>, vector<256x128xf32> -> vector<256x128xf32>
    %79 = arith.addf %75, %78 : vector<256x128xf32>
    %c0_86 = arith.constant 0 : index
    %c0_87 = arith.constant 0 : index
    %80 = vector.load %arg10[%c0_86, %c0_87] : memref<256x128xf32, #tpu.memory_space<vmem>>, vector<256x128xf32>
    tpu.vector_store %arg10[%c0_86, %c0_87], %79 {strides = array<i32>} : memref<256x128xf32, #tpu.memory_space<vmem>>, vector<256x128xf32>,
    %c2_88 = arith.constant 2 : index
    %c1_89 = arith.constant 1 : index
    %c0_90 = arith.constant 0 : index
    %81 = vector.load %arg9[%c2_88, %c1_89, %c0_90] : memref<18x18x128xf32, #tpu.memory_space<vmem>>, vector<16x16x128xf32>
    %82 = vector.shape_cast %81 : vector<16x16x128xf32> to vector<256x128xf32>
    %83 = arith.truncf %82 : vector<256x128xf32> to vector<256x128xbf16>
    %c0_91 = arith.constant 0 : index
    %c0_92 = arith.constant 0 : index
    %84 = vector.load %arg10[%c0_91, %c0_92] : memref<256x128xf32, #tpu.memory_space<vmem>>, vector<256x128xf32>
    %c7 = arith.constant 7 : index
    %c0_93 = arith.constant 0 : index
    %c0_94 = arith.constant 0 : index
    %85 = vector.load %arg4[%c7, %c0_93, %c0_94] : memref<9x128x128xbf16, #tpu.memory_space<vmem>>, vector<1x128x128xbf16>
    %86 = vector.shape_cast %85 : vector<1x128x128xbf16> to vector<128x128xbf16>
    %cst_95 = arith.constant dense<0.000000e+00> : vector<256x128xf32>
    %87 = tpu.matmul %83, %86, %cst_95 {dimension_numbers = #tpu.dot_dimension_numbers<[1], [0], [0], [1], [0, 0, 1, 1], [], []>} : vector<256x128xbf16>, vector<128x128xbf16>, vector<256x128xf32> -> vector<256x128xf32>
    %88 = arith.addf %84, %87 : vector<256x128xf32>
    %c0_96 = arith.constant 0 : index
    %c0_97 = arith.constant 0 : index
    %89 = vector.load %arg10[%c0_96, %c0_97] : memref<256x128xf32, #tpu.memory_space<vmem>>, vector<256x128xf32>
    tpu.vector_store %arg10[%c0_96, %c0_97], %88 {strides = array<i32>} : memref<256x128xf32, #tpu.memory_space<vmem>>, vector<256x128xf32>,
    %c2_98 = arith.constant 2 : index
    %c2_99 = arith.constant 2 : index
    %c0_100 = arith.constant 0 : index
    %90 = vector.load %arg9[%c2_98, %c2_99, %c0_100] : memref<18x18x128xf32, #tpu.memory_space<vmem>>, vector<16x16x128xf32>
    %91 = vector.shape_cast %90 : vector<16x16x128xf32> to vector<256x128xf32>
    %92 = arith.truncf %91 : vector<256x128xf32> to vector<256x128xbf16>
    %c0_101 = arith.constant 0 : index
    %c0_102 = arith.constant 0 : index
    %93 = vector.load %arg10[%c0_101, %c0_102] : memref<256x128xf32, #tpu.memory_space<vmem>>, vector<256x128xf32>
    %c8 = arith.constant 8 : index
    %c0_103 = arith.constant 0 : index
    %c0_104 = arith.constant 0 : index
    %94 = vector.load %arg4[%c8, %c0_103, %c0_104] : memref<9x128x128xbf16, #tpu.memory_space<vmem>>, vector<1x128x128xbf16>
    %95 = vector.shape_cast %94 : vector<1x128x128xbf16> to vector<128x128xbf16>
    %cst_105 = arith.constant dense<0.000000e+00> : vector<256x128xf32>
    %96 = tpu.matmul %92, %95, %cst_105 {dimension_numbers = #tpu.dot_dimension_numbers<[1], [0], [0], [1], [0, 0, 1, 1], [], []>} : vector<256x128xbf16>, vector<128x128xbf16>, vector<256x128xf32> -> vector<256x128xf32>
    %97 = arith.addf %93, %96 : vector<256x128xf32>
    %c0_106 = arith.constant 0 : index
    %c0_107 = arith.constant 0 : index
    %98 = vector.load %arg10[%c0_106, %c0_107] : memref<256x128xf32, #tpu.memory_space<vmem>>, vector<256x128xf32>
    tpu.vector_store %arg10[%c0_106, %c0_107], %97 {strides = array<i32>} : memref<256x128xf32, #tpu.memory_space<vmem>>, vector<256x128xf32>,
    %c0_108 = arith.constant 0 : index
    %c0_109 = arith.constant 0 : index
    %99 = vector.load %arg10[%c0_108, %c0_109] : memref<256x128xf32, #tpu.memory_space<vmem>>, vector<256x128xf32>
    %c0_110 = arith.constant 0 : index
    %c0_111 = arith.constant 0 : index
    %100 = vector.load %arg5[%c0_110, %c0_111] : memref<1x128xf32, #tpu.memory_space<vmem>>, vector<1x128xf32>
    %101 = vector.broadcast %100 : vector<1x128xf32> to vector<256x128xf32>
    %102 = arith.addf %99, %101 : vector<256x128xf32>
    %103 = vector.shape_cast %102 : vector<256x128xf32> to vector<1x16x16x128xf32>
    %c0_112 = arith.constant 0 : index
    %c0_113 = arith.constant 0 : index
    %c0_114 = arith.constant 0 : index
    %c0_115 = arith.constant 0 : index
    %104 = vector.load %arg6[%c0_112, %c0_113, %c0_114, %c0_115] : memref<1x16x16x128xf32, #tpu.memory_space<vmem>>, vector<1x16x16x128xf32>
    tpu.vector_store %arg6[%c0_112, %c0_113, %c0_114, %c0_115], %103 {strides = array<i32>} : memref<1x16x16x128xf32, #tpu.memory_space<vmem>>, vector<1x16x16x128xf32>,
    %cst_116 = arith.constant dense<0.000000e+00> : vector<128xf32>
    %105 = vector.multi_reduction <add>, %102, %cst_116 [0] : vector<256x128xf32> to vector<128xf32>
    %106 = vector.shape_cast %105 : vector<128xf32> to vector<1x128xf32>
    %107 = vector.shape_cast %106 : vector<1x128xf32> to vector<1x1x128xf32>
    %c0_117 = arith.constant 0 : index
    %c0_118 = arith.constant 0 : index
    %c0_119 = arith.constant 0 : index
    %108 = vector.load %arg7[%c0_117, %c0_118, %c0_119] : memref<1x1x128xf32, #tpu.memory_space<vmem>>, vector<1x1x128xf32>
    tpu.vector_store %arg7[%c0_117, %c0_118, %c0_119], %107 {strides = array<i32>} : memref<1x1x128xf32, #tpu.memory_space<vmem>>, vector<1x1x128xf32>,
    %109 = arith.mulf %102, %102 : vector<256x128xf32>
    %cst_120 = arith.constant dense<0.000000e+00> : vector<128xf32>
    %110 = vector.multi_reduction <add>, %109, %cst_120 [0] : vector<256x128xf32> to vector<128xf32>
    %111 = vector.shape_cast %110 : vector<128xf32> to vector<1x128xf32>
    %112 = vector.shape_cast %111 : vector<1x128xf32> to vector<1x1x128xf32>
    %c0_121 = arith.constant 0 : index
    %c0_122 = arith.constant 0 : index
    %c0_123 = arith.constant 0 : index
    %113 = vector.load %arg8[%c0_121, %c0_122, %c0_123] : memref<1x1x128xf32, #tpu.memory_space<vmem>>, vector<1x1x128xf32>
    tpu.vector_store %arg8[%c0_121, %c0_122, %c0_123], %112 {strides = array<i32>} : memref<1x1x128xf32, #tpu.memory_space<vmem>>, vector<1x1x128xf32>,
    return
  }
  func.func @transform_0(%arg0: i32) -> (i32, i32, i32, i32) {
    %c0_i32 = arith.constant 0 : i32
    %c0_i32_0 = arith.constant 0 : i32
    %c0_i32_1 = arith.constant 0 : i32
    %c0_i32_2 = arith.constant 0 : i32
    return %arg0, %c0_i32, %c0_i32_0, %c0_i32_1 : i32, i32, i32, i32
  }
  func.func @transform_1(%arg0: i32) -> (i32, i32) {
    %c0_i32 = arith.constant 0 : i32
    %c0_i32_0 = arith.constant 0 : i32
    %c0_i32_1 = arith.constant 0 : i32
    return %c0_i32, %c0_i32_0 : i32, i32
  }
  func.func @transform_2(%arg0: i32) -> (i32, i32) {
    %c0_i32 = arith.constant 0 : i32
    %c0_i32_0 = arith.constant 0 : i32
    %c0_i32_1 = arith.constant 0 : i32
    return %c0_i32, %c0_i32_0 : i32, i32
  }
  func.func @transform_3(%arg0: i32) -> (i32, i32, i32) {
    %c0_i32 = arith.constant 0 : i32
    %c0_i32_0 = arith.constant 0 : i32
    %c0_i32_1 = arith.constant 0 : i32
    %c0_i32_2 = arith.constant 0 : i32
    return %c0_i32, %c0_i32_0, %c0_i32_1 : i32, i32, i32
  }
  func.func @transform_4(%arg0: i32) -> (i32, i32) {
    %c0_i32 = arith.constant 0 : i32
    %c0_i32_0 = arith.constant 0 : i32
    %c0_i32_1 = arith.constant 0 : i32
    return %c0_i32, %c0_i32_0 : i32, i32
  }
  func.func @transform_5(%arg0: i32) -> (i32, i32, i32, i32) {
    %c0_i32 = arith.constant 0 : i32
    %c0_i32_0 = arith.constant 0 : i32
    %c0_i32_1 = arith.constant 0 : i32
    %c0_i32_2 = arith.constant 0 : i32
    return %arg0, %c0_i32, %c0_i32_0, %c0_i32_1 : i32, i32, i32, i32
  }
  func.func @transform_6(%arg0: i32) -> (i32, i32, i32) {
    %c0_i32 = arith.constant 0 : i32
    %c0_i32_0 = arith.constant 0 : i32
    %c0_i32_1 = arith.constant 0 : i32
    return %arg0, %c0_i32, %c0_i32_0 : i32, i32, i32
  }
  func.func @transform_7(%arg0: i32) -> (i32, i32, i32) {
    %c0_i32 = arith.constant 0 : i32
    %c0_i32_0 = arith.constant 0 : i32
    %c0_i32_1 = arith.constant 0 : i32
    return %arg0, %c0_i32, %c0_i32_0 : i32, i32, i32
  }
}

</mosaic_0001>

<bundles_post_ra>
// kernel: double_conv_forward.5
= control target key start
LH: loop header
LB: loop body
LE: loop exit
PB: predicated region body
PF: predicated region fallthrough
CT: control target
= control target key end

     0   :  { %s896_s0 = inlined_call_operand.vmem [shape: f32[512,128], index: 0, kind: input, shape index: {}]   ;;  %s897_s1 = inlined_call_operand.vmem [shape: f32[1,128], index: 1, kind: input, shape index: {}]   ;;  %s898_s2 = inlined_call_operand.vmem [shape: f32[1,128], index: 2, kind: input, shape index: {}]   ;;  %s899_s3 = inlined_call_operand.vmem [shape: f32[512,128], index: 3, kind: output, shape index: {}]  }
   0x1   :  { %v14_v0 = vld [vmem:[%s896_s0] sm:$0xff]  ;;  %v15_v4 = vld [vmem:[%s896_s0 + $0x8] sm:$0xff]  ;;  %v16_v5 = vld [vmem:[%s896_s0 + $0x10] sm:$0xff] }
   0x2   :  { %v380_v1 = vld [vmem:[%s897_s1] ss:$0 sm:$0xff]  ;;  %v17_v6 = vld [vmem:[%s896_s0 + $0x18] sm:$0xff]  ;;  %v19_v11 = vld [vmem:[%s896_s0 + $0x28] sm:$0xff] }
   0x3   :  { %v385_v2 = vld [vmem:[%s898_s2] ss:$0 sm:$0xff]  ;;  %v85_v3 = vmul.f32 %v380_v1, %v14_v0  ;;  %v86_v7 = vmul.f32 %v380_v1, %v15_v4  ;;  %v87_v8 = vmul.f32 %v380_v1, %v16_v5  ;;  %v88_v9 = vmul.f32 %v380_v1, %v17_v6  ;;  %v20_v12 = vld [vmem:[%s896_s0 + $0x30] sm:$0xff]  ;;  %v21_v17 = vld [vmem:[%s896_s0 + $0x38] sm:$0xff] }
   0x4   :  { %v18_v10 = vld [vmem:[%s896_s0 + $0x20] sm:$0xff]  ;;  %v90_v15 = vmul.f32 %v380_v1, %v19_v11  ;;  %v91_v16 = vmul.f32 %v380_v1, %v20_v12  ;;  %v92_v21 = vmul.f32 %v380_v1, %v21_v17  ;;  %v23_v27 = vld [vmem:[%s896_s0 + $0x48] sm:$0xff]  ;;  %v24_v28 = vld [vmem:[%s896_s0 + $0x50] sm:$0xff] }
   0x5   :  { %v156_v13 = vadd.f32 %v385_v2, %v85_v3  ;;  %v89_v14 = vmul.f32 %v380_v1, %v18_v10  ;;  %v157_v18 = vadd.f32 %v385_v2, %v86_v7  ;;  %v158_v19 = vadd.f32 %v385_v2, %v87_v8  ;;  %v22_v22 = vld [vmem:[%s896_s0 + $0x40] sm:$0xff]  ;;  %v25_v29 = vld [vmem:[%s896_s0 + $0x58] sm:$0xff]  ;;  %v27_v35 = vld [vmem:[%s896_s0 + $0x68] sm:$0xff] }
   0x6   :  { %v159_v20 = vadd.f32 %v385_v2, %v88_v9  ;;  %v161_v25 = vadd.f32 %v385_v2, %v90_v15  ;;  %v162_v26 = vadd.f32 %v385_v2, %v91_v16  ;;  %v163_v33 = vadd.f32 %v385_v2, %v92_v21  ;;  %v26_v34 = vld [vmem:[%s896_s0 + $0x60] sm:$0xff]  ;;  %v28_v36 = vld [vmem:[%s896_s0 + $0x70] sm:$0xff]  ;;  %v29_v41 = vld [vmem:[%s896_s0 + $0x78] sm:$0xff] }
   0x7   :  { %v220_v23 = vmax.f32 %v156_v13, 0.0  ;;  %v160_v24 = vadd.f32 %v385_v2, %v89_v14  ;;  %v221_v30 = vmax.f32 %v157_v18, 0.0  ;;  %v222_v31 = vmax.f32 %v158_v19, 0.0  ;;  %v30_v54 = vld [vmem:[%s896_s0 + $0x80] sm:$0xff]  ;;  %v31_v59 = vld [vmem:[%s896_s0 + $0x88] sm:$0xff]  ;;  %v32_v60 = vld [vmem:[%s896_s0 + $0x90] sm:$0xff] }
   0x8   :  { %v223_v32 = vmax.f32 %v159_v20, 0.0  ;;  %v225_v38 = vmax.f32 %v161_v25, 0.0  ;;  %v226_v39 = vmax.f32 %v162_v26, 0.0  ;;  %v93_v40 = vmul.f32 %v380_v1, %v22_v22  ;;  %v33_v61 = vld [vmem:[%s896_s0 + $0x98] sm:$0xff]  ;;  %v34_v4 = vld [vmem:[%s896_s0 + $0xa0] sm:$0xff]  ;;  %v35_v5 = vld [vmem:[%s896_s0 + $0xa8] sm:$0xff] }
   0x9   :  { %284 = vst [vmem:[%s899_s3] sm:$0xff] %v220_v23  ;;  %v224_v37 = vmax.f32 %v160_v24, 0.0  ;;  %285 = vst [vmem:[%s899_s3 + $0x8] sm:$0xff] %v221_v30  ;;  %v227_v42 = vmax.f32 %v163_v33, 0.0  ;;  %v94_v43 = vmul.f32 %v380_v1, %v23_v27  ;;  %v95_v44 = vmul.f32 %v380_v1, %v24_v28  ;;  %v36_v6 = vld [vmem:[%s896_s0 + $0xb0] sm:$0xff]  ;;  %v37_v11 = vld [vmem:[%s896_s0 + $0xb8] sm:$0xff] }
   0xa   :  { %286 = vst [vmem:[%s899_s3 + $0x10] sm:$0xff] %v222_v31  ;;  %287 = vst [vmem:[%s899_s3 + $0x18] sm:$0xff] %v223_v32  ;;  %v96_v45 = vmul.f32 %v380_v1, %v25_v29  ;;  %v164_v46 = vadd.f32 %v385_v2, %v93_v40  ;;  %v97_v47 = vmul.f32 %v380_v1, %v26_v34  ;;  %v38_v24 = vld [vmem:[%s896_s0 + $0xc0] sm:$0xff]  ;;  %v39_v29 = vld [vmem:[%s896_s0 + $0xc8] sm:$0xff] }
   0xb   :  { %288 = vst [vmem:[%s899_s3 + $0x20] sm:$0xff] %v224_v37  ;;  %289 = vst [vmem:[%s899_s3 + $0x28] sm:$0xff] %v225_v38  ;;  %v98_v48 = vmul.f32 %v380_v1, %v27_v35  ;;  %v99_v49 = vmul.f32 %v380_v1, %v28_v36  ;;  %v165_v50 = vadd.f32 %v385_v2, %v94_v43  ;;  %v40_v30 = vld [vmem:[%s896_s0 + $0xd0] sm:$0xff]  ;;  %v41_v31 = vld [vmem:[%s896_s0 + $0xd8] sm:$0xff] }
   0xc   :  { %290 = vst [vmem:[%s899_s3 + $0x30] sm:$0xff] %v226_v39  ;;  %291 = vst [vmem:[%s899_s3 + $0x38] sm:$0xff] %v227_v42  ;;  %v166_v51 = vadd.f32 %v385_v2, %v95_v44  ;;  %v167_v52 = vadd.f32 %v385_v2, %v96_v45  ;;  %v100_v53 = vmul.f32 %v380_v1, %v29_v41  ;;  %v228_v55 = vmax.f32 %v164_v46, 0.0  ;;  %v42_v36 = vld [vmem:[%s896_s0 + $0xe0] sm:$0xff]  ;;  %v43_v37 = vld [vmem:[%s896_s0 + $0xe8] sm:$0xff] }
   0xd   :  { %v168_v56 = vadd.f32 %v385_v2, %v97_v47  ;;  %v169_v57 = vadd.f32 %v385_v2, %v98_v48  ;;  %v170_v58 = vadd.f32 %v385_v2, %v99_v49  ;;  %v229_v62 = vmax.f32 %v165_v50, 0.0  ;;  %v44_v38 = vld [vmem:[%s896_s0 + $0xf0] sm:$0xff]  ;;  %v45_v43 = vld [vmem:[%s896_s0 + $0xf8] sm:$0xff] }
   0xe   :  { %v230_v63 = vmax.f32 %v166_v51, 0.0  ;;  %v231_v0 = vmax.f32 %v167_v52, 0.0  ;;  %v171_v3 = vadd.f32 %v385_v2, %v100_v53  ;;  %292 = vst [vmem:[%s899_s3 + $0x40] sm:$0xff] %v228_v55  ;;  %v101_v10 = vmul.f32 %v380_v1, %v30_v54 }
   0xf   :  { %v232_v7 = vmax.f32 %v168_v56, 0.0  ;;  %v233_v8 = vmax.f32 %v169_v57, 0.0  ;;  %v234_v9 = vmax.f32 %v170_v58, 0.0  ;;  %293 = vst [vmem:[%s899_s3 + $0x48] sm:$0xff] %v229_v62  ;;  %v102_v13 = vmul.f32 %v380_v1, %v31_v59  ;;  %v46_v56 = vld [vmem:[%s896_s0 + $0x100] sm:$0xff]  ;;  %v48_v62 = vld [vmem:[%s896_s0 + $0x110] sm:$0xff] }
  0x10   :  { %294 = vst [vmem:[%s899_s3 + $0x50] sm:$0xff] %v230_v63  ;;  %295 = vst [vmem:[%s899_s3 + $0x58] sm:$0xff] %v231_v0  ;;  %v235_v12 = vmax.f32 %v171_v3, 0.0  ;;  %v103_v14 = vmul.f32 %v380_v1, %v32_v60  ;;  %v104_v15 = vmul.f32 %v380_v1, %v33_v61  ;;  %v172_v16 = vadd.f32 %v385_v2, %v101_v10  ;;  %v47_v61 = vld [vmem:[%s896_s0 + $0x108] sm:$0xff]  ;;  %v49_v63 = vld [vmem:[%s896_s0 + $0x118] sm:$0xff] }
  0x11   :  { %296 = vst [vmem:[%s899_s3 + $0x60] sm:$0xff] %v232_v7  ;;  %297 = vst [vmem:[%s899_s3 + $0x68] sm:$0xff] %v233_v8  ;;  %v105_v17 = vmul.f32 %v380_v1, %v34_v4  ;;  %v106_v18 = vmul.f32 %v380_v1, %v35_v5  ;;  %v107_v19 = vmul.f32 %v380_v1, %v36_v6  ;;  %v50_v6 = vld [vmem:[%s896_s0 + $0x120] sm:$0xff]  ;;  %v51_v7 = vld [vmem:[%s896_s0 + $0x128] sm:$0xff] }
  0x12   :  { %298 = vst [vmem:[%s899_s3 + $0x70] sm:$0xff] %v234_v9  ;;  %299 = vst [vmem:[%s899_s3 + $0x78] sm:$0xff] %v235_v12  ;;  %v173_v20 = vadd.f32 %v385_v2, %v102_v13  ;;  %v174_v21 = vadd.f32 %v385_v2, %v103_v14  ;;  %v175_v22 = vadd.f32 %v385_v2, %v104_v15  ;;  %v236_v25 = vmax.f32 %v172_v16, 0.0  ;;  %v52_v8 = vld [vmem:[%s896_s0 + $0x130] sm:$0xff]  ;;  %v53_v13 = vld [vmem:[%s896_s0 + $0x138] sm:$0xff] }
  0x13   :  { %v108_v23 = vmul.f32 %v380_v1, %v37_v11  ;;  %v176_v26 = vadd.f32 %v385_v2, %v105_v17  ;;  %v177_v27 = vadd.f32 %v385_v2, %v106_v18  ;;  %v178_v28 = vadd.f32 %v385_v2, %v107_v19 }
  0x14   :  { %v237_v32 = vmax.f32 %v173_v20, 0.0  ;;  %v238_v33 = vmax.f32 %v174_v21, 0.0  ;;  %v239_v34 = vmax.f32 %v175_v22, 0.0  ;;  %300 = vst [vmem:[%s899_s3 + $0x80] sm:$0xff] %v236_v25  ;;  %v109_v42 = vmul.f32 %v380_v1, %v38_v24 }
  0x15   :  { %v179_v35 = vadd.f32 %v385_v2, %v108_v23  ;;  %v240_v39 = vmax.f32 %v176_v26, 0.0  ;;  %v241_v40 = vmax.f32 %v177_v27, 0.0  ;;  %v242_v41 = vmax.f32 %v178_v28, 0.0  ;;  %v54_v26 = vld [vmem:[%s896_s0 + $0x140] sm:$0xff] }
  0x16   :  { %301 = vst [vmem:[%s899_s3 + $0x88] sm:$0xff] %v237_v32  ;;  %302 = vst [vmem:[%s899_s3 + $0x90] sm:$0xff] %v238_v33  ;;  %v110_v45 = vmul.f32 %v380_v1, %v39_v29  ;;  %v111_v46 = vmul.f32 %v380_v1, %v40_v30  ;;  %v112_v47 = vmul.f32 %v380_v1, %v41_v31  ;;  %v55_v31 = vld [vmem:[%s896_s0 + $0x148] sm:$0xff]  ;;  %v56_v32 = vld [vmem:[%s896_s0 + $0x150] sm:$0xff] }
  0x17   :  { %303 = vst [vmem:[%s899_s3 + $0x98] sm:$0xff] %v239_v34  ;;  %v243_v44 = vmax.f32 %v179_v35, 0.0  ;;  %304 = vst [vmem:[%s899_s3 + $0xa0] sm:$0xff] %v240_v39  ;;  %v180_v48 = vadd.f32 %v385_v2, %v109_v42  ;;  %v113_v49 = vmul.f32 %v380_v1, %v42_v36  ;;  %v114_v50 = vmul.f32 %v380_v1, %v43_v37  ;;  %v57_v33 = vld [vmem:[%s896_s0 + $0x158] sm:$0xff]  ;;  %v59_v39 = vld [vmem:[%s896_s0 + $0x168] sm:$0xff] }
  0x18   :  { %305 = vst [vmem:[%s899_s3 + $0xa8] sm:$0xff] %v241_v40  ;;  %306 = vst [vmem:[%s899_s3 + $0xb0] sm:$0xff] %v242_v41  ;;  %v115_v51 = vmul.f32 %v380_v1, %v44_v38  ;;  %v181_v52 = vadd.f32 %v385_v2, %v110_v45  ;;  %v182_v53 = vadd.f32 %v385_v2, %v111_v46  ;;  %v58_v38 = vld [vmem:[%s896_s0 + $0x160] sm:$0xff]  ;;  %v60_v40 = vld [vmem:[%s896_s0 + $0x170] sm:$0xff] }
  0x19   :  { %307 = vst [vmem:[%s899_s3 + $0xb8] sm:$0xff] %v243_v44  ;;  %v183_v54 = vadd.f32 %v385_v2, %v112_v47  ;;  %v116_v55 = vmul.f32 %v380_v1, %v45_v43  ;;  %v244_v57 = vmax.f32 %v180_v48, 0.0  ;;  %v184_v58 = vadd.f32 %v385_v2, %v113_v49  ;;  %v61_v45 = vld [vmem:[%s896_s0 + $0x178] sm:$0xff] }
  0x1a   :  { %v185_v59 = vadd.f32 %v385_v2, %v114_v50  ;;  %v186_v60 = vadd.f32 %v385_v2, %v115_v51  ;;  %v245_v0 = vmax.f32 %v181_v52, 0.0  ;;  %v246_v3 = vmax.f32 %v182_v53, 0.0 }
  0x1b   :  { %v247_v4 = vmax.f32 %v183_v54, 0.0  ;;  %v187_v5 = vadd.f32 %v385_v2, %v116_v55  ;;  %308 = vst [vmem:[%s899_s3 + $0xc0] sm:$0xff] %v244_v57  ;;  %v248_v9 = vmax.f32 %v184_v58, 0.0  ;;  %v117_v12 = vmul.f32 %v380_v1, %v46_v56  ;;  %v62_v58 = vld [vmem:[%s896_s0 + $0x180] sm:$0xff] }
  0x1c   :  { %v249_v10 = vmax.f32 %v185_v59, 0.0  ;;  %v250_v11 = vmax.f32 %v186_v60, 0.0  ;;  %309 = vst [vmem:[%s899_s3 + $0xc8] sm:$0xff] %v245_v0  ;;  %310 = vst [vmem:[%s899_s3 + $0xd0] sm:$0xff] %v246_v3  ;;  %v118_v15 = vmul.f32 %v380_v1, %v47_v61  ;;  %v119_v16 = vmul.f32 %v380_v1, %v48_v62  ;;  %v64_v0 = vld [vmem:[%s896_s0 + $0x190] sm:$0xff]  ;;  %v65_v3 = vld [vmem:[%s896_s0 + $0x198] sm:$0xff] }
  0x1d   :  { %311 = vst [vmem:[%s899_s3 + $0xd8] sm:$0xff] %v247_v4  ;;  %v251_v14 = vmax.f32 %v187_v5, 0.0  ;;  %v120_v17 = vmul.f32 %v380_v1, %v49_v63  ;;  %312 = vst [vmem:[%s899_s3 + $0xe0] sm:$0xff] %v248_v9  ;;  %v188_v18 = vadd.f32 %v385_v2, %v117_v12  ;;  %v121_v19 = vmul.f32 %v380_v1, %v50_v6  ;;  %v63_v63 = vld [vmem:[%s896_s0 + $0x188] sm:$0xff] }
  0x1e   :  { %313 = vst [vmem:[%s899_s3 + $0xe8] sm:$0xff] %v249_v10  ;;  %314 = vst [vmem:[%s899_s3 + $0xf0] sm:$0xff] %v250_v11  ;;  %v122_v20 = vmul.f32 %v380_v1, %v51_v7  ;;  %v123_v21 = vmul.f32 %v380_v1, %v52_v8  ;;  %v189_v22 = vadd.f32 %v385_v2, %v118_v15  ;;  %v66_v8 = vld [vmem:[%s896_s0 + $0x1a0] sm:$0xff]  ;;  %v67_v9 = vld [vmem:[%s896_s0 + $0x1a8] sm:$0xff] }
  0x1f   :  { %315 = vst [vmem:[%s899_s3 + $0xf8] sm:$0xff] %v251_v14  ;;  %v190_v23 = vadd.f32 %v385_v2, %v119_v16  ;;  %v191_v24 = vadd.f32 %v385_v2, %v120_v17  ;;  %v124_v25 = vmul.f32 %v380_v1, %v53_v13  ;;  %v252_v27 = vmax.f32 %v188_v18, 0.0  ;;  %v68_v10 = vld [vmem:[%s896_s0 + $0x1b0] sm:$0xff]  ;;  %v69_v15 = vld [vmem:[%s896_s0 + $0x1b8] sm:$0xff] }
  0x20   :  { %v192_v28 = vadd.f32 %v385_v2, %v121_v19  ;;  %v193_v29 = vadd.f32 %v385_v2, %v122_v20  ;;  %v194_v30 = vadd.f32 %v385_v2, %v123_v21  ;;  %v253_v34 = vmax.f32 %v189_v22, 0.0 }
  0x21   :  { %v254_v35 = vmax.f32 %v190_v23, 0.0  ;;  %v255_v36 = vmax.f32 %v191_v24, 0.0  ;;  %v195_v37 = vadd.f32 %v385_v2, %v124_v25  ;;  %316 = vst [vmem:[%s899_s3 + $0x100] sm:$0xff] %v252_v27  ;;  %v125_v44 = vmul.f32 %v380_v1, %v54_v26 }
  0x22   :  { %v256_v41 = vmax.f32 %v192_v28, 0.0  ;;  %v257_v42 = vmax.f32 %v193_v29, 0.0  ;;  %v258_v43 = vmax.f32 %v194_v30, 0.0  ;;  %317 = vst [vmem:[%s899_s3 + $0x108] sm:$0xff] %v253_v34  ;;  %v126_v47 = vmul.f32 %v380_v1, %v55_v31  ;;  %v70_v28 = vld [vmem:[%s896_s0 + $0x1c0] sm:$0xff]  ;;  %v72_v34 = vld [vmem:[%s896_s0 + $0x1d0] sm:$0xff] }
  0x23   :  { %318 = vst [vmem:[%s899_s3 + $0x110] sm:$0xff] %v254_v35  ;;  %319 = vst [vmem:[%s899_s3 + $0x118] sm:$0xff] %v255_v36  ;;  %v259_v46 = vmax.f32 %v195_v37, 0.0  ;;  %v127_v48 = vmul.f32 %v380_v1, %v56_v32  ;;  %v128_v49 = vmul.f32 %v380_v1, %v57_v33  ;;  %v196_v50 = vadd.f32 %v385_v2, %v125_v44  ;;  %v71_v33 = vld [vmem:[%s896_s0 + $0x1c8] sm:$0xff]  ;;  %v73_v35 = vld [vmem:[%s896_s0 + $0x1d8] sm:$0xff] }
  0x24   :  { %320 = vst [vmem:[%s899_s3 + $0x120] sm:$0xff] %v256_v41  ;;  %321 = vst [vmem:[%s899_s3 + $0x128] sm:$0xff] %v257_v42  ;;  %v129_v51 = vmul.f32 %v380_v1, %v58_v38  ;;  %v130_v52 = vmul.f32 %v380_v1, %v59_v39  ;;  %v131_v53 = vmul.f32 %v380_v1, %v60_v40  ;;  %v74_v40 = vld [vmem:[%s896_s0 + $0x1e0] sm:$0xff]  ;;  %v75_v41 = vld [vmem:[%s896_s0 + $0x1e8] sm:$0xff] }
  0x25   :  { %322 = vst [vmem:[%s899_s3 + $0x130] sm:$0xff] %v258_v43  ;;  %323 = vst [vmem:[%s899_s3 + $0x138] sm:$0xff] %v259_v46  ;;  %v197_v54 = vadd.f32 %v385_v2, %v126_v47  ;;  %v198_v55 = vadd.f32 %v385_v2, %v127_v48  ;;  %v199_v56 = vadd.f32 %v385_v2, %v128_v49  ;;  %v260_v59 = vmax.f32 %v196_v50, 0.0  ;;  %v76_v42 = vld [vmem:[%s896_s0 + $0x1f0] sm:$0xff]  ;;  %v77_v47 = vld [vmem:[%s896_s0 + $0x1f8] sm:$0xff] }
  0x26   :  { %v132_v57 = vmul.f32 %v380_v1, %v61_v45  ;;  %v200_v60 = vadd.f32 %v385_v2, %v129_v51  ;;  %v201_v61 = vadd.f32 %v385_v2, %v130_v52  ;;  %v202_v62 = vadd.f32 %v385_v2, %v131_v53 }
  0x27   :  { %v261_v4 = vmax.f32 %v197_v54, 0.0  ;;  %v262_v5 = vmax.f32 %v198_v55, 0.0  ;;  %v263_v6 = vmax.f32 %v199_v56, 0.0  ;;  %324 = vst [vmem:[%s899_s3 + $0x140] sm:$0xff] %v260_v59  ;;  %v133_v14 = vmul.f32 %v380_v1, %v62_v58 }
  0x28   :  { %v203_v7 = vadd.f32 %v385_v2, %v132_v57  ;;  %v264_v11 = vmax.f32 %v200_v60, 0.0  ;;  %v265_v12 = vmax.f32 %v201_v61, 0.0  ;;  %v266_v13 = vmax.f32 %v202_v62, 0.0 }
  0x29   :  { %325 = vst [vmem:[%s899_s3 + $0x148] sm:$0xff] %v261_v4  ;;  %326 = vst [vmem:[%s899_s3 + $0x150] sm:$0xff] %v262_v5  ;;  %v134_v17 = vmul.f32 %v380_v1, %v63_v63  ;;  %v135_v18 = vmul.f32 %v380_v1, %v64_v0  ;;  %v136_v19 = vmul.f32 %v380_v1, %v65_v3 }
  0x2a   :  { %327 = vst [vmem:[%s899_s3 + $0x158] sm:$0xff] %v263_v6  ;;  %v267_v16 = vmax.f32 %v203_v7, 0.0  ;;  %328 = vst [vmem:[%s899_s3 + $0x160] sm:$0xff] %v264_v11  ;;  %v204_v20 = vadd.f32 %v385_v2, %v133_v14  ;;  %v137_v21 = vmul.f32 %v380_v1, %v66_v8  ;;  %v138_v22 = vmul.f32 %v380_v1, %v67_v9 }
  0x2b   :  { %329 = vst [vmem:[%s899_s3 + $0x168] sm:$0xff] %v265_v12  ;;  %330 = vst [vmem:[%s899_s3 + $0x170] sm:$0xff] %v266_v13  ;;  %v139_v23 = vmul.f32 %v380_v1, %v68_v10  ;;  %v205_v24 = vadd.f32 %v385_v2, %v134_v17  ;;  %v206_v25 = vadd.f32 %v385_v2, %v135_v18 }
  0x2c   :  { %331 = vst [vmem:[%s899_s3 + $0x178] sm:$0xff] %v267_v16  ;;  %v207_v26 = vadd.f32 %v385_v2, %v136_v19  ;;  %v140_v27 = vmul.f32 %v380_v1, %v69_v15  ;;  %v268_v29 = vmax.f32 %v204_v20, 0.0  ;;  %v208_v30 = vadd.f32 %v385_v2, %v137_v21 }
  0x2d   :  { %v209_v31 = vadd.f32 %v385_v2, %v138_v22  ;;  %v210_v32 = vadd.f32 %v385_v2, %v139_v23  ;;  %v269_v36 = vmax.f32 %v205_v24, 0.0  ;;  %v270_v37 = vmax.f32 %v206_v25, 0.0 }
  0x2e   :  { %v271_v38 = vmax.f32 %v207_v26, 0.0  ;;  %v211_v39 = vadd.f32 %v385_v2, %v140_v27  ;;  %332 = vst [vmem:[%s899_s3 + $0x180] sm:$0xff] %v268_v29  ;;  %v272_v43 = vmax.f32 %v208_v30, 0.0  ;;  %v141_v46 = vmul.f32 %v380_v1, %v70_v28 }
  0x2f   :  { %v273_v44 = vmax.f32 %v209_v31, 0.0  ;;  %v274_v45 = vmax.f32 %v210_v32, 0.0  ;;  %333 = vst [vmem:[%s899_s3 + $0x188] sm:$0xff] %v269_v36  ;;  %334 = vst [vmem:[%s899_s3 + $0x190] sm:$0xff] %v270_v37  ;;  %v142_v49 = vmul.f32 %v380_v1, %v71_v33  ;;  %v143_v50 = vmul.f32 %v380_v1, %v72_v34 }
  0x30   :  { %335 = vst [vmem:[%s899_s3 + $0x198] sm:$0xff] %v271_v38  ;;  %v275_v48 = vmax.f32 %v211_v39, 0.0  ;;  %v144_v51 = vmul.f32 %v380_v1, %v73_v35  ;;  %336 = vst [vmem:[%s899_s3 + $0x1a0] sm:$0xff] %v272_v43  ;;  %v212_v52 = vadd.f32 %v385_v2, %v141_v46  ;;  %v145_v53 = vmul.f32 %v380_v1, %v74_v40 }
  0x31   :  { %337 = vst [vmem:[%s899_s3 + $0x1a8] sm:$0xff] %v273_v44  ;;  %338 = vst [vmem:[%s899_s3 + $0x1b0] sm:$0xff] %v274_v45  ;;  %v146_v54 = vmul.f32 %v380_v1, %v75_v41  ;;  %v147_v55 = vmul.f32 %v380_v1, %v76_v42  ;;  %v213_v56 = vadd.f32 %v385_v2, %v142_v49 }
  0x32   :  { %339 = vst [vmem:[%s899_s3 + $0x1b8] sm:$0xff] %v275_v48  ;;  %v214_v57 = vadd.f32 %v385_v2, %v143_v50  ;;  %v215_v58 = vadd.f32 %v385_v2, %v144_v51  ;;  %v148_v59 = vmul.f32 %v380_v1, %v77_v47  ;;  %v276_v60 = vmax.f32 %v212_v52, 0.0 }
  0x33   :  { %v216_v61 = vadd.f32 %v385_v2, %v145_v53  ;;  %v217_v62 = vadd.f32 %v385_v2, %v146_v54  ;;  %v218_v63 = vadd.f32 %v385_v2, %v147_v55  ;;  %v277_v0 = vmax.f32 %v213_v56, 0.0 }
  0x34   :  { %v278_v3 = vmax.f32 %v214_v57, 0.0  ;;  %v279_v4 = vmax.f32 %v215_v58, 0.0  ;;  %v219_v5 = vadd.f32 %v385_v2, %v148_v59  ;;  %340 = vst [vmem:[%s899_s3 + $0x1c0] sm:$0xff] %v276_v60 }
  0x35   :  { %v280_v6 = vmax.f32 %v216_v61, 0.0  ;;  %v281_v7 = vmax.f32 %v217_v62, 0.0  ;;  %v282_v8 = vmax.f32 %v218_v63, 0.0  ;;  %341 = vst [vmem:[%s899_s3 + $0x1c8] sm:$0xff] %v277_v0 }
  0x36   :  { %342 = vst [vmem:[%s899_s3 + $0x1d0] sm:$0xff] %v278_v3  ;;  %343 = vst [vmem:[%s899_s3 + $0x1d8] sm:$0xff] %v279_v4  ;;  %v283_v1 = vmax.f32 %v219_v5, 0.0 }
  0x37   :  { %344 = vst [vmem:[%s899_s3 + $0x1e0] sm:$0xff] %v280_v6  ;;  %345 = vst [vmem:[%s899_s3 + $0x1e8] sm:$0xff] %v281_v7 }
  0x38   :  { %346 = vst [vmem:[%s899_s3 + $0x1f0] sm:$0xff] %v282_v8  ;;  %347 = vst [vmem:[%s899_s3 + $0x1f8] sm:$0xff] %v283_v1 }

// kernel: double_conv_forward.4
= control target key start
LH: loop header
LB: loop body
LE: loop exit
PB: predicated region body
PF: predicated region fallthrough
CT: control target
= control target key end

     0   :  { %s5591_s24 = smov 0   ;;  %s6349_s0 = inlined_call_operand.vmem [shape: bf16[2,16,16,128], index: 0, kind: input, shape index: {}]   ;;  %s6350_s1 = inlined_call_operand.vmem [shape: f32[1,128], index: 1, kind: input, shape index: {}]   ;;  %s6351_s2 = inlined_call_operand.vmem [shape: f32[1,128], index: 2, kind: input, shape index: {}]   ;;  %s6352_s3 = inlined_call_operand.vmem [shape: bf16[9,128,128], index: 3, kind: input, shape index: {}]   ;;  %s6353_s4 = inlined_call_operand.vmem [shape: f32[1,128], index: 4, kind: input, shape index: {}]   ;;  %s6354_s5 = inlined_call_operand.vmem [shape: f32[2,16,16,128], index: 5, kind: output, shape index: {0}]   ;;  %s6355_s6 = inlined_call_operand.vmem [shape: f32[2,1,128], index: 6, kind: output, shape index: {1}]   ;;  %s6356_s7 = inlined_call_operand.vmem [shape: f32[2,1,128], index: 7, kind: output, shape index: {2}]  }
   0x1 LB: > { %s4236_s25 = sadd.s32 4294967295, %s5547_s24   ;;  %p4240_p0 = scmp.ge.s32.totalorder %s5547_s24, 1  ;;  %s5547_s24 = sphi %s5591_s24, %s18_s24  }
   0x2   : > { %p242_p1 = scmp.lt.s32.totalorder %s5547_s24, 3 }
   0x4   : > { %p243_p2 = pnand %p4240_p0, %p242_p1 }
   0x5   : > { %v5460_v0 = vld [vmem:[%s6352_s3] sm:$0xff] (!%p243_p2)   ;;  %v5549_v2 = vmov (!%p243_p2), 0.0   ;;  %v5462_v3 = vld [vmem:[%s6352_s3 + $0x8] sm:$0xff] (!%p243_p2)   ;;  %p280_p3 = scmp.lt.s32.totalorder (!%p243_p2), %s4236_s25, 1  ;;  %v5464_v5 = vld [vmem:[%s6352_s3 + $0x10] sm:$0xff] (!%p243_p2)   ;;  %v5550_v7 = vmov (!%p243_p2), 0.0|0.0  }
   0x6   : > { %246 = sbr.rel (%p243_p2) target bundleno = 563 (0x233), region = 40  ;;  %v5461_v1 = vld [vmem:[%s6352_s3 + $0x100] sm:$0xff] (!%p243_p2)   ;;  %471 = vst [vmem:[#allocation2] sm:$0xff] (!%p243_p2), %v5549_v2  ;;  %472 = vst [vmem:[#allocation2 + $0x8] sm:$0xff] (!%p243_p2), %v5549_v2  ;;  %4747 = vmatprep.subr.bf16.mxu1 (!%p243_p2), %v5460_v0  ;;  %v5463_v4 = vld [vmem:[%s6352_s3 + $0x108] sm:$0xff] (!%p243_p2)   ;;  %4763 = vmatprep.mubr.bf16.mxu1 (!%p243_p2), %v5550_v7 }
   0x7   : > { %473 = vst [vmem:[#allocation2 + $0x10] sm:$0x3] (!%p243_p2), %v5549_v2  ;;  %474 = vst [vmem:[#allocation2 + $0x18] sm:$0xff] (!%p243_p2), %v5549_v2  ;;  %4939 = vmatprep.subr.bf16.mxu0 (!%p243_p2), %v5461_v1  ;;  %4748 = vmatpush3.bf16.msra.mxu1 (!%p243_p2), %v5460_v0  ;;  %v5465_v6 = vld [vmem:[%s6352_s3 + $0x110] sm:$0xff] (!%p243_p2)   ;;  %v5466_v8 = vld [vmem:[%s6352_s3 + $0x18] sm:$0xff] (!%p243_p2)  }
   0x8   : > { %475 = vst [vmem:[#allocation2 + $0x20] sm:$0xff] (!%p243_p2), %v5549_v2  ;;  %476 = vst [vmem:[#allocation2 + $0x28] sm:$0x3] (!%p243_p2), %v5549_v2  ;;  %4940 = vmatpush3.bf16.msra.mxu0 (!%p243_p2), %v5461_v1  ;;  %4749 = vmatprep.subr.bf16.mxu1 (!%p243_p2), %v5462_v3  ;;  %v5467_v9 = vld [vmem:[%s6352_s3 + $0x118] sm:$0xff] (!%p243_p2)   ;;  %v5468_v10 = vld [vmem:[%s6352_s3 + $0x20] sm:$0xff] (!%p243_p2)  }
   0x9   : > { %477 = vst [vmem:[#allocation2 + $0x30] sm:$0xff] (!%p243_p2), %v5549_v2  ;;  %478 = vst [vmem:[#allocation2 + $0x38] sm:$0xff] (!%p243_p2), %v5549_v2  ;;  %4941 = vmatprep.subr.bf16.mxu0 (!%p243_p2), %v5463_v4  ;;  %v5469_v11 = vld [vmem:[%s6352_s3 + $0x120] sm:$0xff] (!%p243_p2)   ;;  %v5470_v12 = vld [vmem:[%s6352_s3 + $0x28] sm:$0xff] (!%p243_p2)  }
   0xa   : > { %479 = vst [vmem:[#allocation2 + $0x40] sm:$0x3] (!%p243_p2), %v5549_v2  ;;  %480 = vst [vmem:[#allocation2 + $0x48] sm:$0xff] (!%p243_p2), %v5549_v2  ;;  %v5471_v13 = vld [vmem:[%s6352_s3 + $0x128] sm:$0xff] (!%p243_p2)   ;;  %v5651_v15 = vld [vmem:[%s6350_s1] ss:$0 sm:$0xff] (!%p243_p2) }
   0xb   : > { %481 = vst [vmem:[#allocation2 + $0x50] sm:$0xff] (!%p243_p2), %v5549_v2  ;;  %482 = vst [vmem:[#allocation2 + $0x58] sm:$0x3] (!%p243_p2), %v5549_v2  ;;  %4750 = vmatpush3.bf16.msra.mxu1 (!%p243_p2), %v5462_v3  ;;  %v5656_v18 = vld [vmem:[%s6351_s2] ss:$0 sm:$0xff] (!%p243_p2)  ;;  %v5472_v24 = vld [vmem:[%s6352_s3 + $0x30] sm:$0xff] (!%p243_p2)  }
   0xc   : > { %483 = vst [vmem:[#allocation2 + $0x60] sm:$0xff] (!%p243_p2), %v5549_v2  ;;  %484 = vst [vmem:[#allocation2 + $0x68] sm:$0xff] (!%p243_p2), %v5549_v2  ;;  %4942 = vmatpush3.bf16.msra.mxu0 (!%p243_p2), %v5463_v4  ;;  %4751 = vmatprep.subr.bf16.mxu1 (!%p243_p2), %v5464_v5  ;;  %v5473_v26 = vld [vmem:[%s6352_s3 + $0x130] sm:$0xff] (!%p243_p2)   ;;  %v5474_v40 = vld [vmem:[%s6352_s3 + $0x38] sm:$0xff] (!%p243_p2)  }
   0xd   : > { %485 = vst [vmem:[#allocation2 + $0x70] sm:$0x3] %v5549_v2  ;;  %486 = vst [vmem:[#allocation2 + $0x78] sm:$0xff] %v5549_v2  ;;  %s6358_s25 = smov (!%p280_p3, %s4236_s25), 1  ;;  %4943 = vmatprep.subr.bf16.mxu0 %v5465_v6  ;;  %v5475_v45 = vld [vmem:[%s6352_s3 + $0x138] sm:$0xff]   ;;  %v5698_v55 = vld [vmem:[%s6352_s3 + $0x40] sm:$0xff]  }
   0xe   : > { %487 = vst [vmem:[#allocation2 + $0x80] sm:$0xff] %v5549_v2  ;;  %488 = vst [vmem:[#allocation2 + $0x88] sm:$0x3] %v5549_v2  ;;  %s4450_s19 = sshll.u32 %s6358_s25, 7  ;;  %v5477_v0 = vld [vmem:[%s6352_s3 + $0x140] sm:$0xff]   ;;  %s4451_s27 = sshll.u32 %s6358_s25, 8 }
   0xf   : > { %489 = vst [vmem:[#allocation2 + $0x90] sm:$0xff] %v5549_v2  ;;  %490 = vst [vmem:[#allocation2 + $0x98] sm:$0xff] %v5549_v2  ;;  %4752 = vmatpush3.bf16.msra.mxu1 %v5464_v5  ;;  %s5639_s28 = scalar_lea.vmem %s6349_s0, %s4450_s19  ;;  %s6265_s10 = scalar_lea.vmem %s6354_s5, %s4451_s27 }
  0x10   : > { %491 = vst [vmem:[#allocation2 + $0xa0] sm:$0x3] %v5549_v2  ;;  %492 = vst [vmem:[#allocation2 + $0xa8] sm:$0xff] %v5549_v2  ;;  %4944 = vmatpush3.bf16.msra.mxu0 %v5465_v6  ;;  %4753 = vmatprep.subr.bf16.mxu1 %v5466_v8  ;;  %v4453_v14 = vld [vmem:[%s5639_s28] sm:$0xff]   ;;  %v4516_v19 = vld [vmem:[%s5639_s28 + $0x8] sm:$0xff]   ;;  %s292_s13 = scalar_lea.vmem %s6355_s6, %s6358_s25  ;;  %s295_s16 = scalar_lea.vmem %s6356_s7, %s6358_s25 }
  0x11   : > { %493 = vst [vmem:[#allocation2 + $0xb0] sm:$0xff] %v5549_v2  ;;  %494 = vst [vmem:[#allocation2 + $0xb8] sm:$0x3] %v5549_v2  ;;  %4945 = vmatprep.subr.bf16.mxu0 %v5467_v9  ;;  %v4454_v16 = vunpack.c.l.bf16 %v4453_v14  ;;  %v4455_v17 = vunpack.c.h.bf16 %v4453_v14  ;;  %v4458_v22 = vunpack.c.l.bf16 %v4516_v19  ;;  %v4459_v23 = vunpack.c.h.bf16 %v4516_v19  ;;  %v4517_v25 = vld [vmem:[%s5639_s28 + $0x10] sm:$0xff]   ;;  %v4518_v31 = vld [vmem:[%s5639_s28 + $0x18] sm:$0xff]  }
  0x12   : > { %495 = vst [vmem:[#allocation2 + $0xc0] sm:$0xff] %v5549_v2  ;;  %496 = vst [vmem:[#allocation2 + $0xc8] sm:$0xff] %v5549_v2  ;;  %v4462_v32 = vunpack.c.l.bf16 %v4517_v25  ;;  %v4463_v33 = vunpack.c.h.bf16 %v4517_v25  ;;  %v4466_v34 = vunpack.c.l.bf16 %v4518_v31  ;;  %v4467_v35 = vunpack.c.h.bf16 %v4518_v31  ;;  %v4519_v44 = vld [vmem:[%s5639_s28 + $0x20] sm:$0xff]   ;;  %v4520_v50 = vld [vmem:[%s5639_s28 + $0x28] sm:$0xff]  }
  0x13   : > { %497 = vst [vmem:[#allocation2 + $0xd0] sm:$0x3] %v5549_v2  ;;  %498 = vst [vmem:[#allocation2 + $0xd8] sm:$0xff] %v5549_v2  ;;  %4754 = vmatpush3.bf16.msra.mxu1 %v5466_v8  ;;  %v368_v20 = vmul.f32 %v4454_v16, %v5651_v15  ;;  %v369_v21 = vmul.f32 %v4455_v17, %v5651_v15  ;;  %v370_v29 = vmul.f32 %v4458_v22, %v5651_v15  ;;  %v4521_v63 = vld [vmem:[%s5639_s28 + $0x30] sm:$0xff]   ;;  %v4522_v5 = vld [vmem:[%s5639_s28 + $0x38] sm:$0xff]  }
  0x14   : > { %499 = vst [vmem:[#allocation2 + $0xe0] sm:$0xff] %v5549_v2  ;;  %500 = vst [vmem:[#allocation2 + $0xe8] sm:$0x3] %v5549_v2  ;;  %4946 = vmatpush3.bf16.msra.mxu0 %v5467_v9  ;;  %4755 = vmatprep.subr.bf16.mxu1 %v5468_v10  ;;  %v371_v30 = vmul.f32 %v4459_v23, %v5651_v15  ;;  %v372_v41 = vmul.f32 %v4462_v32, %v5651_v15  ;;  %v4470_v54 = vunpack.c.l.bf16 %v4519_v44  ;;  %v5478_v17 = vld [vmem:[%s6352_s3 + $0x148] sm:$0xff]  }
  0x15   : > { %501 = vst [vmem:[#allocation2 + $0xf0] sm:$0xff] %v5549_v2  ;;  %502 = vst [vmem:[#allocation2 + $0xf8] sm:$0xff] %v5549_v2  ;;  %4947 = vmatprep.subr.bf16.mxu0 %v5469_v11  ;;  %v407_v27 = vadd.f32 %v5656_v18, %v368_v20  ;;  %v408_v28 = vadd.f32 %v5656_v18, %v369_v21  ;;  %v409_v38 = vadd.f32 %v5656_v18, %v370_v29 }
  0x16   : > { %503 = vst [vmem:[#allocation2 + $0x100] sm:$0x3] %v5549_v2  ;;  %504 = vst [vmem:[#allocation2 + $0x108] sm:$0xff] %v5549_v2  ;;  %v410_v39 = vadd.f32 %v5656_v18, %v371_v30  ;;  %v373_v42 = vmul.f32 %v4463_v33, %v5651_v15  ;;  %v374_v43 = vmul.f32 %v4466_v34, %v5651_v15  ;;  %v4471_v57 = vunpack.c.h.bf16 %v4519_v44 }
  0x17   : > { %505 = vst [vmem:[#allocation2 + $0x110] sm:$0xff] %v5549_v2  ;;  %506 = vst [vmem:[#allocation2 + $0x118] sm:$0x3] %v5549_v2  ;;  %4756 = vmatpush3.bf16.msra.mxu1 %v5468_v10  ;;  %v439_v36 = vmax.f32 %v407_v27, 0.0  ;;  %v440_v37 = vmax.f32 %v408_v28, 0.0  ;;  %v441_v47 = vmax.f32 %v409_v38, 0.0  ;;  %v375_v49 = vmul.f32 %v4467_v35, %v5651_v15 }
  0x18   : > { %507 = vst [vmem:[#allocation2 + $0x120] sm:$0xff] %v5549_v2  ;;  %508 = vst [vmem:[#allocation2 + $0x128] sm:$0xff] %v5549_v2  ;;  %4948 = vmatpush3.bf16.msra.mxu0 %v5469_v11  ;;  %4757 = vmatprep.subr.bf16.mxu1 %v5470_v12  ;;  %v442_v48 = vmax.f32 %v410_v39, 0.0  ;;  %v411_v51 = vadd.f32 %v5656_v18, %v372_v41  ;;  %v412_v52 = vadd.f32 %v5656_v18, %v373_v42  ;;  %v4523_v28 = vld [vmem:[%s5639_s28 + $0x40] sm:$0xff]  }
  0x19   : > { %509 = vst [vmem:[#allocation2 + $0x130] sm:$0x3] %v5549_v2  ;;  %510 = vst [vmem:[#allocation2 + $0x138] sm:$0xff] %v5549_v2  ;;  %4949 = vmatprep.subr.bf16.mxu0 %v5471_v13  ;;  %v5685_v46 = vpack.c.bf16 %v440_v37, %v439_v36  ;;  %v5692_v53 = vadd.f32 %v5656_v18, %v374_v43  ;;  %v5701_v56 = vadd.f32 %v5656_v18, %v375_v49 }
  0x1a   : > { %511 = vst [vmem:[#allocation2 + $0x140] sm:$0xff] %v5549_v2  ;;  %512 = vst [vmem:[#allocation2 + $0x148] sm:$0x3] %v5549_v2  ;;  %v4474_v58 = vunpack.c.l.bf16 %v4520_v50  ;;  %v443_v59 = vmax.f32 %v411_v51, 0.0  ;;  %v444_v60 = vmax.f32 %v412_v52, 0.0  ;;  %v376_v62 = vmul.f32 %v4470_v54, %v5651_v15 }
  0x1b   : > { %513 = vst [vmem:[#allocation2 + $0x150] sm:$0xff] %v5549_v2  ;;  %514 = vst [vmem:[#allocation2 + $0x158] sm:$0xff] %v5549_v2  ;;  %4758 = vmatpush3.bf16.msra.mxu1 %v5470_v12  ;;  %4955 = vmatprep.mubr.bf16.mxu0 %v5685_v46  ;;  %v445_v61 = vmax.f32 %v5692_v53, 0.0  ;;  %v446_v1 = vmax.f32 %v5701_v56, 0.0  ;;  %v4475_v3 = vunpack.c.h.bf16 %v4520_v50  ;;  %v5713_v6 = vpack.c.bf16 %v442_v48, %v441_v47 }
  0x1c   : > { %515 = vst [vmem:[#allocation2 + $0x160] sm:$0x3] %v5549_v2  ;;  %516 = vst [vmem:[#allocation2 + $0x168] sm:$0xff] %v5549_v2  ;;  %4950 = vmatpush3.bf16.msra.mxu0 %v5471_v13  ;;  %4759 = vmatprep.subr.bf16.mxu1 %v5472_v24  ;;  %v378_v4 = vmul.f32 %v4474_v58, %v5651_v15  ;;  %v415_v7 = vadd.f32 %v5656_v18, %v376_v62  ;;  %v4478_v8 = vunpack.c.l.bf16 %v4521_v63 }
  0x1d   : > { %517 = vst [vmem:[#allocation2 + $0x170] sm:$0xff] %v5549_v2  ;;  %518 = vst [vmem:[#allocation2 + $0x178] sm:$0x3] %v5549_v2  ;;  %4951 = vmatprep.subr.bf16.mxu0 %v5473_v26  ;;  %v4479_v9 = vunpack.c.h.bf16 %v4521_v63  ;;  %v5718_v10 = vpack.c.bf16 %v444_v60, %v443_v59  ;;  %v379_v12 = vmul.f32 %v4475_v3, %v5651_v15  ;;  %v4482_v22 = vunpack.c.l.bf16 %v4522_v5 }
  0x1e   : > { %519 = vst [vmem:[#allocation2 + $0x180] sm:$0xff] %v5549_v2  ;;  %520 = vst [vmem:[#allocation2 + $0x188] sm:$0xff] %v5549_v2  ;;  %v5725_v13 = vadd.f32 %v5656_v18, %v378_v4  ;;  %v447_v19 = vmax.f32 %v415_v7, 0.0  ;;  %v380_v20 = vmul.f32 %v4478_v8, %v5651_v15  ;;  %v4483_v33 = vunpack.c.h.bf16 %v4522_v5  ;;  %v5485_v7 = vld [vmem:[%s6352_s3 + $0x58] sm:$0xff]  }
  0x1f   : > { %521 = vst [vmem:[#allocation2 + $0x190] sm:$0x3] %v5549_v2  ;;  %522 = vst [vmem:[#allocation2 + $0x198] sm:$0xff] %v5549_v2  ;;  %4760 = vmatpush3.bf16.msra.mxu1 %v5472_v24  ;;  %v381_v21 = vmul.f32 %v4479_v9, %v5651_v15  ;;  %v5479_v24 = vld [vmem:[%s6352_s3 + $0x48] sm:$0xff]   ;;  %v382_v34 = vmul.f32 %v4482_v22, %v5651_v15  ;;  %v5777_v49 = vpack.c.bf16 %v446_v1, %v445_v61 }
  0x20   : > { %523 = vst [vmem:[#allocation2 + $0x1a0] sm:$0xff] %v5549_v2  ;;  %524 = vst [vmem:[#allocation2 + $0x1a8] sm:$0x3] %v5549_v2  ;;  %4952 = vmatpush3.bf16.msra.mxu0 %v5473_v26  ;;  %4761 = vmatprep.subr.bf16.mxu1 %v5474_v40  ;;  %v377_v2 = vmul.f32 %v4471_v57, %v5651_v15  ;;  %v5737_v26 = vadd.f32 %v5656_v18, %v379_v12  ;;  %v449_v27 = vmax.f32 %v5725_v13, 0.0 }
  0x21   : > { %526 = vst [vmem:[#allocation2 + $0x19] sm:$0xff] %v439_v36  ;;  %527 = vst [vmem:[#allocation2 + $0x21] sm:$0xff] %v440_v37  ;;  %4953 = vmatprep.subr.bf16.mxu0 %v5475_v45  ;;  %v5742_v31 = vadd.f32 %v5656_v18, %v380_v20  ;;  %v5745_v32 = vadd.f32 %v5656_v18, %v381_v21  ;;  %v5480_v36 = vld [vmem:[%s6352_s3 + $0x150] sm:$0xff]   ;;  %v383_v41 = vmul.f32 %v4483_v33, %v5651_v15 }
  0x22   : > { %528 = vst [vmem:[#allocation2 + $0x31] sm:$0xff] %v441_v47  ;;  %529 = vst [vmem:[#allocation2 + $0x39] sm:$0xff] %v442_v48  ;;  %v416_v11 = vadd.f32 %v5656_v18, %v377_v2  ;;  %v5757_v37 = vld [vmem:[%s6352_s3 + $0x50] sm:$0xff]   ;;  %v450_v38 = vmax.f32 %v5737_v26, 0.0  ;;  %v5767_v42 = vadd.f32 %v5656_v18, %v382_v34  ;;  %v4486_v47 = vunpack.c.l.bf16 %v4523_v28  ;;  %v4527_v34 = vld [vmem:[%s5639_s28 + $0x60] sm:$0xff]  }
  0x23   : > { %530 = vst [vmem:[#allocation2 + $0x49] sm:$0xff] %v443_v59  ;;  %531 = vst [vmem:[#allocation2 + $0x51] sm:$0xff] %v444_v60  ;;  %4762 = vmatpush3.bf16.msra.mxu1 %v5474_v40  ;;  %v451_v39 = vmax.f32 %v5742_v31, 0.0  ;;  %v452_v40 = vmax.f32 %v5745_v32, 0.0  ;;  %v4487_v48 = vunpack.c.h.bf16 %v4523_v28  ;;  %v5786_v52 = vadd.f32 %v5656_v18, %v383_v41  ;;  %v4525_v59 = vld [vmem:[%s5639_s28 + $0x50] sm:$0xff]  }
  0x24   : > { %532 = vst [vmem:[#allocation2 + $0x61] sm:$0xff] %v445_v61  ;;  %533 = vst [vmem:[#allocation2 + $0x69] sm:$0xff] %v446_v1  ;;  %4954 = vmatpush3.bf16.msra.mxu0 %v5475_v45  ;;  %4795 = vmatprep.subr.bf16.mxu1 %v5698_v55  ;;  %v448_v25 = vmax.f32 %v416_v11, 0.0  ;;  %v453_v54 = vmax.f32 %v5767_v42, 0.0  ;;  %v384_v56 = vmul.f32 %v4486_v47, %v5651_v15  ;;  %v4494_v63 = vunpack.c.l.bf16 %v4525_v59 }
  0x25   : > { %4987 = vmatprep.subr.bf16.mxu0 %v5477_v0  ;;  %534 = vst [vmem:[#allocation2 + $0x79] sm:$0xff] %v447_v19  ;;  %536 = vst [vmem:[#allocation2 + $0x91] sm:$0xff] %v449_v27  ;;  %v385_v57 = vmul.f32 %v4487_v48, %v5651_v15  ;;  %v454_v61 = vmax.f32 %v5786_v52, 0.0  ;;  %v4495_v4 = vunpack.c.h.bf16 %v4525_v59 }
  0x26   : > { %535 = vst [vmem:[#allocation2 + $0x81] sm:$0xff] %v448_v25  ;;  %537 = vst [vmem:[#allocation2 + $0x99] sm:$0xff] %v450_v38  ;;  %v5779_v51 = vpack.c.bf16 %v448_v25, %v447_v19  ;;  %v423_v1 = vadd.f32 %v5656_v18, %v384_v56  ;;  %v388_v9 = vmul.f32 %v4494_v63, %v5651_v15  ;;  %v5483_v19 = vld [vmem:[%s6352_s3 + $0x160] sm:$0xff]   ;;  %v4528_v56 = vld [vmem:[%s5639_s28 + $0x68] sm:$0xff]  }
  0x27   : > { %4956 = vmatmul.mubr.bf16.vlgmr.msra.gmra.mrb[0].mxu0 %v5713_v6  ;;  %538 = vst [vmem:[#allocation2 + $0xa9] sm:$0xff] %v451_v39  ;;  %539 = vst [vmem:[#allocation2 + $0xb1] sm:$0xff] %v452_v40  ;;  %v424_v2 = vadd.f32 %v5656_v18, %v385_v57  ;;  %v389_v21 = vmul.f32 %v4495_v4, %v5651_v15  ;;  %v4506_v59 = vunpack.c.l.bf16 %v4528_v56  ;;  %v4529_v63 = vld [vmem:[%s5639_s28 + $0x70] sm:$0xff]  }
  0x28   : > { %v592_v14 = vld [vmem:[#allocation2 + $0x18] sm:$0xff]  ;;  %v593_v16 = vld [vmem:[#allocation2 + $0x20] sm:$0xff]  ;;  %4988 = vmatpush3.bf16.msra.mxu0 %v5477_v0  ;;  %4959 = vmatprep.mubr.bf16.mxu0 %v5718_v10  ;;  %540 = vst [vmem:[#allocation2 + $0xc1] sm:$0xff] %v453_v54  ;;  %541 = vst [vmem:[#allocation2 + $0xc9] sm:$0xff] %v454_v61  ;;  %v455_v12 = vmax.f32 %v423_v1, 0.0  ;;  %v5825_v22 = vadd.f32 %v5656_v18, %v388_v9  ;;  %v4510_v9 = vunpack.c.l.bf16 %v4529_v63 }
  0x29   : > { %v623_v23 = vpack.c.bf16 %v593_v16, %v592_v14  ;;  %v594_v29 = vld [vmem:[#allocation2 + $0x30] sm:$0xff]  ;;  %v595_v30 = vld [vmem:[#allocation2 + $0x38] sm:$0xff]  ;;  %4989 = vmatprep.subr.bf16.mxu0 %v5478_v17  ;;  %v456_v14 = vmax.f32 %v424_v2, 0.0  ;;  %v5845_v26 = vadd.f32 %v5656_v18, %v389_v21 }
  0x2a   : > { %v5749_v35 = vpack.c.bf16 %v595_v30, %v594_v29  ;;  %v596_v43 = vld [vmem:[#allocation2 + $0x48] sm:$0xff]  ;;  %v597_v44 = vld [vmem:[#allocation2 + $0x50] sm:$0xff]  ;;  %v5481_v0 = vld [vmem:[%s6352_s3 + $0x158] sm:$0xff]   ;;  %v5838_v29 = vpack.c.bf16 %v452_v40, %v451_v39  ;;  %542 = vst [vmem:[#allocation2 + $0xd9] sm:$0xff] %v455_v12  ;;  %v4503_v39 = vunpack.c.h.bf16 %v4527_v34  ;;  %v396_v52 = vmul.f32 %v4510_v9, %v5651_v15 }
  0x2b   : > { %4764 = vmatmul.mubr.bf16.vlgmr.msra.gmra.mrb[0].mxu1 %v623_v23  ;;  %v598_v45 = vld [vmem:[#allocation2 + $0x60] sm:$0xff]  ;;  %v599_v50 = vld [vmem:[#allocation2 + $0x68] sm:$0xff]  ;;  %v5790_v53 = vpack.c.bf16 %v597_v44, %v596_v43  ;;  %543 = vst [vmem:[#allocation2 + $0xe1] sm:$0xff] %v456_v14  ;;  %v5855_v41 = vpack.c.bf16 %v456_v14, %v455_v12  ;;  %v5486_v4 = vld [vmem:[%s6352_s3 + $0x170] sm:$0xff]  }
  0x2c   : > { %4796 = vmatpush3.bf16.msra.mxu1 %v5698_v55  ;;  %4767 = vmatprep.mubr.bf16.mxu1 %v5749_v35  ;;  %v4524_v55 = vld [vmem:[%s5639_s28 + $0x48] sm:$0xff]   ;;  %v5795_v60 = vpack.c.bf16 %v599_v50, %v598_v45  ;;  %v600_v5 = vld [vmem:[#allocation2 + $0x78] sm:$0xff]  ;;  %v602_v25 = vld [vmem:[#allocation2 + $0x90] sm:$0xff] }
  0x2d   : > { %4797 = vmatprep.subr.bf16.mxu1 %v5479_v24  ;;  %v4490_v58 = vunpack.c.l.bf16 %v4524_v55  ;;  %4990 = vmatpush3.bf16.msra.mxu0 %v5478_v17  ;;  %v4491_v62 = vunpack.c.h.bf16 %v4524_v55  ;;  %v601_v11 = vld [vmem:[#allocation2 + $0x80] sm:$0xff]  ;;  %v4526_v17 = vld [vmem:[%s5639_s28 + $0x58] sm:$0xff]   ;;  %v5484_v44 = vld [vmem:[%s6352_s3 + $0x168] sm:$0xff]   ;;  %v393_v55 = vmul.f32 %v4503_v39, %v5651_v15 }
  0x2e   : > { %4991 = vmatprep.subr.bf16.mxu0 %v5480_v36  ;;  %v4498_v23 = vunpack.c.l.bf16 %v4526_v17  ;;  %v603_v28 = vld [vmem:[#allocation2 + $0x98] sm:$0xff]  ;;  %v4499_v33 = vunpack.c.h.bf16 %v4526_v17  ;;  %v5488_v45 = vld [vmem:[%s6352_s3 + $0x60] sm:$0xff]   ;;  %v604_v57 = vld [vmem:[#allocation2 + $0xa8] sm:$0xff] }
  0x2f   : > { %v386_v3 = vmul.f32 %v4490_v58, %v5651_v15  ;;  %v387_v8 = vmul.f32 %v4491_v62, %v5651_v15  ;;  %4960 = vmatmul.mubr.bf16.gmra.mrb[4].mxu0 %v5777_v49  ;;  %v5850_v40 = vpack.c.bf16 %v603_v28, %v602_v25  ;;  %v605_v58 = vld [vmem:[#allocation2 + $0xb0] sm:$0xff]  ;;  %v4507_v62 = vunpack.c.h.bf16 %v4528_v56  ;;  %v606_v12 = vld [vmem:[#allocation2 + $0xc0] sm:$0xff]  ;;  %v607_v14 = vld [vmem:[#allocation2 + $0xc8] sm:$0xff] }
  0x30   : > { %4798 = vmatpush3.bf16.msra.mxu1 %v5479_v24  ;;  %4963 = vmatprep.mubr.bf16.mxu0 %v5779_v51  ;;  %v5832_v24 = vpack.c.bf16 %v450_v38, %v449_v27  ;;  %v459_v27 = vmax.f32 %v5825_v22, 0.0  ;;  %v390_v31 = vmul.f32 %v4498_v23, %v5651_v15  ;;  %v391_v32 = vmul.f32 %v4499_v33, %v5651_v15  ;;  %v2439_v21 = vld [vmem:[#allocation2 + $0x1a] sm:$0xff]  ;;  %v2440_v23 = vld [vmem:[#allocation2 + $0x22] sm:$0xff] }
  0x31   : > { %4799 = vmatprep.subr.bf16.mxu1 %v5757_v37  ;;  %v425_v16 = vadd.f32 %v5656_v18, %v386_v3  ;;  %4992 = vmatpush3.bf16.msra.mxu0 %v5480_v36  ;;  %v426_v20 = vadd.f32 %v5656_v18, %v387_v8  ;;  %v5841_v36 = vpack.c.bf16 %v601_v11, %v600_v5  ;;  %v4502_v38 = vunpack.c.l.bf16 %v4527_v34  ;;  %v5490_v5 = vld [vmem:[%s6352_s3 + $0x68] sm:$0xff]   ;;  %v2447_v9 = vld [vmem:[#allocation2 + $0x7a] sm:$0xff] }
  0x32   : > { %4993 = vmatprep.subr.bf16.mxu0 %v5481_v0  ;;  %546 = vst [vmem:[#allocation2 + $0x109] sm:$0xff] %v459_v27  ;;  %v429_v47 = vadd.f32 %v5656_v18, %v390_v31  ;;  %v430_v48 = vadd.f32 %v5656_v18, %v391_v32  ;;  %v432_v3 = vadd.f32 %v5656_v18, %v393_v55  ;;  %v5487_v31 = vld [vmem:[%s6352_s3 + $0x178] sm:$0xff]  }
  0x33   : > { %4768 = vmatmul.mubr.bf16.gmra.mrb[4].mxu1 %v5790_v53  ;;  %v457_v30 = vmax.f32 %v425_v16, 0.0  ;;  %v458_v13 = vmax.f32 %v426_v20, 0.0  ;;  %v392_v50 = vmul.f32 %v4502_v38, %v5651_v15  ;;  %v395_v8 = vmul.f32 %v4507_v62, %v5651_v15  ;;  %v2441_v32 = vld [vmem:[#allocation2 + $0x32] sm:$0xff]  ;;  %v2442_v38 = vld [vmem:[#allocation2 + $0x3a] sm:$0xff] }
  0x34   : > { %4771 = vmatprep.mubr.bf16.mxu1 %v5795_v60  ;;  %4800 = vmatpush3.bf16.msra.mxu1 %v5757_v37  ;;  %v460_v37 = vmax.f32 %v5845_v26, 0.0  ;;  %v462_v1 = vmax.f32 %v430_v48, 0.0  ;;  %v5889_v11 = vpack.c.bf16 %v454_v61, %v453_v54  ;;  %v464_v17 = vmax.f32 %v432_v3, 0.0  ;;  %v608_v48 = vld [vmem:[#allocation2 + $0xd8] sm:$0xff]  ;;  %v2445_v3 = vld [vmem:[#allocation2 + $0x62] sm:$0xff] }
  0x35   : > { %4801 = vmatprep.subr.bf16.mxu1 %v5485_v7  ;;  %544 = vst [vmem:[#allocation2 + $0xf1] sm:$0xff] %v457_v30  ;;  %4994 = vmatpush3.bf16.msra.mxu0 %v5481_v0  ;;  %545 = vst [vmem:[#allocation2 + $0xf9] sm:$0xff] %v458_v13  ;;  %v5857_v43 = vpack.c.bf16 %v458_v13, %v457_v30  ;;  %v461_v0 = vmax.f32 %v429_v47, 0.0  ;;  %v431_v2 = vadd.f32 %v5656_v18, %v392_v50  ;;  %v609_v50 = vld [vmem:[#allocation2 + $0xe0] sm:$0xff] }
  0x36   : > { %4995 = vmatprep.subr.bf16.mxu0 %v5483_v19  ;;  %547 = vst [vmem:[#allocation2 + $0x111] sm:$0xff] %v460_v37  ;;  %549 = vst [vmem:[#allocation2 + $0x129] sm:$0xff] %v462_v1  ;;  %v5891_v20 = vpack.c.bf16 %v605_v58, %v604_v57  ;;  %v434_v42 = vadd.f32 %v5656_v18, %v395_v8  ;;  %v5899_v61 = vpack.c.bf16 %v460_v37, %v459_v27  ;;  %v2443_v58 = vld [vmem:[#allocation2 + $0x4a] sm:$0xff] }
  0x37   : > { %4964 = vmatmul.mubr.bf16.gmra.mrb[8].mxu0 %v5832_v24  ;;  %548 = vst [vmem:[#allocation2 + $0x121] sm:$0xff] %v461_v0  ;;  %v463_v16 = vmax.f32 %v431_v2, 0.0  ;;  %551 = vst [vmem:[#allocation2 + $0x141] sm:$0xff] %v464_v17  ;;  %v5901_v28 = vpack.c.bf16 %v462_v1, %v461_v0  ;;  %v5905_v33 = vpack.c.bf16 %v607_v14, %v606_v12  ;;  %v5491_v2 = vld [vmem:[%s6352_s3 + $0x188] sm:$0xff]   ;;  %v5948_v14 = vld [vmem:[%s6352_s3 + $0x80] sm:$0xff]  }
  0x38   : > { %4802 = vmatpush3.bf16.msra.mxu1 %v5485_v7  ;;  %v394_v7 = vmul.f32 %v4506_v59, %v5651_v15  ;;  %4967 = vmatprep.mubr.bf16.mxu0 %v5838_v29  ;;  %v466_v13 = vmax.f32 %v434_v42, 0.0  ;;  %v435_v26 = vadd.f32 %v5656_v18, %v396_v52  ;;  %v5911_v22 = vpack.c.bf16 %v2440_v23, %v2439_v21  ;;  %v2444_v59 = vld [vmem:[#allocation2 + $0x52] sm:$0xff]  ;;  %v2448_v12 = vld [vmem:[#allocation2 + $0x82] sm:$0xff] }
  0x39   : > { %4996 = vmatpush3.bf16.msra.mxu0 %v5483_v19  ;;  %v4511_v19 = vunpack.c.h.bf16 %v4529_v63  ;;  %4803 = vmatprep.subr.bf16.mxu1 %v5488_v45  ;;  %550 = vst [vmem:[#allocation2 + $0x139] sm:$0xff] %v463_v16  ;;  %v5903_v30 = vpack.c.bf16 %v464_v17, %v463_v16  ;;  %v5928_v62 = vpack.c.bf16 %v609_v50, %v608_v48 }
  0x3a   : > { %4997 = vmatprep.subr.bf16.mxu0 %v5484_v44  ;;  %v433_v25 = vadd.f32 %v5656_v18, %v394_v7  ;;  %553 = vst [vmem:[#allocation2 + $0x159] sm:$0xff] %v466_v13  ;;  %v467_v39 = vmax.f32 %v435_v26, 0.0  ;;  %v5930_v63 = vpack.c.bf16 %v2442_v38, %v2441_v32  ;;  %v5934_v1 = vpack.c.bf16 %v2444_v59, %v2443_v58  ;;  %v612_v7 = vld [vmem:[#allocation2 + $0x108] sm:$0xff] }
  0x3b   : > { %4772 = vmatmul.mubr.bf16.gmra.mrb[8].mxu1 %v5841_v36  ;;  %v397_v54 = vmul.f32 %v4511_v19, %v5651_v15  ;;  %v5493_v19 = vld [vmem:[%s6352_s3 + $0x190] sm:$0xff]   ;;  %v5961_v52 = vpack.c.bf16 %v2448_v12, %v2447_v9  ;;  %v959_v9 = vld [vmem:[#allocation2 + $0x1] sm:$0xff] }
  0x3c   : > { %4775 = vmatprep.mubr.bf16.mxu1 %v5850_v40  ;;  %4804 = vmatpush3.bf16.msra.mxu1 %v5488_v45  ;;  %v465_v34 = vmax.f32 %v433_v25, 0.0  ;;  %v5492_v45 = vld [vmem:[%s6352_s3 + $0x70] sm:$0xff]   ;;  %554 = vst [vmem:[#allocation2 + $0x169] sm:$0xff] %v467_v39  ;;  %v611_v56 = vld [vmem:[#allocation2 + $0xf8] sm:$0xff] }
  0x3d   : > { %4998 = vmatpush3.bf16.msra.mxu0 %v5484_v44  ;;  %4805 = vmatprep.subr.bf16.mxu1 %v5490_v5  ;;  %v436_v27 = vadd.f32 %v5656_v18, %v397_v54  ;;  %v5489_v44 = vld [vmem:[%s6352_s3 + $0x180] sm:$0xff]   ;;  %v610_v55 = vld [vmem:[#allocation2 + $0xf0] sm:$0xff]  ;;  %v4530_v25 = vld [vmem:[%s5639_s28 + $0x78] sm:$0xff]  }
  0x3e   : > { %4999 = vmatprep.subr.bf16.mxu0 %v5486_v4  ;;  %552 = vst [vmem:[#allocation2 + $0x151] sm:$0xff] %v465_v34  ;;  %v5914_v37 = vpack.c.bf16 %v466_v13, %v465_v34  ;;  %v5932_v0 = vpack.c.bf16 %v611_v56, %v610_v55  ;;  %v613_v8 = vld [vmem:[#allocation2 + $0x110] sm:$0xff]  ;;  %v614_v16 = vld [vmem:[#allocation2 + $0x120] sm:$0xff]  ;;  %v615_v17 = vld [vmem:[#allocation2 + $0x128] sm:$0xff]  ;;  %v4514_v54 = vunpack.c.l.bf16 %v4530_v25  ;;  %v4515_v34 = vunpack.c.h.bf16 %v4530_v25 }
  0x3f   : > { %4968 = vmatmul.mubr.bf16.gmra.mrb[12].mxu0 %v5889_v11  ;;  %v468_v47 = vmax.f32 %v436_v27, 0.0  ;;  %v5954_v21 = vpack.c.bf16 %v613_v8, %v612_v7  ;;  %v5959_v42 = vpack.c.bf16 %v615_v17, %v614_v16  ;;  %v5495_v13 = vld [vmem:[%s6352_s3 + $0x198] sm:$0xff]   ;;  %v5497_v55 = vld [vmem:[%s6352_s3 + $0x1a0] sm:$0xff]   ;;  %v5499_v7 = vld [vmem:[%s6352_s3 + $0x1a8] sm:$0xff]  }
  0x40   : > { %5003 = vmatprep.mubr.bf16.mxu0 %v5911_v22  ;;  %4806 = vmatpush3.bf16.msra.mxu1 %v5490_v5  ;;  %v5494_v5 = vld [vmem:[%s6352_s3 + $0x78] sm:$0xff]   ;;  %v398_v32 = vmul.f32 %v4514_v54, %v5651_v15  ;;  %v399_v38 = vmul.f32 %v4515_v34, %v5651_v15  ;;  %v960_v12 = vld [vmem:[#allocation2 + $0x9] sm:$0xff] }
  0x41   : > { %5000 = vmatpush3.bf16.msra.mxu0 %v5486_v4  ;;  %555 = vst [vmem:[#allocation2 + $0x171] sm:$0xff] %v468_v47  ;;  %v5926_v57 = vpack.c.bf16 %v468_v47, %v467_v39  ;;  %4807 = vmatprep.subr.bf16.mxu1 %v5492_v45  ;;  %v2446_v4 = vld [vmem:[#allocation2 + $0x6a] sm:$0xff]  ;;  %v616_v26 = vld [vmem:[#allocation2 + $0x138] sm:$0xff]  ;;  %v617_v39 = vld [vmem:[#allocation2 + $0x140] sm:$0xff] }
  0x42   : > { %5001 = vmatprep.subr.bf16.mxu0 %v5487_v31  ;;  %v5956_v23 = vpack.c.bf16 %v2446_v4, %v2445_v3  ;;  %v2450_v27 = vld [vmem:[#allocation2 + $0x9a] sm:$0xff]  ;;  %v5974_v48 = vadd.f32 %v5656_v18, %v398_v32  ;;  %v5977_v50 = vadd.f32 %v5656_v18, %v399_v38  ;;  %v5984_v59 = vpack.c.bf16 %v617_v39, %v616_v26  ;;  %v2453_v18 = vld [vmem:[#allocation2 + $0xc2] sm:$0xff]  ;;  %v5501_v25 = vld [vmem:[%s6352_s3 + $0x1b0] sm:$0xff]  }
  0x43   : > { %4776 = vmatmul.mubr.bf16.gmra.mrb[12].mxu1 %v5891_v20  ;;  %v620_v8 = vld [vmem:[#allocation2 + $0x168] sm:$0xff]  ;;  %v2455_v16 = vld [vmem:[#allocation2 + $0xda] sm:$0xff]  ;;  %v2460_v39 = vld [vmem:[#allocation2 + $0x112] sm:$0xff] }
  0x44   : > { %4779 = vmatprep.mubr.bf16.mxu1 %v5905_v33  ;;  %4808 = vmatpush3.bf16.msra.mxu1 %v5492_v45  ;;  %v2452_v45 = vld [vmem:[#allocation2 + $0xb2] sm:$0xff]  ;;  %v469_v56 = vmax.f32 %v5974_v48, 0.0  ;;  %v470_v58 = vmax.f32 %v5977_v50, 0.0  ;;  %v2458_v32 = vld [vmem:[#allocation2 + $0xfa] sm:$0xff]  ;;  %v2459_v38 = vld [vmem:[#allocation2 + $0x10a] sm:$0xff] }
  0x45   : > { %5002 = vmatpush3.bf16.msra.mxu0 %v5487_v31  ;;  %4809 = vmatprep.subr.bf16.mxu1 %v5494_v5  ;;  %v2449_v31 = vld [vmem:[#allocation2 + $0x92] sm:$0xff]  ;;  %v5512_v48 = vld [vmem:[%s6352_s3 + $0xc0] sm:$0xff]   ;;  %v5507_v50 = vld [vmem:[%s6352_s3 + $0x1c8] sm:$0xff]  }
  0x46   : > { %5035 = vmatprep.subr.bf16.mxu0 %v5489_v44  ;;  %v618_v47 = vld [vmem:[#allocation2 + $0x150] sm:$0xff]  ;;  %v619_v15 = vld [vmem:[#allocation2 + $0x158] sm:$0xff]  ;;  %556 = vst [vmem:[#allocation2 + $0x181] sm:$0xff] %v469_v56  ;;  %557 = vst [vmem:[#allocation2 + $0x189] sm:$0xff] %v470_v58 }
  0x47   : > { %v5988_v3 = vpack.c.bf16 %v619_v15, %v618_v47  ;;  %v6025_v47 = vpack.c.bf16 %v2460_v39, %v2459_v38  ;;  %v5498_v15 = vld [vmem:[%s6352_s3 + $0x88] sm:$0xff]  }
  0x48   : > { %5004 = vmatmul.mubr.bf16.vlgmr.msra.gmra.mrb[0].mxu0 %v5930_v63  ;;  %4810 = vmatpush3.bf16.msra.mxu1 %v5494_v5  ;;  %v2454_v5 = vld [vmem:[#allocation2 + $0xca] sm:$0xff] }
  0x49   : > { %5036 = vmatpush3.bf16.msra.mxu0 %v5489_v44  ;;  %5007 = vmatprep.mubr.bf16.mxu0 %v5934_v1  ;;  %v2451_v44 = vld [vmem:[#allocation2 + $0xaa] sm:$0xff]  ;;  %v6008_v34 = vpack.c.bf16 %v2454_v5, %v2453_v18  ;;  %v2463_v5 = vld [vmem:[#allocation2 + $0x13a] sm:$0xff] }
  0x4a   : > { %5037 = vmatprep.subr.bf16.mxu0 %v5491_v2  ;;  %4843 = vmatprep.subr.bf16.mxu1 %v5948_v14  ;;  %v5990_v4 = vpack.c.bf16 %v2452_v45, %v2451_v44  ;;  %v621_v17 = vld [vmem:[#allocation2 + $0x170] sm:$0xff]  ;;  %v6021_v44 = vld [vmem:[%s6352_s3 + $0x1c0] sm:$0xff]   ;;  %v5523_v39 = vld [vmem:[%s6352_s3 + $0x208] sm:$0xff]  }
  0x4b   : > { %4780 = vmatmul.mubr.bf16.gmra.mrb[16].mxu1 %v5928_v62  ;;  %v6006_v54 = vpack.c.bf16 %v621_v17, %v620_v8  ;;  %v2462_v18 = vld [vmem:[#allocation2 + $0x12a] sm:$0xff]  ;;  %v2468_v17 = vld [vmem:[#allocation2 + $0x172] sm:$0xff] }
  0x4c   : > { %4783 = vmatprep.mubr.bf16.mxu1 %v5932_v0  ;;  %v5500_v8 = vld [vmem:[%s6352_s3 + $0x90] sm:$0xff]  }
  0x4d   : > { %5038 = vmatpush3.bf16.msra.mxu0 %v5491_v2  ;;  %v5986_v2 = vpack.c.bf16 %v2450_v27, %v2449_v31  ;;  %v5503_v31 = vld [vmem:[%s6352_s3 + $0x1b8] sm:$0xff]  }
  0x4e   : > { %5039 = vmatprep.subr.bf16.mxu0 %v5493_v19  ;;  %v2457_v27 = vld [vmem:[#allocation2 + $0xf2] sm:$0xff] }
  0x4f   : > { %v6023_v45 = vpack.c.bf16 %v2458_v32, %v2457_v27  ;;  %v6068_v27 = vpack.c.bf16 %v470_v58, %v469_v56  ;;  %v3182_v58 = vld [vmem:[#allocation2 + $0x49] sm:$0xff] }
  0x50   : > { %5008 = vmatmul.mubr.bf16.gmra.mrb[4].mxu0 %v5956_v23 }
  0x51   : > { %5011 = vmatprep.mubr.bf16.mxu0 %v5961_v52  ;;  %5040 = vmatpush3.bf16.msra.mxu0 %v5493_v19  ;;  %v2456_v19 = vld [vmem:[#allocation2 + $0xe2] sm:$0xff] }
  0x52   : > { %5041 = vmatprep.subr.bf16.mxu0 %v5495_v13  ;;  %v6010_v26 = vpack.c.bf16 %v2456_v19, %v2455_v16  ;;  %v2467_v16 = vld [vmem:[#allocation2 + $0x16a] sm:$0xff]  ;;  %v5504_v19 = vld [vmem:[%s6352_s3 + $0xa0] sm:$0xff]  }
  0x53   : > { %4784 = vmatmul.mubr.bf16.gmra.mrb[20].mxu1 %v5954_v21 }
  0x54   : > { %4787 = vmatprep.mubr.bf16.mxu1 %v5959_v42 }
  0x55   : > { %5042 = vmatpush3.bf16.msra.mxu0 %v5495_v13  ;;  %v991_v13 = vpack.c.bf16 %v960_v12, %v959_v9  ;;  %v2466_v12 = vld [vmem:[#allocation2 + $0x15a] sm:$0xff] }
  0x56   : > { %5043 = vmatprep.subr.bf16.mxu0 %v5497_v55 }
  0x58   : > { %5012 = vmatmul.mubr.bf16.gmra.mrb[8].mxu0 %v5986_v2 }
  0x59   : > { %5015 = vmatprep.mubr.bf16.mxu0 %v5990_v4  ;;  %5044 = vmatpush3.bf16.msra.mxu0 %v5497_v55  ;;  %v2461_v55 = vld [vmem:[#allocation2 + $0x122] sm:$0xff] }
  0x5a   : > { %5045 = vmatprep.subr.bf16.mxu0 %v5499_v7  ;;  %v6039_v9 = vpack.c.bf16 %v2462_v18, %v2461_v55  ;;  %v3189_v55 = vld [vmem:[#allocation2 + $0x99] sm:$0xff]  ;;  %v5525_v18 = vld [vmem:[%s6352_s3 + $0x210] sm:$0xff]  }
  0x5b   : > { %4788 = vmatmul.mubr.bf16.gmra.mrb[24].mxu1 %v5984_v59 }
  0x5c   : > { %4791 = vmatprep.mubr.bf16.mxu1 %v5988_v3 }
  0x5d   : > { %5046 = vmatpush3.bf16.msra.mxu0 %v5499_v7  ;;  %v2464_v7 = vld [vmem:[#allocation2 + $0x142] sm:$0xff] }
  0x5e   : > { %5047 = vmatprep.subr.bf16.mxu0 %v5501_v25 }
  0x60   : > { %5016 = vmatmul.mubr.bf16.gmra.mrb[12].mxu0 %v6008_v34 }
  0x61   : > { %5019 = vmatprep.mubr.bf16.mxu0 %v6010_v26  ;;  %5048 = vmatpush3.bf16.msra.mxu0 %v5501_v25 }
  0x62   : > { %5049 = vmatprep.subr.bf16.mxu0 %v5503_v31 }
  0x63   : > { %4792 = vmatmul.mubr.bf16.gmra.mrb[28].mxu1 %v6006_v54 }
  0x64   : > { %4811 = vmatprep.mubr.bf16.mxu1 %v991_v13  ;;  %v6055_v13 = vpack.c.bf16 %v2468_v17, %v2467_v16 }
  0x65   : > { %5050 = vmatpush3.bf16.msra.mxu0 %v5503_v31  ;;  %v2470_v31 = vld [vmem:[#allocation2 + $0x18a] sm:$0xff] }
  0x66   : > { %5083 = vmatprep.subr.bf16.mxu0 %v6021_v44 }
  0x68   : > { %5020 = vmatmul.mubr.bf16.gmra.mrb[16].mxu0 %v6023_v45 }
  0x69   : > { %5023 = vmatprep.mubr.bf16.mxu0 %v6025_v47 }
  0x6b   : > { %4812 = vmatmul.mubr.bf16.vlgmr.msra.gmra.mrb[0].mxu1 %v5685_v46  ;;  %v6041_v46 = vpack.c.bf16 %v2464_v7, %v2463_v5 }
  0x6c   : > { %4844 = vmatpush3.bf16.msra.mxu1 %v5948_v14  ;;  %4815 = vmatprep.mubr.bf16.mxu1 %v5713_v6  ;;  %v5502_v6 = vld [vmem:[%s6352_s3 + $0x98] sm:$0xff]  }
  0x6d   : > { %4845 = vmatprep.subr.bf16.mxu1 %v5498_v15  ;;  %v2465_v14 = vld [vmem:[#allocation2 + $0x152] sm:$0xff] }
  0x6e   : > { %v6053_v25 = vpack.c.bf16 %v2466_v12, %v2465_v14  ;;  %v3193_v14 = vld [vmem:[#allocation2 + $0xc9] sm:$0xff]  ;;  %v5528_v12 = vld [vmem:[%s6352_s3 + $0x220] sm:$0xff]  }
  0x70   : > { %4846 = vmatpush3.bf16.msra.mxu1 %v5498_v15  ;;  %5024 = vmatmul.mubr.bf16.gmra.mrb[20].mxu0 %v6039_v9  ;;  %v3188_v15 = vld [vmem:[#allocation2 + $0x91] sm:$0xff] }
  0x71   : > { %4847 = vmatprep.subr.bf16.mxu1 %v5500_v8  ;;  %5027 = vmatprep.mubr.bf16.mxu0 %v6041_v46  ;;  %v3216_v7 = vpack.c.bf16 %v3189_v55, %v3188_v15  ;;  %v3210_v15 = vld [vmem:[#allocation2 + $0x199] sm:$0xff]  ;;  %v3211_v55 = vld [vmem:[#allocation2 + $0x1a1] sm:$0xff] }
  0x73   : > { %4816 = vmatmul.mubr.bf16.gmra.mrb[4].mxu1 %v5718_v10  ;;  %v5506_v10 = vld [vmem:[%s6352_s3 + $0xa8] sm:$0xff]  }
  0x74   : > { %4819 = vmatprep.mubr.bf16.mxu1 %v5777_v49  ;;  %4848 = vmatpush3.bf16.msra.mxu1 %v5500_v8  ;;  %v2469_v49 = vld [vmem:[#allocation2 + $0x182] sm:$0xff]  ;;  %v3191_v8 = vld [vmem:[#allocation2 + $0xb1] sm:$0xff] }
  0x75   : > { %4849 = vmatprep.subr.bf16.mxu1 %v5502_v6  ;;  %v2486_v32 = vpack.c.bf16 %v2470_v31, %v2469_v49  ;;  %v1700_v49 = vld [vmem:[#allocation2 + $0x20] sm:$0xff]  ;;  %v3196_v31 = vld [vmem:[#allocation2 + $0xf1] sm:$0xff] }
  0x78   : > { %4850 = vmatpush3.bf16.msra.mxu1 %v5502_v6  ;;  %5028 = vmatmul.mubr.bf16.gmra.mrb[24].mxu0 %v6053_v25  ;;  %v3192_v6 = vld [vmem:[#allocation2 + $0xc1] sm:$0xff] }
  0x79   : > { %4851 = vmatprep.subr.bf16.mxu1 %v5504_v19  ;;  %5031 = vmatprep.mubr.bf16.mxu0 %v6055_v13  ;;  %v3218_v17 = vpack.c.bf16 %v3193_v14, %v3192_v6  ;;  %v3227_v6 = vpack.c.bf16 %v3211_v55, %v3210_v15  ;;  %v3570_v15 = vld [vmem:[#allocation2 + $0x122] sm:$0xff]  ;;  %v3571_v55 = vld [vmem:[#allocation2 + $0x12a] sm:$0xff] }
  0x7b   : > { %4820 = vmatmul.mubr.bf16.gmra.mrb[8].mxu1 %v5779_v51  ;;  %v5508_v51 = vld [vmem:[%s6352_s3 + $0xb0] sm:$0xff]  }
  0x7c   : > { %4823 = vmatprep.mubr.bf16.mxu1 %v5832_v24  ;;  %4852 = vmatpush3.bf16.msra.mxu1 %v5504_v19  ;;  %v5510_v24 = vld [vmem:[%s6352_s3 + $0xb8] sm:$0xff]   ;;  %v3195_v19 = vld [vmem:[#allocation2 + $0xe1] sm:$0xff] }
  0x7d   : > { %4853 = vmatprep.subr.bf16.mxu1 %v5506_v10 }
  0x80   : > { %4854 = vmatpush3.bf16.msra.mxu1 %v5506_v10  ;;  %5032 = vmatmul.mubr.bf16.gmra.mrb[28].mxu0 %v2486_v32  ;;  %v1699_v10 = vld [vmem:[#allocation2 + $0x18] sm:$0xff]  ;;  %v5530_v32 = vld [vmem:[%s6352_s3 + $0x230] sm:$0xff]  }
  0x81   : > { %4855 = vmatprep.subr.bf16.mxu1 %v5508_v51  ;;  %5051 = vmatprep.mubr.bf16.mxu0 %v5749_v35  ;;  %v5509_v35 = vld [vmem:[%s6352_s3 + $0x1d0] sm:$0xff]  }
  0x83   : > { %4824 = vmatmul.mubr.bf16.gmra.mrb[12].mxu1 %v5838_v29  ;;  %v5511_v29 = vld [vmem:[%s6352_s3 + $0x1d8] sm:$0xff]  }
  0x84   : > { %4827 = vmatprep.mubr.bf16.mxu1 %v5889_v11  ;;  %4856 = vmatpush3.bf16.msra.mxu1 %v5508_v51  ;;  %v5519_v11 = vld [vmem:[%s6352_s3 + $0x1f8] sm:$0xff]  }
  0x85   : > { %4857 = vmatprep.subr.bf16.mxu1 %v5510_v24  ;;  %v3197_v51 = vld [vmem:[#allocation2 + $0xf9] sm:$0xff] }
  0x88   : > { %4858 = vmatpush3.bf16.msra.mxu1 %v5510_v24  ;;  %5052 = vmatmul.mubr.bf16.vlgmr.msra.gmra.mrb[0].mxu0 %v5790_v53  ;;  %v5513_v53 = vld [vmem:[%s6352_s3 + $0x1e0] sm:$0xff]  }
  0x89   : > { %4891 = vmatprep.subr.bf16.mxu1 %v5512_v48  ;;  %5084 = vmatpush3.bf16.msra.mxu0 %v6021_v44  ;;  %v3187_v44 = vld [vmem:[#allocation2 + $0x81] sm:$0xff] }
  0x8a   : > { %5055 = vmatprep.mubr.bf16.mxu0 %v5795_v60  ;;  %5085 = vmatprep.subr.bf16.mxu0 %v5507_v50  ;;  %v5515_v60 = vld [vmem:[%s6352_s3 + $0x1e8] sm:$0xff]  }
  0x8b   : > { %4828 = vmatmul.mubr.bf16.gmra.mrb[16].mxu1 %v5855_v41  ;;  %v5517_v41 = vld [vmem:[%s6352_s3 + $0x1f0] sm:$0xff]  }
  0x8c   : > { %4831 = vmatprep.mubr.bf16.mxu1 %v5857_v43 }
  0x8d   : > { %5086 = vmatpush3.bf16.msra.mxu0 %v5507_v50  ;;  %v1701_v50 = vld [vmem:[#allocation2 + $0x30] sm:$0xff] }
  0x8e   : > { %5087 = vmatprep.subr.bf16.mxu0 %v5509_v35 }
  0x90   : > { %5056 = vmatmul.mubr.bf16.gmra.mrb[4].mxu0 %v5841_v36  ;;  %v1329_v36 = vld [vmem:[#allocation2 + $0x2] sm:$0xff] }
  0x91   : > { %5059 = vmatprep.mubr.bf16.mxu0 %v5850_v40  ;;  %5088 = vmatpush3.bf16.msra.mxu0 %v5509_v35  ;;  %v1330_v40 = vld [vmem:[#allocation2 + $0xa] sm:$0xff]  ;;  %v1702_v35 = vld [vmem:[#allocation2 + $0x38] sm:$0xff] }
  0x92   : > { %5089 = vmatprep.subr.bf16.mxu0 %v5511_v29  ;;  %v1361_v43 = vpack.c.bf16 %v1330_v40, %v1329_v36  ;;  %v1704_v36 = vld [vmem:[#allocation2 + $0x50] sm:$0xff]  ;;  %v3200_v40 = vld [vmem:[#allocation2 + $0x121] sm:$0xff] }
  0x93   : > { %4832 = vmatmul.mubr.bf16.gmra.mrb[20].mxu1 %v5899_v61  ;;  %v5514_v61 = vld [vmem:[%s6352_s3 + $0xc8] sm:$0xff]  }
  0x94   : > { %4835 = vmatprep.mubr.bf16.mxu1 %v5901_v28  ;;  %v5516_v28 = vld [vmem:[%s6352_s3 + $0xd0] sm:$0xff]  }
  0x95   : > { %5090 = vmatpush3.bf16.msra.mxu0 %v5511_v29  ;;  %v3198_v29 = vld [vmem:[#allocation2 + $0x109] sm:$0xff] }
  0x96   : > { %5091 = vmatprep.subr.bf16.mxu0 %v5513_v53 }
  0x98   : > { %5060 = vmatmul.mubr.bf16.gmra.mrb[8].mxu0 %v5891_v20  ;;  %v5521_v20 = vld [vmem:[%s6352_s3 + $0x200] sm:$0xff]  }
  0x99   : > { %5063 = vmatprep.mubr.bf16.mxu0 %v5905_v33  ;;  %5092 = vmatpush3.bf16.msra.mxu0 %v5513_v53  ;;  %v2838_v33 = vld [vmem:[#allocation2 + $0x180] sm:$0xff]  ;;  %v3199_v53 = vld [vmem:[#allocation2 + $0x111] sm:$0xff] }
  0x9a   : > { %5093 = vmatprep.subr.bf16.mxu0 %v5515_v60 }
  0x9b   : > { %4836 = vmatmul.mubr.bf16.gmra.mrb[24].mxu1 %v5903_v30  ;;  %v5518_v30 = vld [vmem:[%s6352_s3 + $0xd8] sm:$0xff]  }
  0x9c   : > { %4839 = vmatprep.mubr.bf16.mxu1 %v5914_v37  ;;  %v5520_v37 = vld [vmem:[%s6352_s3 + $0xe0] sm:$0xff]  }
  0x9d   : > { %5094 = vmatpush3.bf16.msra.mxu0 %v5515_v60  ;;  %v1703_v60 = vld [vmem:[#allocation2 + $0x48] sm:$0xff] }
  0x9e   : > { %5095 = vmatprep.subr.bf16.mxu0 %v5517_v41 }
  0xa0   : > { %5064 = vmatmul.mubr.bf16.gmra.mrb[12].mxu0 %v5928_v62 }
  0xa1   : > { %5067 = vmatprep.mubr.bf16.mxu0 %v5932_v0  ;;  %5096 = vmatpush3.bf16.msra.mxu0 %v5517_v41  ;;  %v3180_v0 = vld [vmem:[#allocation2 + $0x31] sm:$0xff]  ;;  %v3201_v41 = vld [vmem:[#allocation2 + $0x129] sm:$0xff] }
  0xa2   : > { %5097 = vmatprep.subr.bf16.mxu0 %v5519_v11 }
  0xa3   : > { %4840 = vmatmul.mubr.bf16.gmra.mrb[28].mxu1 %v5926_v57 }
  0xa4   : > { %4859 = vmatprep.mubr.bf16.mxu1 %v1361_v43  ;;  %v1732_v43 = vpack.c.bf16 %v1702_v35, %v1701_v50  ;;  %v1721_v50 = vld [vmem:[#allocation2 + $0x120] sm:$0xff]  ;;  %v1722_v35 = vld [vmem:[#allocation2 + $0x128] sm:$0xff] }
  0xa5   : > { %5098 = vmatpush3.bf16.msra.mxu0 %v5519_v11  ;;  %v6199_v11 = vpack.c.bf16 %v3199_v53, %v3198_v29  ;;  %v3556_v29 = vld [vmem:[#allocation2 + $0x7a] sm:$0xff]  ;;  %v3557_v53 = vld [vmem:[#allocation2 + $0x82] sm:$0xff] }
  0xa6   : > { %5131 = vmatprep.subr.bf16.mxu0 %v5521_v20 }
  0xa8   : > { %5068 = vmatmul.mubr.bf16.gmra.mrb[16].mxu0 %v5954_v21  ;;  %v5524_v21 = vld [vmem:[%s6352_s3 + $0xf0] sm:$0xff]  }
  0xa9   : > { %5071 = vmatprep.mubr.bf16.mxu0 %v5959_v42 }
  0xab   : > { %4860 = vmatmul.mubr.bf16.vlgmr.msra.gmra.mrb[0].mxu1 %v5911_v22  ;;  %v2839_v22 = vld [vmem:[#allocation2 + $0x188] sm:$0xff] }
  0xac   : > { %4892 = vmatpush3.bf16.msra.mxu1 %v5512_v48  ;;  %4863 = vmatprep.mubr.bf16.mxu1 %v5930_v63  ;;  %v6142_v62 = vpack.c.bf16 %v2839_v22, %v2838_v33  ;;  %v5522_v63 = vld [vmem:[%s6352_s3 + $0xe8] sm:$0xff]   ;;  %v1731_v48 = vpack.c.bf16 %v1700_v49, %v1699_v10  ;;  %v1707_v22 = vld [vmem:[#allocation2 + $0x78] sm:$0xff] }
  0xad   : > { %4893 = vmatprep.subr.bf16.mxu1 %v5514_v61  ;;  %v3203_v33 = vld [vmem:[#allocation2 + $0x141] sm:$0xff]  ;;  %v3555_v49 = vld [vmem:[#allocation2 + $0x6a] sm:$0xff] }
  0xae   : > { %v3554_v10 = vld [vmem:[#allocation2 + $0x62] sm:$0xff] }
  0xb0   : > { %4894 = vmatpush3.bf16.msra.mxu1 %v5514_v61  ;;  %5072 = vmatmul.mubr.bf16.gmra.mrb[20].mxu0 %v5984_v59  ;;  %v3183_v59 = vld [vmem:[#allocation2 + $0x51] sm:$0xff]  ;;  %v1705_v61 = vld [vmem:[#allocation2 + $0x60] sm:$0xff] }
  0xb1   : > { %4895 = vmatprep.subr.bf16.mxu1 %v5516_v28  ;;  %5075 = vmatprep.mubr.bf16.mxu0 %v5988_v3  ;;  %v3185_v3 = vld [vmem:[#allocation2 + $0x69] sm:$0xff] }
  0xb3   : > { %4864 = vmatmul.mubr.bf16.gmra.mrb[4].mxu1 %v5934_v1  ;;  %v3181_v1 = vld [vmem:[#allocation2 + $0x39] sm:$0xff] }
  0xb4   : > { %4867 = vmatprep.mubr.bf16.mxu1 %v5956_v23  ;;  %4896 = vmatpush3.bf16.msra.mxu1 %v5516_v28  ;;  %v5532_v23 = vld [vmem:[#allocation2] sm:$0xff]  ;;  %v3212_v56 = vpack.c.bf16 %v3181_v1, %v3180_v0  ;;  %v1706_v28 = vld [vmem:[#allocation2 + $0x68] sm:$0xff]  ;;  %v3204_v0 = vld [vmem:[#allocation2 + $0x151] sm:$0xff] }
  0xb5   : > { %4897 = vmatprep.subr.bf16.mxu1 %v5518_v30  ;;  %v2857_v42 = vpack.c.bf16 %v5532_v23, %v5532_v23  ;;  %v3205_v1 = vld [vmem:[#allocation2 + $0x159] sm:$0xff] }
  0xb8   : > { %4898 = vmatpush3.bf16.msra.mxu1 %v5518_v30  ;;  %5076 = vmatmul.mubr.bf16.gmra.mrb[24].mxu0 %v6006_v54  ;;  %v3213_v54 = vpack.c.bf16 %v3183_v59, %v3182_v58  ;;  %v3202_v30 = vld [vmem:[#allocation2 + $0x139] sm:$0xff]  ;;  %v1709_v58 = vld [vmem:[#allocation2 + $0x90] sm:$0xff] }
  0xb9   : > { %4899 = vmatprep.subr.bf16.mxu1 %v5520_v37  ;;  %5079 = vmatprep.mubr.bf16.mxu0 %v6142_v62  ;;  %v6209_v23 = vpack.c.bf16 %v3203_v33, %v3202_v30  ;;  %v1710_v59 = vld [vmem:[#allocation2 + $0x98] sm:$0xff]  ;;  %v1725_v30 = vld [vmem:[#allocation2 + $0x150] sm:$0xff] }
  0xba   : > { %v1726_v33 = vld [vmem:[#allocation2 + $0x158] sm:$0xff] }
  0xbb   : > { %4868 = vmatmul.mubr.bf16.gmra.mrb[8].mxu1 %v5961_v52  ;;  %v5526_v52 = vld [vmem:[%s6352_s3 + $0xf8] sm:$0xff]  }
  0xbc   : > { %4871 = vmatprep.mubr.bf16.mxu1 %v5986_v2  ;;  %4900 = vmatpush3.bf16.msra.mxu1 %v5520_v37  ;;  %v3184_v2 = vld [vmem:[#allocation2 + $0x61] sm:$0xff] }
  0xbd   : > { %4901 = vmatprep.subr.bf16.mxu1 %v5522_v63  ;;  %v3214_v38 = vpack.c.bf16 %v3185_v3, %v3184_v2  ;;  %v5534_v37 = vld [vmem:[%s6352_s3 + $0x108] sm:$0xff]   ;;  %v1712_v3 = vld [vmem:[#allocation2 + $0xb0] sm:$0xff] }
  0xbe   : > { %v1711_v2 = vld [vmem:[#allocation2 + $0xa8] sm:$0xff] }
  0xc0   : > { %4902 = vmatpush3.bf16.msra.mxu1 %v5522_v63  ;;  %5080 = vmatmul.mubr.bf16.gmra.mrb[28].mxu0 %v2857_v42  ;;  %v1708_v63 = vld [vmem:[#allocation2 + $0x80] sm:$0xff] }
  0xc1   : > { %4903 = vmatprep.subr.bf16.mxu1 %v5524_v21  ;;  %5099 = vmatprep.mubr.bf16.mxu0 %v3212_v56  ;;  %v1735_v42 = vpack.c.bf16 %v1708_v63, %v1707_v22  ;;  %v6211_v56 = vpack.c.bf16 %v3205_v1, %v3204_v0  ;;  %v3560_v22 = vld [vmem:[#allocation2 + $0xaa] sm:$0xff]  ;;  %v3562_v1 = vld [vmem:[#allocation2 + $0xc2] sm:$0xff] }
  0xc2   : > { %v1727_v63 = vld [vmem:[#allocation2 + $0x168] sm:$0xff]  ;;  %v1728_v0 = vld [vmem:[#allocation2 + $0x170] sm:$0xff] }
  0xc3   : > { %4872 = vmatmul.mubr.bf16.gmra.mrb[12].mxu1 %v5990_v4  ;;  %v6165_v4 = vld [vmem:[%s6352_s3 + $0x100] sm:$0xff]  }
  0xc4   : > { %4875 = vmatprep.mubr.bf16.mxu1 %v6008_v34  ;;  %4904 = vmatpush3.bf16.msra.mxu1 %v5524_v21  ;;  %v3186_v34 = vld [vmem:[#allocation2 + $0x79] sm:$0xff]  ;;  %v1734_v21 = vpack.c.bf16 %v1706_v28, %v1705_v61 }
  0xc5   : > { %4905 = vmatprep.subr.bf16.mxu1 %v5526_v52  ;;  %v3215_v5 = vpack.c.bf16 %v3187_v44, %v3186_v34  ;;  %v1713_v34 = vld [vmem:[#allocation2 + $0xc0] sm:$0xff]  ;;  %v1714_v44 = vld [vmem:[#allocation2 + $0xc8] sm:$0xff] }
  0xc8   : > { %4906 = vmatpush3.bf16.msra.mxu1 %v5526_v52  ;;  %5100 = vmatmul.mubr.bf16.vlgmr.msra.gmra.mrb[0].mxu0 %v3213_v54  ;;  %v5535_v52 = vld [vmem:[%s6352_s3 + $0x110] sm:$0xff]   ;;  %v5536_v54 = vld [vmem:[%s6352_s3 + $0x118] sm:$0xff]  }
  0xc9   : > { %5179 = vmatprep.subr.bf16.mxu1 %v6165_v4  ;;  %5132 = vmatpush3.bf16.msra.mxu0 %v5521_v20  ;;  %v1733_v20 = vpack.c.bf16 %v1704_v36, %v1703_v60  ;;  %v1723_v60 = vld [vmem:[#allocation2 + $0x138] sm:$0xff]  ;;  %v1724_v36 = vld [vmem:[#allocation2 + $0x140] sm:$0xff] }
  0xca   : > { %5103 = vmatprep.mubr.bf16.mxu0 %v3214_v38  ;;  %5133 = vmatprep.subr.bf16.mxu0 %v5523_v39  ;;  %v1736_v38 = vpack.c.bf16 %v1710_v59, %v1709_v58  ;;  %v1743_v61 = vpack.c.bf16 %v1724_v36, %v1723_v60  ;;  %v1745_v58 = vpack.c.bf16 %v1728_v0, %v1727_v63 }
  0xcb   : > { %4876 = vmatmul.mubr.bf16.gmra.mrb[16].mxu1 %v6010_v26  ;;  %v5527_v26 = vld [vmem:[%s6352_s3 + $0x218] sm:$0xff]  }
  0xcc   : > { %4879 = vmatprep.mubr.bf16.mxu1 %v6023_v45  ;;  %v3190_v45 = vld [vmem:[#allocation2 + $0xa9] sm:$0xff] }
  0xcd   : > { %5134 = vmatpush3.bf16.msra.mxu0 %v5523_v39  ;;  %v3217_v16 = vpack.c.bf16 %v3191_v8, %v3190_v45  ;;  %v1737_v39 = vpack.c.bf16 %v1712_v3, %v1711_v2  ;;  %v5538_v45 = vld [vmem:[%s6352_s3 + $0x128] sm:$0xff]   ;;  %v1738_v8 = vpack.c.bf16 %v1714_v44, %v1713_v34  ;;  %v3564_v2 = vld [vmem:[#allocation2 + $0xda] sm:$0xff]  ;;  %v3569_v44 = vld [vmem:[#allocation2 + $0x112] sm:$0xff] }
  0xce   : > { %5135 = vmatprep.subr.bf16.mxu0 %v5525_v18  ;;  %v3565_v3 = vld [vmem:[#allocation2 + $0xe2] sm:$0xff]  ;;  %v3568_v34 = vld [vmem:[#allocation2 + $0x10a] sm:$0xff] }
  0xd0   : > { %5104 = vmatmul.mubr.bf16.gmra.mrb[4].mxu0 %v3215_v5  ;;  %v1716_v5 = vld [vmem:[#allocation2 + $0xe0] sm:$0xff] }
  0xd1   : > { %5107 = vmatprep.mubr.bf16.mxu0 %v3216_v7  ;;  %5136 = vmatpush3.bf16.msra.mxu0 %v5525_v18  ;;  %v1715_v18 = vld [vmem:[#allocation2 + $0xd8] sm:$0xff] }
  0xd2   : > { %5137 = vmatprep.subr.bf16.mxu0 %v5527_v26  ;;  %v3550_v7 = vld [vmem:[#allocation2 + $0x32] sm:$0xff] }
  0xd3   : > { %4880 = vmatmul.mubr.bf16.gmra.mrb[20].mxu1 %v6025_v47  ;;  %v5529_v47 = vld [vmem:[%s6352_s3 + $0x228] sm:$0xff]  }
  0xd4   : > { %4883 = vmatprep.mubr.bf16.mxu1 %v6039_v9  ;;  %v3194_v9 = vld [vmem:[#allocation2 + $0xd9] sm:$0xff] }
  0xd5   : > { %5138 = vmatpush3.bf16.msra.mxu0 %v5527_v26  ;;  %v6189_v24 = vpack.c.bf16 %v3195_v19, %v3194_v9  ;;  %v3551_v26 = vld [vmem:[#allocation2 + $0x3a] sm:$0xff]  ;;  %v1719_v9 = vld [vmem:[#allocation2 + $0x108] sm:$0xff]  ;;  %v1720_v19 = vld [vmem:[#allocation2 + $0x110] sm:$0xff] }
  0xd6   : > { %5139 = vmatprep.subr.bf16.mxu0 %v5528_v12  ;;  %v3582_v14 = vpack.c.bf16 %v3551_v26, %v3550_v7  ;;  %v3572_v7 = vld [vmem:[#allocation2 + $0x13a] sm:$0xff]  ;;  %v3573_v26 = vld [vmem:[#allocation2 + $0x142] sm:$0xff] }
  0xd8   : > { %5108 = vmatmul.mubr.bf16.gmra.mrb[8].mxu0 %v3217_v16  ;;  %v1718_v16 = vld [vmem:[#allocation2 + $0xf8] sm:$0xff] }
  0xd9   : > { %5111 = vmatprep.mubr.bf16.mxu0 %v3218_v17  ;;  %5140 = vmatpush3.bf16.msra.mxu0 %v5528_v12  ;;  %v1717_v12 = vld [vmem:[#allocation2 + $0xf0] sm:$0xff] }
  0xda   : > { %5141 = vmatprep.subr.bf16.mxu0 %v5529_v47  ;;  %v3552_v17 = vld [vmem:[#allocation2 + $0x4a] sm:$0xff] }
  0xdb   : > { %4884 = vmatmul.mubr.bf16.gmra.mrb[24].mxu1 %v6041_v46  ;;  %v6191_v46 = vpack.c.bf16 %v3197_v51, %v3196_v31  ;;  %v5540_v31 = vld [vmem:[%s6352_s3 + $0x138] sm:$0xff]   ;;  %v1740_v51 = vpack.c.bf16 %v1718_v16, %v1717_v12  ;;  %v3579_v12 = vld [vmem:[#allocation2 + $0x18a] sm:$0xff] }
  0xdc   : > { %4887 = vmatprep.mubr.bf16.mxu1 %v6053_v25  ;;  %v5531_v25 = vld [vmem:[%s6352_s3 + $0x238] sm:$0xff]  }
  0xdd   : > { %5142 = vmatpush3.bf16.msra.mxu0 %v5529_v47  ;;  %v3553_v47 = vld [vmem:[#allocation2 + $0x52] sm:$0xff] }
  0xde   : > { %5143 = vmatprep.subr.bf16.mxu0 %v5530_v32 }
  0xe0   : > { %5112 = vmatmul.mubr.bf16.gmra.mrb[12].mxu0 %v6189_v24 }
  0xe1   : > { %5115 = vmatprep.mubr.bf16.mxu0 %v6191_v46  ;;  %5144 = vmatpush3.bf16.msra.mxu0 %v5530_v32  ;;  %v3583_v32 = vpack.c.bf16 %v3553_v47, %v3552_v17  ;;  %v2099_v47 = vld [vmem:[#allocation2 + $0x181] sm:$0xff] }
  0xe2   : > { %5145 = vmatprep.subr.bf16.mxu0 %v5531_v25 }
  0xe3   : > { %4888 = vmatmul.mubr.bf16.gmra.mrb[28].mxu1 %v6055_v13  ;;  %v6201_v13 = vpack.c.bf16 %v3201_v41, %v3200_v40  ;;  %v3558_v40 = vld [vmem:[#allocation2 + $0x92] sm:$0xff]  ;;  %v3559_v41 = vld [vmem:[#allocation2 + $0x9a] sm:$0xff] }
  0xe4   : > { %4907 = vmatprep.mubr.bf16.mxu1 %v1731_v48  ;;  %v1741_v48 = vpack.c.bf16 %v1720_v19, %v1719_v9  ;;  %v3586_v28 = vpack.c.bf16 %v3559_v41, %v3558_v40  ;;  %v3580_v9 = vld [vmem:[#allocation2 + $0x19a] sm:$0xff]  ;;  %v3581_v19 = vld [vmem:[#allocation2 + $0x1a2] sm:$0xff] }
  0xe5   : > { %5146 = vmatpush3.bf16.msra.mxu0 %v5531_v25  ;;  %v3584_v25 = vpack.c.bf16 %v3555_v49, %v3554_v10  ;;  %v3597_v10 = vpack.c.bf16 %v3581_v19, %v3580_v9 }
  0xe8   : > { %5116 = vmatmul.mubr.bf16.gmra.mrb[16].mxu0 %v6199_v11 }
  0xe9   : > { %5119 = vmatprep.mubr.bf16.mxu0 %v6201_v13 }
  0xeb   : > { %4908 = vmatmul.mubr.bf16.vlgmr.msra.gmra.mrb[0].mxu1 %v1732_v43  ;;  %v1742_v43 = vpack.c.bf16 %v1722_v35, %v1721_v50 }
  0xec   : > { %5187 = vmatpush3.bf16.msra.mxu1 %v6165_v4  ;;  %4911 = vmatprep.mubr.bf16.mxu1 %v1733_v20  ;;  %v5537_v4 = vld [vmem:[%s6352_s3 + $0x120] sm:$0xff]   ;;  %v3585_v20 = vpack.c.bf16 %v3557_v53, %v3556_v29 }
  0xed   : > { %5180 = vmatprep.subr.bf16.mxu1 %v5534_v37 }
  0xf0   : > { %5188 = vmatpush3.bf16.msra.mxu1 %v5534_v37  ;;  %5120 = vmatmul.mubr.bf16.gmra.mrb[20].mxu0 %v6209_v23  ;;  %v3561_v37 = vld [vmem:[#allocation2 + $0xb2] sm:$0xff] }
  0xf1   : > { %5181 = vmatprep.subr.bf16.mxu1 %v5535_v52  ;;  %5123 = vmatprep.mubr.bf16.mxu0 %v6211_v56 }
  0xf3   : > { %4912 = vmatmul.mubr.bf16.gmra.mrb[4].mxu1 %v1734_v21  ;;  %v3563_v21 = vld [vmem:[#allocation2 + $0xca] sm:$0xff] }
  0xf4   : > { %4915 = vmatprep.mubr.bf16.mxu1 %v1735_v42  ;;  %5189 = vmatpush3.bf16.msra.mxu1 %v5535_v52  ;;  %v1744_v42 = vpack.c.bf16 %v1726_v33, %v1725_v30  ;;  %v3587_v52 = vpack.c.bf16 %v3561_v37, %v3560_v22  ;;  %v3588_v59 = vpack.c.bf16 %v3563_v21, %v3562_v1 }
  0xf5   : > { %5182 = vmatprep.subr.bf16.mxu1 %v5536_v54 }
  0xf8   : > { %5190 = vmatpush3.bf16.msra.mxu1 %v5536_v54  ;;  %5124 = vmatmul.mubr.bf16.gmra.mrb[24].mxu0 %v5926_v57  ;;  %v1739_v57 = vpack.c.bf16 %v1716_v5, %v1715_v18  ;;  %v3566_v54 = vld [vmem:[#allocation2 + $0xf2] sm:$0xff]  ;;  %v3591_v18 = vpack.c.bf16 %v3569_v44, %v3568_v34  ;;  %v3592_v5 = vpack.c.bf16 %v3571_v55, %v3570_v15 }
  0xf9   : > { %5183 = vmatprep.subr.bf16.mxu1 %v5537_v4  ;;  %5127 = vmatprep.mubr.bf16.mxu0 %v6068_v27  ;;  %v5539_v27 = vld [vmem:[%s6352_s3 + $0x130] sm:$0xff]  }
  0xfb   : > { %4916 = vmatmul.mubr.bf16.gmra.mrb[8].mxu1 %v1736_v38  ;;  %v3567_v38 = vld [vmem:[#allocation2 + $0xfa] sm:$0xff] }
  0xfc   : > { %4919 = vmatprep.mubr.bf16.mxu1 %v1737_v39  ;;  %5191 = vmatpush3.bf16.msra.mxu1 %v5537_v4  ;;  %v3589_v39 = vpack.c.bf16 %v3565_v3, %v3564_v2  ;;  %v3590_v4 = vpack.c.bf16 %v3567_v38, %v3566_v54 }
  0xfd   : > { %5184 = vmatprep.subr.bf16.mxu1 %v5538_v45 }
 0x100   : > { %5192 = vmatpush3.bf16.msra.mxu1 %v5538_v45  ;;  %5128 = vmatmul.mubr.bf16.gmra.mrb[28].mxu0 %v3227_v6  ;;  %v3574_v45 = vld [vmem:[#allocation2 + $0x152] sm:$0xff] }
 0x101   : > { %5185 = vmatprep.subr.bf16.mxu1 %v5539_v27  ;;  %5147 = vmatprep.mubr.bf16.mxu0 %v3582_v14  ;;  %v2097_v14 = vld [vmem:[#allocation2 + $0x169] sm:$0xff] }
 0x103   : > { %4920 = vmatmul.mubr.bf16.gmra.mrb[12].mxu1 %v1738_v8  ;;  %v3593_v8 = vpack.c.bf16 %v3573_v26, %v3572_v7 }
 0x104   : > { %4923 = vmatprep.mubr.bf16.mxu1 %v1739_v57  ;;  %5193 = vmatpush3.bf16.msra.mxu1 %v5539_v27  ;;  %v3577_v57 = vld [vmem:[#allocation2 + $0x172] sm:$0xff]  ;;  %v3578_v27 = vld [vmem:[#allocation2 + $0x182] sm:$0xff] }
 0x105   : > { %5186 = vmatprep.subr.bf16.mxu1 %v5540_v31  ;;  %v3596_v17 = vpack.c.bf16 %v3579_v12, %v3578_v27 }
 0x108   : > { %5194 = vmatpush3.bf16.msra.mxu1 %v5540_v31  ;;  %5148 = vmatmul.mubr.bf16.vlgmr.msra.gmra.mrb[0].mxu0 %v3583_v32 }
 0x109   : > { %5151 = vmatprep.mubr.bf16.mxu0 %v3584_v25 }
 0x10b   : > { %4924 = vmatmul.mubr.bf16.gmra.mrb[16].mxu1 %v1740_v51 }
 0x10c   : > { %4927 = vmatprep.mubr.bf16.mxu1 %v1741_v48 }
 0x110   : > { %5152 = vmatmul.mubr.bf16.gmra.mrb[4].mxu0 %v3585_v20 }
 0x111   : > { %5155 = vmatprep.mubr.bf16.mxu0 %v3586_v28 }
 0x113   : > { %4928 = vmatmul.mubr.bf16.gmra.mrb[20].mxu1 %v1742_v43 }
 0x114   : > { %4931 = vmatprep.mubr.bf16.mxu1 %v1743_v61  ;;  %v6260_v61 = vld [vmem:[%s6353_s4] ss:$0 sm:$0xff] }
 0x118   : > { %5156 = vmatmul.mubr.bf16.gmra.mrb[8].mxu0 %v3587_v52 }
 0x119   : > { %5159 = vmatprep.mubr.bf16.mxu0 %v3588_v59 }
 0x11b   : > { %4932 = vmatmul.mubr.bf16.gmra.mrb[24].mxu1 %v1744_v42 }
 0x11c   : > { %4935 = vmatprep.mubr.bf16.mxu1 %v1745_v58 }
 0x120   : > { %5160 = vmatmul.mubr.bf16.gmra.mrb[12].mxu0 %v3589_v39 }
 0x121   : > { %5163 = vmatprep.mubr.bf16.mxu0 %v3590_v4 }
 0x123   : > { %4936 = vmatmul.mubr.bf16.gmra.mrb[28].mxu1 %v6142_v62  ;;  %v3575_v62 = vld [vmem:[#allocation2 + $0x15a] sm:$0xff] }
 0x124   : > { %4971 = vmatprep.mubr.bf16.mxu1 %v6189_v24  ;;  %v3594_v6 = vpack.c.bf16 %v3575_v62, %v3574_v45  ;;  %v3576_v24 = vld [vmem:[#allocation2 + $0x16a] sm:$0xff] }
 0x128   : > { %5164 = vmatmul.mubr.bf16.gmra.mrb[16].mxu0 %v3591_v18 }
 0x129   : > { %5167 = vmatprep.mubr.bf16.mxu0 %v3592_v5 }
 0x12b   : > { %4972 = vmatmul.mubr.bf16.vlgmr.msra.gmra.mrb[16].mxu1 %v6191_v46  ;;  %v2098_v46 = vld [vmem:[#allocation2 + $0x171] sm:$0xff] }
 0x12c   : > { %4975 = vmatprep.mubr.bf16.mxu1 %v6199_v11  ;;  %v3595_v11 = vpack.c.bf16 %v3577_v57, %v3576_v24  ;;  %v2115_v16 = vpack.c.bf16 %v2098_v46, %v2097_v14 }
 0x130   : > { %5168 = vmatmul.mubr.bf16.gmra.mrb[20].mxu0 %v3593_v8 }
 0x131   : > { %5171 = vmatprep.mubr.bf16.mxu0 %v3594_v6 }
 0x133   : > { %4976 = vmatmul.mubr.bf16.gmra.mrb[20].mxu1 %v6201_v13  ;;  %v2100_v13 = vld [vmem:[#allocation2 + $0x189] sm:$0xff] }
 0x134   : > { %4979 = vmatprep.mubr.bf16.mxu1 %v6209_v23  ;;  %v2116_v23 = vpack.c.bf16 %v2100_v13, %v2099_v47 }
 0x138   : > { %5172 = vmatmul.mubr.bf16.gmra.mrb[24].mxu0 %v3595_v11 }
 0x139   : > { %5175 = vmatprep.mubr.bf16.mxu0 %v3596_v17 }
 0x13b   : > { %4980 = vmatmul.mubr.bf16.gmra.mrb[24].mxu1 %v6211_v56 }
 0x13c   : > { %4983 = vmatprep.mubr.bf16.mxu1 %v2115_v16 }
 0x140   : > { %5176 = vmatmul.mubr.bf16.gmra.mrb[28].mxu0 %v3597_v10 }
 0x143   : > { %4984 = vmatmul.mubr.bf16.gmra.mrb[28].mxu1 %v2116_v23 }
 0x1be   : > { %v4909_v49 = vpop.f32.mrb[0].mxu1 }
 0x1bf   : > { %v1878_v31 = vpop.f32.mrb[1].mxu1 }
 0x1c0   : > { %v4910_v51 = vpop.f32.mrb[2].mxu1 }
 0x1c1   : > { %v1881_v32 = vpop.f32.mrb[3].mxu1 }
 0x1c6   : > { %v4913_v48 = vpop.f32.mrb[4].mxu1 }
 0x1c7   : > { %v1894_v25 = vpop.f32.mrb[5].mxu1 }
 0x1c8   : > { %v4914_v50 = vpop.f32.mrb[6].mxu1 }
 0x1c9   : > { %v1897_v56 = vpop.f32.mrb[7].mxu1 }
 0x1ce   : > { %v4917_v35 = vpop.f32.mrb[8].mxu1 }
 0x1cf   : > { %v6242_v29 = vpop.f32.mrb[9].mxu1 }
 0x1d0   : > { %v6244_v53 = vpop.f32.mrb[10].mxu1 }
 0x1d1   : > { %v6246_v60 = vpop.f32.mrb[11].mxu1 }
 0x1d6   : > { %v6248_v36 = vpop.f32.mrb[12].mxu1 }
 0x1d7   : > { %v6250_v40 = vpop.f32.mrb[13].mxu1 }
 0x1d8   : > { %v6252_v41 = vpop.f32.mrb[14].mxu1 }
 0x1d9   : > { %v6254_v43 = vpop.f32.mrb[15].mxu1 }
 0x1db   : > { %v5149_v20 = vpop.f32.mrb[0].mxu0 }
 0x1dc   : > { %v5195_v28 = vadd.f32 %v5149_v20, %v4909_v49  ;;  %v3729_v30 = vpop.f32.mrb[1].mxu0 }
 0x1dd   : > { %v5196_v33 = vadd.f32 %v3729_v30, %v1878_v31  ;;  %v5150_v22 = vpop.f32.mrb[2].mxu0 }
 0x1de   : > { %v3961_v37 = vadd.f32 %v5195_v28, %v6260_v61  ;;  %v5197_v63 = vadd.f32 %v5150_v22, %v4910_v51  ;;  %v3732_v0 = vpop.f32.mrb[3].mxu0 }
 0x1df   : > { %v3959_v1 = vadd.f32 %v5196_v33, %v6260_v61  ;;  %v5198_v21 = vadd.f32 %v3732_v0, %v1881_v32 }
 0x1e0   : > { %3993 = vst [vmem:[%s6265_s10 + $0x10] sm:$0xff] %v3961_v37  ;;  %v3962_v42 = vadd.f32 %v5197_v63, %v6260_v61  ;;  %v4063_v39 = vmul.f32 %v3961_v37, %v3961_v37 }
 0x1e1   : > { %3991 = vst [vmem:[%s6265_s10] sm:$0xff] %v3959_v1  ;;  %v3960_v52 = vadd.f32 %v5198_v21, %v6260_v61  ;;  %v4061_v58 = vmul.f32 %v3959_v1, %v3959_v1 }
 0x1e2   : > { %3994 = vst [vmem:[%s6265_s10 + $0x18] sm:$0xff] %v3962_v42  ;;  %v4064_v55 = vmul.f32 %v3962_v42, %v3962_v42 }
 0x1e3   : > { %3992 = vst [vmem:[%s6265_s10 + $0x8] sm:$0xff] %v3960_v52  ;;  %v4023_v59 = vadd.f32 %v3960_v52, %v3959_v1  ;;  %v4062_v2 = vmul.f32 %v3960_v52, %v3960_v52  ;;  %v5153_v3 = vpop.f32.mrb[4].mxu0 }
 0x1e4   : > { %v5199_v54 = vadd.f32 %v5153_v3, %v4913_v48  ;;  %v3745_v38 = vpop.f32.mrb[5].mxu0 }
 0x1e5   : > { %v4024_v4 = vadd.f32 %v4023_v59, %v3961_v37  ;;  %v4093_v34 = vadd.f32 %v4062_v2, %v4061_v58  ;;  %v5200_v44 = vadd.f32 %v3745_v38, %v1894_v25  ;;  %v5154_v15 = vpop.f32.mrb[6].mxu0 }
 0x1e6   : > { %v3965_v18 = vadd.f32 %v5199_v54, %v6260_v61  ;;  %v5201_v5 = vadd.f32 %v5154_v15, %v4914_v50  ;;  %v3748_v7 = vpop.f32.mrb[7].mxu0 }
 0x1e7   : > { %v4094_v26 = vadd.f32 %v4093_v34, %v4063_v39  ;;  %v3963_v45 = vadd.f32 %v5200_v44, %v6260_v61  ;;  %v4025_v62 = vadd.f32 %v4024_v4, %v3962_v42  ;;  %v5202_v8 = vadd.f32 %v3748_v7, %v1897_v56 }
 0x1e8   : > { %3997 = vst [vmem:[%s6265_s10 + $0x30] sm:$0xff] %v3965_v18  ;;  %v3966_v6 = vadd.f32 %v5201_v5, %v6260_v61  ;;  %v4067_v13 = vmul.f32 %v3965_v18, %v3965_v18 }
 0x1e9   : > { %3995 = vst [vmem:[%s6265_s10 + $0x20] sm:$0xff] %v3963_v45  ;;  %v4026_v24 = vadd.f32 %v4025_v62, %v3963_v45  ;;  %v4065_v57 = vmul.f32 %v3963_v45, %v3963_v45  ;;  %v4095_v14 = vadd.f32 %v4094_v26, %v4064_v55  ;;  %v3964_v46 = vadd.f32 %v5202_v8, %v6260_v61 }
 0x1ea   : > { %3998 = vst [vmem:[%s6265_s10 + $0x38] sm:$0xff] %v3966_v6  ;;  %v4068_v49 = vmul.f32 %v3966_v6, %v3966_v6 }
 0x1eb   : > { %v4096_v27 = vadd.f32 %v4095_v14, %v4065_v57  ;;  %3996 = vst [vmem:[%s6265_s10 + $0x28] sm:$0xff] %v3964_v46  ;;  %v4027_v12 = vadd.f32 %v4026_v24, %v3964_v46  ;;  %v4066_v11 = vmul.f32 %v3964_v46, %v3964_v46  ;;  %v5157_v16 = vpop.f32.mrb[8].mxu0 }
 0x1ec   : > { %v5203_v17 = vadd.f32 %v5157_v16, %v4917_v35  ;;  %v3761_v47 = vpop.f32.mrb[9].mxu0 }
 0x1ed   : > { %v4028_v9 = vadd.f32 %v4027_v12, %v3965_v18  ;;  %v4097_v19 = vadd.f32 %v4096_v27, %v4066_v11  ;;  %v5204_v23 = vadd.f32 %v3761_v47, %v6242_v29  ;;  %v5158_v10 = vpop.f32.mrb[10].mxu0 }
 0x1ee   : > { %v3969_v31 = vadd.f32 %v5203_v17, %v6260_v61  ;;  %v5205_v51 = vadd.f32 %v5158_v10, %v6244_v53  ;;  %v3764_v32 = vpop.f32.mrb[11].mxu0 }
 0x1ef   : > { %v4098_v48 = vadd.f32 %v4097_v19, %v4067_v13  ;;  %v3967_v25 = vadd.f32 %v5204_v23, %v6260_v61  ;;  %v4029_v50 = vadd.f32 %v4028_v9, %v3966_v6  ;;  %v5206_v56 = vadd.f32 %v3764_v32, %v6246_v60 }
 0x1f0   : > { %4001 = vst [vmem:[%s6265_s10 + $0x50] sm:$0xff] %v3969_v31  ;;  %v3970_v35 = vadd.f32 %v5205_v51, %v6260_v61  ;;  %v4071_v60 = vmul.f32 %v3969_v31, %v3969_v31 }
 0x1f1   : > { %3999 = vst [vmem:[%s6265_s10 + $0x40] sm:$0xff] %v3967_v25  ;;  %v4030_v29 = vadd.f32 %v4029_v50, %v3967_v25  ;;  %v4069_v20 = vmul.f32 %v3967_v25, %v3967_v25  ;;  %v4099_v28 = vadd.f32 %v4098_v48, %v4068_v49  ;;  %v3968_v30 = vadd.f32 %v5206_v56, %v6260_v61 }
 0x1f2   : > { %4002 = vst [vmem:[%s6265_s10 + $0x58] sm:$0xff] %v3970_v35  ;;  %v4072_v58 = vmul.f32 %v3970_v35, %v3970_v35 }
 0x1f3   : > { %v4100_v33 = vadd.f32 %v4099_v28, %v4069_v20  ;;  %4000 = vst [vmem:[%s6265_s10 + $0x48] sm:$0xff] %v3968_v30  ;;  %v4031_v53 = vadd.f32 %v4030_v29, %v3968_v30  ;;  %v4070_v22 = vmul.f32 %v3968_v30, %v3968_v30  ;;  %v5161_v37 = vpop.f32.mrb[12].mxu0 }
 0x1f4   : > { %v5207_v63 = vadd.f32 %v5161_v37, %v6248_v36  ;;  %v3777_v0 = vpop.f32.mrb[13].mxu0 }
 0x1f5   : > { %v4032_v1 = vadd.f32 %v4031_v53, %v3969_v31  ;;  %v4101_v21 = vadd.f32 %v4100_v33, %v4070_v22  ;;  %v5208_v42 = vadd.f32 %v3777_v0, %v6250_v40  ;;  %v5162_v52 = vpop.f32.mrb[14].mxu0 }
 0x1f6   : > { %v3973_v59 = vadd.f32 %v5207_v63, %v6260_v61  ;;  %v5209_v2 = vadd.f32 %v5162_v52, %v6252_v41  ;;  %v3780_v3 = vpop.f32.mrb[15].mxu0 }
 0x1f7   : > { %v4102_v54 = vadd.f32 %v4101_v21, %v4071_v60  ;;  %v3971_v38 = vadd.f32 %v5208_v42, %v6260_v61  ;;  %v4033_v36 = vadd.f32 %v4032_v1, %v3970_v35  ;;  %v5210_v39 = vadd.f32 %v3780_v3, %v6254_v43 }
 0x1f8   : > { %4005 = vst [vmem:[%s6265_s10 + $0x70] sm:$0xff] %v3973_v59  ;;  %v3974_v4 = vadd.f32 %v5209_v2, %v6260_v61  ;;  %v4075_v43 = vmul.f32 %v3973_v59, %v3973_v59 }
 0x1f9   : > { %4003 = vst [vmem:[%s6265_s10 + $0x60] sm:$0xff] %v3971_v38  ;;  %v4034_v40 = vadd.f32 %v4033_v36, %v3971_v38  ;;  %v4073_v34 = vmul.f32 %v3971_v38, %v3971_v38  ;;  %v4103_v44 = vadd.f32 %v4102_v54, %v4072_v58  ;;  %v3972_v15 = vadd.f32 %v5210_v39, %v6260_v61 }
 0x1fa   : > { %4006 = vst [vmem:[%s6265_s10 + $0x78] sm:$0xff] %v3974_v4  ;;  %v4076_v46 = vmul.f32 %v3974_v4, %v3974_v4 }
 0x1fb   : > { %v4104_v55 = vadd.f32 %v4103_v44, %v4073_v34  ;;  %4004 = vst [vmem:[%s6265_s10 + $0x68] sm:$0xff] %v3972_v15  ;;  %v4035_v41 = vadd.f32 %v4034_v40, %v3972_v15  ;;  %v4074_v18 = vmul.f32 %v3972_v15, %v3972_v15  ;;  %v5165_v7 = vpop.f32.mrb[16].mxu0 }
 0x1fc   : > { %v3793_v62 = vpop.f32.mrb[17].mxu0 }
 0x1fd   : > { %v4036_v8 = vadd.f32 %v4035_v41, %v3973_v59  ;;  %v4105_v6 = vadd.f32 %v4104_v55, %v4074_v18  ;;  %v5166_v14 = vpop.f32.mrb[18].mxu0 }
 0x1fe   : > { %v4973_v5 = vpop.f32.mrb[16].mxu1  ;;  %v3796_v16 = vpop.f32.mrb[19].mxu0 }
 0x1ff   : > { %v5211_v26 = vadd.f32 %v5165_v7, %v4973_v5  ;;  %v2312_v45 = vpop.f32.mrb[17].mxu1  ;;  %v4106_v17 = vadd.f32 %v4105_v6, %v4075_v43  ;;  %v4037_v13 = vadd.f32 %v4036_v8, %v3974_v4 }
 0x200   : > { %v5212_v24 = vadd.f32 %v3793_v62, %v2312_v45  ;;  %v4974_v57 = vpop.f32.mrb[18].mxu1 }
 0x201   : > { %v3977_v27 = vadd.f32 %v5211_v26, %v6260_v61  ;;  %v5213_v12 = vadd.f32 %v5166_v14, %v4974_v57  ;;  %v2315_v11 = vpop.f32.mrb[19].mxu1  ;;  %v4107_v49 = vadd.f32 %v4106_v17, %v4076_v46 }
 0x202   : > { %v3975_v47 = vadd.f32 %v5212_v24, %v6260_v61  ;;  %v5214_v9 = vadd.f32 %v3796_v16, %v2315_v11 }
 0x203   : > { %4009 = vst [vmem:[%s6265_s10 + $0x90] sm:$0xff] %v3977_v27  ;;  %v3978_v19 = vadd.f32 %v5213_v12, %v6260_v61  ;;  %v5169_v50 = vpop.f32.mrb[20].mxu0  ;;  %v4079_v20 = vmul.f32 %v3977_v27, %v3977_v27 }
 0x204   : > { %4007 = vst [vmem:[%s6265_s10 + $0x80] sm:$0xff] %v3975_v47  ;;  %v4038_v23 = vadd.f32 %v4037_v13, %v3975_v47  ;;  %v4077_v10 = vmul.f32 %v3975_v47, %v3975_v47  ;;  %v3976_v31 = vadd.f32 %v5214_v9, %v6260_v61  ;;  %v3809_v29 = vpop.f32.mrb[21].mxu0 }
 0x205   : > { %4010 = vst [vmem:[%s6265_s10 + $0x98] sm:$0xff] %v3978_v19  ;;  %v5170_v22 = vpop.f32.mrb[22].mxu0  ;;  %v4080_v37 = vmul.f32 %v3978_v19, %v3978_v19 }
 0x206   : > { %v4108_v51 = vadd.f32 %v4107_v49, %v4077_v10  ;;  %4008 = vst [vmem:[%s6265_s10 + $0x88] sm:$0xff] %v3976_v31  ;;  %v4039_v32 = vadd.f32 %v4038_v23, %v3976_v31  ;;  %v4078_v48 = vmul.f32 %v3976_v31, %v3976_v31  ;;  %v4977_v25 = vpop.f32.mrb[20].mxu1  ;;  %v3812_v1 = vpop.f32.mrb[23].mxu0 }
 0x207   : > { %v5215_v56 = vadd.f32 %v5169_v50, %v4977_v25  ;;  %v2328_v35 = vpop.f32.mrb[21].mxu1 }
 0x208   : > { %v4040_v28 = vadd.f32 %v4039_v32, %v3977_v27  ;;  %v4109_v30 = vadd.f32 %v4108_v51, %v4078_v48  ;;  %v5216_v33 = vadd.f32 %v3809_v29, %v2328_v35  ;;  %v4978_v53 = vpop.f32.mrb[22].mxu1 }
 0x209   : > { %v3981_v63 = vadd.f32 %v5215_v56, %v6260_v61  ;;  %v5217_v0 = vadd.f32 %v5170_v22, %v4978_v53  ;;  %v2331_v60 = vpop.f32.mrb[23].mxu1 }
 0x20a   : > { %v4110_v21 = vadd.f32 %v4109_v30, %v4079_v20  ;;  %v3979_v42 = vadd.f32 %v5216_v33, %v6260_v61  ;;  %v4041_v52 = vadd.f32 %v4040_v28, %v3978_v19  ;;  %v5218_v58 = vadd.f32 %v3812_v1, %v2331_v60 }
 0x20b   : > { %4013 = vst [vmem:[%s6265_s10 + $0xb0] sm:$0xff] %v3981_v63  ;;  %v3982_v59 = vadd.f32 %v5217_v0, %v6260_v61  ;;  %v5173_v34 = vpop.f32.mrb[24].mxu0  ;;  %v4083_v41 = vmul.f32 %v3981_v63, %v3981_v63 }
 0x20c   : > { %4011 = vst [vmem:[%s6265_s10 + $0xa0] sm:$0xff] %v3979_v42  ;;  %v4042_v2 = vadd.f32 %v4041_v52, %v3979_v42  ;;  %v4081_v3 = vmul.f32 %v3979_v42, %v3979_v42  ;;  %v4111_v54 = vadd.f32 %v4110_v21, %v4080_v37  ;;  %v3980_v38 = vadd.f32 %v5218_v58, %v6260_v61  ;;  %v3825_v55 = vpop.f32.mrb[25].mxu0 }
 0x20d   : > { %4014 = vst [vmem:[%s6265_s10 + $0xb8] sm:$0xff] %v3982_v59  ;;  %v5174_v45 = vpop.f32.mrb[26].mxu0  ;;  %v4084_v62 = vmul.f32 %v3982_v59, %v3982_v59 }
 0x20e   : > { %v4112_v36 = vadd.f32 %v4111_v54, %v4081_v3  ;;  %4012 = vst [vmem:[%s6265_s10 + $0xa8] sm:$0xff] %v3980_v38  ;;  %v4043_v39 = vadd.f32 %v4042_v2, %v3980_v38  ;;  %v4082_v4 = vmul.f32 %v3980_v38, %v3980_v38  ;;  %v4981_v40 = vpop.f32.mrb[24].mxu1  ;;  %v3828_v24 = vpop.f32.mrb[27].mxu0 }
 0x20f   : > { %v5219_v44 = vadd.f32 %v5173_v34, %v4981_v40  ;;  %v2344_v15 = vpop.f32.mrb[25].mxu1 }
 0x210   : > { %v4044_v18 = vadd.f32 %v4043_v39, %v3981_v63  ;;  %v4113_v5 = vadd.f32 %v4112_v36, %v4082_v4  ;;  %v5220_v7 = vadd.f32 %v3825_v55, %v2344_v15  ;;  %v4982_v26 = vpop.f32.mrb[26].mxu1 }
 0x211   : > { %v3985_v43 = vadd.f32 %v5219_v44, %v6260_v61  ;;  %v5221_v8 = vadd.f32 %v5174_v45, %v4982_v26  ;;  %v2347_v6 = vpop.f32.mrb[27].mxu1 }
 0x212   : > { %v4114_v57 = vadd.f32 %v4113_v5, %v4083_v41  ;;  %v3983_v14 = vadd.f32 %v5220_v7, %v6260_v61  ;;  %v4045_v46 = vadd.f32 %v4044_v18, %v3982_v59  ;;  %v5222_v27 = vadd.f32 %v3828_v24, %v2347_v6 }
 0x213   : > { %4017 = vst [vmem:[%s6265_s10 + $0xd0] sm:$0xff] %v3985_v43  ;;  %v3986_v12 = vadd.f32 %v5221_v8, %v6260_v61  ;;  %v5177_v10 = vpop.f32.mrb[28].mxu0  ;;  %v4087_v32 = vmul.f32 %v3985_v43, %v3985_v43 }
 0x214   : > { %4015 = vst [vmem:[%s6265_s10 + $0xc0] sm:$0xff] %v3983_v14  ;;  %v4046_v11 = vadd.f32 %v4045_v46, %v3983_v14  ;;  %v4085_v16 = vmul.f32 %v3983_v14, %v3983_v14  ;;  %v4115_v17 = vadd.f32 %v4114_v57, %v4084_v62  ;;  %v3984_v47 = vadd.f32 %v5222_v27, %v6260_v61  ;;  %v3841_v51 = vpop.f32.mrb[29].mxu0 }
 0x215   : > { %4018 = vst [vmem:[%s6265_s10 + $0xd8] sm:$0xff] %v3986_v12  ;;  %v5178_v35 = vpop.f32.mrb[30].mxu0  ;;  %v4088_v29 = vmul.f32 %v3986_v12, %v3986_v12 }
 0x216   : > { %v4116_v13 = vadd.f32 %v4115_v17, %v4085_v16  ;;  %4016 = vst [vmem:[%s6265_s10 + $0xc8] sm:$0xff] %v3984_v47  ;;  %v4047_v9 = vadd.f32 %v4046_v11, %v3984_v47  ;;  %v4086_v19 = vmul.f32 %v3984_v47, %v3984_v47  ;;  %v4985_v23 = vpop.f32.mrb[28].mxu1  ;;  %v3844_v33 = vpop.f32.mrb[31].mxu0 }
 0x217   : > { %v5223_v49 = vadd.f32 %v5177_v10, %v4985_v23  ;;  %v2360_v31 = vpop.f32.mrb[29].mxu1 }
 0x218   : > { %v4048_v48 = vadd.f32 %v4047_v9, %v3985_v43  ;;  %v4117_v25 = vadd.f32 %v4116_v13, %v4086_v19  ;;  %v5224_v50 = vadd.f32 %v3841_v51, %v2360_v31  ;;  %v4986_v56 = vpop.f32.mrb[30].mxu1 }
 0x219   : > { %v3989_v20 = vadd.f32 %v5223_v49, %v6260_v61  ;;  %v5225_v28 = vadd.f32 %v5178_v35, %v4986_v56  ;;  %v2363_v30 = vpop.f32.mrb[31].mxu1 }
 0x21a   : > { %v4118_v53 = vadd.f32 %v4117_v25, %v4087_v32  ;;  %v3987_v22 = vadd.f32 %v5224_v50, %v6260_v61  ;;  %v4049_v37 = vadd.f32 %v4048_v48, %v3986_v12  ;;  %v5226_v63 = vadd.f32 %v3844_v33, %v2363_v30 }
 0x21b   : > { %4021 = vst [vmem:[%s6265_s10 + $0xf0] sm:$0xff] %v3989_v20  ;;  %v3990_v0 = vadd.f32 %v5225_v28, %v6260_v61  ;;  %v4091_v2 = vmul.f32 %v3989_v20, %v3989_v20 }
 0x21c   : > { %4019 = vst [vmem:[%s6265_s10 + $0xe0] sm:$0xff] %v3987_v22  ;;  %v4050_v60 = vadd.f32 %v4049_v37, %v3987_v22  ;;  %v4089_v1 = vmul.f32 %v3987_v22, %v3987_v22  ;;  %v4119_v21 = vadd.f32 %v4118_v53, %v4088_v29  ;;  %v3988_v42 = vadd.f32 %v5226_v63, %v6260_v61 }
 0x21d   : > { %4022 = vst [vmem:[%s6265_s10 + $0xf8] sm:$0xff] %v3990_v0  ;;  %v4092_v38 = vmul.f32 %v3990_v0, %v3990_v0 }
 0x21e   : > { %v4120_v52 = vadd.f32 %v4119_v21, %v4089_v1  ;;  %4020 = vst [vmem:[%s6265_s10 + $0xe8] sm:$0xff] %v3988_v42  ;;  %v4051_v58 = vadd.f32 %v4050_v60, %v3988_v42  ;;  %v4090_v59 = vmul.f32 %v3988_v42, %v3988_v42 }
 0x220   : > { %v4052_v3 = vadd.f32 %v4051_v58, %v3989_v20  ;;  %v4121_v54 = vadd.f32 %v4120_v52, %v4090_v59 }
 0x222   : > { %v4053_v36 = vadd.f32 %v4052_v3, %v3990_v0  ;;  %v4122_v39 = vadd.f32 %v4121_v54, %v4091_v2 }
 0x224   : > { %v4054_v4 = vrot.slane %v4053_v36, 4  ;;  %v4123_v40 = vadd.f32 %v4122_v39, %v4092_v38 }
 0x226   : > { %v4055_v34 = vadd.f32 %v4054_v4, %v4053_v36  ;;  %v4124_v44 = vrot.slane %v4123_v40, 4 }
 0x228   : > { %v4056_v15 = vrot.slane %v4055_v34, 2  ;;  %v4125_v55 = vadd.f32 %v4124_v44, %v4123_v40 }
 0x22a   : > { %v4057_v61 = vadd.f32 %v4056_v15, %v4055_v34  ;;  %v4126_v41 = vrot.slane %v4125_v55, 2 }
 0x22c   : > { %v4058_v18 = vrot.slane %v4057_v61, 1  ;;  %v4127_v5 = vadd.f32 %v4126_v41, %v4125_v55 }
 0x22e   : > { %v4059_v7 = vadd.f32 %v4058_v18, %v4057_v61  ;;  %v4128_v26 = vrot.slane %v4127_v5, 1 }
 0x230   : > { %4060 = vst [vmem:[%s292_s13] sm:$0x1] %v4059_v7  ;;  %v4129_v45 = vadd.f32 %v4128_v26, %v4127_v5 }
 0x232   : > { %4130 = vst [vmem:[%s295_s16] sm:$0x1] %v4129_v45 }
 0x233 PF: > { %s18_s24 = sadd.s32 1, %s5547_s24  }
 0x234   : > { %p15_p4 = scmp.ge.s32.totalorder %s18_s24, 4  }
 0x236   :  { %17 = sbr.rel (!%p15_p4) target bundleno = 1 (0x1), region = 104 }

// kernel: double_conv_forward.3
= control target key start
LH: loop header
LB: loop body
LE: loop exit
PB: predicated region body
PF: predicated region fallthrough
CT: control target
= control target key end

     0   :  { %s5782_s24 = smov 0   ;;  %s6357_s0 = inlined_call_operand.vmem [shape: bf16[2,16,16,128], index: 0, kind: input, shape index: {}]   ;;  %s6358_s1 = inlined_call_operand.vmem [shape: f32[1,128], index: 1, kind: input, shape index: {}]   ;;  %s6359_s2 = inlined_call_operand.vmem [shape: f32[1,128], index: 2, kind: input, shape index: {}]   ;;  %s6360_s3 = inlined_call_operand.vmem [shape: bf16[9,128,128], index: 3, kind: input, shape index: {}]   ;;  %s6361_s4 = inlined_call_operand.vmem [shape: f32[1,128], index: 4, kind: input, shape index: {}]   ;;  %s6362_s5 = inlined_call_operand.vmem [shape: bf16[2,16,16,128], index: 5, kind: output, shape index: {0}]   ;;  %s6363_s6 = inlined_call_operand.vmem [shape: f32[2,1,128], index: 6, kind: output, shape index: {1}]   ;;  %s6364_s7 = inlined_call_operand.vmem [shape: f32[2,1,128], index: 7, kind: output, shape index: {2}]  }
   0x1 LB: > { %s4254_s1 = sadd.s32 4294967295, %s5738_s24   ;;  %p4258_p0 = scmp.ge.s32.totalorder %s5738_s24, 1  ;;  %s5738_s24 = sphi %s5782_s24, %s18_s24  }
   0x2   : > { %p242_p1 = scmp.lt.s32.totalorder %s5738_s24, 3 }
   0x4   : > { %p243_p2 = pnand %p4258_p0, %p242_p1 }
   0x5   : > { %v5635_v0 = vld [vmem:[%s6360_s3] sm:$0xff] (!%p243_p2)   ;;  %v5740_v2 = vmov (!%p243_p2), 0.0   ;;  %v5637_v3 = vld [vmem:[%s6360_s3 + $0x8] sm:$0xff] (!%p243_p2)   ;;  %p280_p3 = scmp.lt.s32.totalorder (!%p243_p2), %s4254_s1, 1  ;;  %v5639_v5 = vld [vmem:[%s6360_s3 + $0x10] sm:$0xff] (!%p243_p2)   ;;  %v5741_v7 = vmov (!%p243_p2), 0.0|0.0  }
   0x6   : > { %246 = sbr.rel (%p243_p2) target bundleno = 563 (0x233), region = 40  ;;  %v5636_v1 = vld [vmem:[%s6360_s3 + $0x100] sm:$0xff] (!%p243_p2)   ;;  %361 = vst [vmem:[#allocation2] sm:$0xff] (!%p243_p2), %v5740_v2  ;;  %362 = vst [vmem:[#allocation2 + $0x8] sm:$0xff] (!%p243_p2), %v5740_v2  ;;  %4922 = vmatprep.subr.bf16.mxu1 (!%p243_p2), %v5635_v0  ;;  %v5638_v4 = vld [vmem:[%s6360_s3 + $0x108] sm:$0xff] (!%p243_p2)   ;;  %4938 = vmatprep.mubr.bf16.mxu1 (!%p243_p2), %v5741_v7 }
   0x7   : > { %363 = vst [vmem:[#allocation2 + $0x10] sm:$0x3] (!%p243_p2), %v5740_v2  ;;  %364 = vst [vmem:[#allocation2 + $0x18] sm:$0xff] (!%p243_p2), %v5740_v2  ;;  %5114 = vmatprep.subr.bf16.mxu0 (!%p243_p2), %v5636_v1  ;;  %4923 = vmatpush3.bf16.msra.mxu1 (!%p243_p2), %v5635_v0  ;;  %v5640_v6 = vld [vmem:[%s6360_s3 + $0x110] sm:$0xff] (!%p243_p2)   ;;  %v5641_v8 = vld [vmem:[%s6360_s3 + $0x18] sm:$0xff] (!%p243_p2)  }
   0x8   : > { %365 = vst [vmem:[#allocation2 + $0x20] sm:$0xff] (!%p243_p2), %v5740_v2  ;;  %366 = vst [vmem:[#allocation2 + $0x28] sm:$0x3] (!%p243_p2), %v5740_v2  ;;  %5115 = vmatpush3.bf16.msra.mxu0 (!%p243_p2), %v5636_v1  ;;  %4924 = vmatprep.subr.bf16.mxu1 (!%p243_p2), %v5637_v3  ;;  %v5642_v9 = vld [vmem:[%s6360_s3 + $0x118] sm:$0xff] (!%p243_p2)   ;;  %v5643_v10 = vld [vmem:[%s6360_s3 + $0x20] sm:$0xff] (!%p243_p2)  }
   0x9   : > { %367 = vst [vmem:[#allocation2 + $0x30] sm:$0xff] (!%p243_p2), %v5740_v2  ;;  %368 = vst [vmem:[#allocation2 + $0x38] sm:$0xff] (!%p243_p2), %v5740_v2  ;;  %5116 = vmatprep.subr.bf16.mxu0 (!%p243_p2), %v5638_v4  ;;  %v5644_v11 = vld [vmem:[%s6360_s3 + $0x120] sm:$0xff] (!%p243_p2)   ;;  %v5645_v12 = vld [vmem:[%s6360_s3 + $0x28] sm:$0xff] (!%p243_p2)  }
   0xa   : > { %369 = vst [vmem:[#allocation2 + $0x40] sm:$0x3] (!%p243_p2), %v5740_v2  ;;  %370 = vst [vmem:[#allocation2 + $0x48] sm:$0xff] (!%p243_p2), %v5740_v2  ;;  %v5646_v15 = vld [vmem:[%s6360_s3 + $0x128] sm:$0xff] (!%p243_p2)   ;;  %v5647_v21 = vld [vmem:[%s6360_s3 + $0x30] sm:$0xff] (!%p243_p2)  }
   0xb   : > { %371 = vst [vmem:[#allocation2 + $0x50] sm:$0xff] (!%p243_p2), %v5740_v2  ;;  %372 = vst [vmem:[#allocation2 + $0x58] sm:$0x3] (!%p243_p2), %v5740_v2  ;;  %4925 = vmatpush3.bf16.msra.mxu1 (!%p243_p2), %v5637_v3  ;;  %v5648_v23 = vld [vmem:[%s6360_s3 + $0x130] sm:$0xff] (!%p243_p2)   ;;  %v5649_v29 = vld [vmem:[%s6360_s3 + $0x38] sm:$0xff] (!%p243_p2)  }
   0xc   : > { %373 = vst [vmem:[#allocation2 + $0x60] sm:$0xff] (!%p243_p2), %v5740_v2  ;;  %374 = vst [vmem:[#allocation2 + $0x68] sm:$0xff] (!%p243_p2), %v5740_v2  ;;  %5117 = vmatpush3.bf16.msra.mxu0 (!%p243_p2), %v5638_v4  ;;  %4926 = vmatprep.subr.bf16.mxu1 (!%p243_p2), %v5639_v5  ;;  %v5650_v31 = vld [vmem:[%s6360_s3 + $0x138] sm:$0xff] (!%p243_p2)   ;;  %v5652_v34 = vld [vmem:[%s6360_s3 + $0x40] sm:$0xff] (!%p243_p2)  }
   0xd   : > { %375 = vst [vmem:[#allocation2 + $0x70] sm:$0x3] %v5740_v2  ;;  %376 = vst [vmem:[#allocation2 + $0x78] sm:$0xff] %v5740_v2  ;;  %s6366_s1 = smov (!%p280_p3, %s4254_s1), 1  ;;  %5118 = vmatprep.subr.bf16.mxu0 %v5640_v6  ;;  %v5654_v37 = vld [vmem:[%s6360_s3 + $0x140] sm:$0xff]   ;;  %v5655_v46 = vld [vmem:[%s6360_s3 + $0x148] sm:$0xff]  }
   0xe   : > { %377 = vst [vmem:[#allocation2 + $0x80] sm:$0xff] %v5740_v2  ;;  %378 = vst [vmem:[#allocation2 + $0x88] sm:$0x3] %v5740_v2  ;;  %s4498_s17 = sshll.u32 %s6366_s1, 7  ;;  %v5657_v51 = vld [vmem:[%s6360_s3 + $0x48] sm:$0xff]   ;;  %v5662_v54 = vld [vmem:[%s6360_s3 + $0x50] sm:$0xff]   ;;  %s292_s22 = scalar_lea.vmem %s6363_s6, %s6366_s1 }
   0xf   : > { %379 = vst [vmem:[#allocation2 + $0x90] sm:$0xff] %v5740_v2  ;;  %380 = vst [vmem:[#allocation2 + $0x98] sm:$0xff] %v5740_v2  ;;  %4927 = vmatpush3.bf16.msra.mxu1 %v5639_v5  ;;  %s5832_s2 = scalar_lea.vmem %s6357_s0, %s4498_s17  ;;  %v5659_v60 = vld [vmem:[%s6360_s3 + $0x150] sm:$0xff]   ;;  %v5660_v4 = vld [vmem:[%s6360_s3 + $0x158] sm:$0xff]   ;;  %s6293_s20 = scalar_lea.vmem %s6362_s5, %s4498_s17 }
  0x10   : > { %381 = vst [vmem:[#allocation2 + $0xa0] sm:$0x3] %v5740_v2  ;;  %382 = vst [vmem:[#allocation2 + $0xa8] sm:$0xff] %v5740_v2  ;;  %5119 = vmatpush3.bf16.msra.mxu0 %v5640_v6  ;;  %4928 = vmatprep.subr.bf16.mxu1 %v5641_v8  ;;  %v4533_v13 = vld [vmem:[%s5832_s2] sm:$0xff]   ;;  %v4676_v18 = vld [vmem:[%s5832_s2 + $0x8] sm:$0xff]   ;;  %s295_s26 = scalar_lea.vmem %s6364_s7, %s6366_s1 }
  0x11   : > { %383 = vst [vmem:[#allocation2 + $0xb0] sm:$0xff] %v5740_v2  ;;  %384 = vst [vmem:[#allocation2 + $0xb8] sm:$0x3] %v5740_v2  ;;  %5120 = vmatprep.subr.bf16.mxu0 %v5642_v9  ;;  %v5839_v14 = vld [vmem:[%s5832_s2] sm:$0xff]  ;;  %v4534_v16 = vunpack.c.l.bf16 %v4533_v13  ;;  %v4535_v17 = vunpack.c.h.bf16 %v4533_v13  ;;  %v4538_v19 = vunpack.c.l.bf16 %v4676_v18  ;;  %v4539_v20 = vunpack.c.h.bf16 %v4676_v18  ;;  %v4677_v22 = vld [vmem:[%s5832_s2 + $0x10] sm:$0xff]  }
  0x12   : > { %385 = vst [vmem:[#allocation2 + $0xc0] sm:$0xff] %v5740_v2  ;;  %386 = vst [vmem:[#allocation2 + $0xc8] sm:$0xff] %v5740_v2  ;;  %5130 = vmatprep.mubr.bf16.mxu0 %v5839_v14  ;;  %v4542_v24 = vunpack.c.l.bf16 %v4677_v22  ;;  %v4543_v25 = vunpack.c.h.bf16 %v4677_v22  ;;  %v4678_v26 = vld [vmem:[%s5832_s2 + $0x18] sm:$0xff]   ;;  %v4679_v30 = vld [vmem:[%s5832_s2 + $0x20] sm:$0xff]  }
  0x13   : > { %387 = vst [vmem:[#allocation2 + $0xd0] sm:$0x3] %v5740_v2  ;;  %388 = vst [vmem:[#allocation2 + $0xd8] sm:$0xff] %v5740_v2  ;;  %4929 = vmatpush3.bf16.msra.mxu1 %v5641_v8  ;;  %v4546_v27 = vunpack.c.l.bf16 %v4678_v26  ;;  %v4547_v28 = vunpack.c.h.bf16 %v4678_v26  ;;  %v4550_v32 = vunpack.c.l.bf16 %v4679_v30  ;;  %v4551_v33 = vunpack.c.h.bf16 %v4679_v30  ;;  %v4680_v38 = vld [vmem:[%s5832_s2 + $0x28] sm:$0xff]   ;;  %v4681_v45 = vld [vmem:[%s5832_s2 + $0x30] sm:$0xff]  }
  0x14   : > { %389 = vst [vmem:[#allocation2 + $0xe0] sm:$0xff] %v5740_v2  ;;  %390 = vst [vmem:[#allocation2 + $0xe8] sm:$0x3] %v5740_v2  ;;  %5121 = vmatpush3.bf16.msra.mxu0 %v5642_v9  ;;  %4930 = vmatprep.subr.bf16.mxu1 %v5643_v10  ;;  %v4554_v40 = vunpack.c.l.bf16 %v4680_v38  ;;  %v4555_v41 = vunpack.c.h.bf16 %v4680_v38  ;;  %v5869_v44 = vld [vmem:[%s5832_s2 + $0x8] sm:$0xff]  ;;  %v4558_v48 = vunpack.c.l.bf16 %v4681_v45  ;;  %v4559_v49 = vunpack.c.h.bf16 %v4681_v45  ;;  %v5878_v50 = vld [vmem:[%s5832_s2 + $0x10] sm:$0xff] }
  0x15   : > { %391 = vst [vmem:[#allocation2 + $0xf0] sm:$0xff] %v5740_v2  ;;  %392 = vst [vmem:[#allocation2 + $0xf8] sm:$0xff] %v5740_v2  ;;  %5122 = vmatprep.subr.bf16.mxu0 %v5644_v11  ;;  %v4682_v52 = vld [vmem:[%s5832_s2 + $0x38] sm:$0xff]   ;;  %v4683_v62 = vld [vmem:[%s5832_s2 + $0x40] sm:$0xff]  }
  0x16   : > { %393 = vst [vmem:[#allocation2 + $0x100] sm:$0x3] %v5740_v2  ;;  %394 = vst [vmem:[#allocation2 + $0x108] sm:$0xff] %v5740_v2  ;;  %v4562_v55 = vunpack.c.l.bf16 %v4682_v52  ;;  %v4563_v56 = vunpack.c.h.bf16 %v4682_v52  ;;  %v5897_v63 = vld [vmem:[%s5832_s2 + $0x18] sm:$0xff]  ;;  %v4566_v1 = vunpack.c.l.bf16 %v4683_v62  ;;  %v5902_v3 = vld [vmem:[%s5832_s2 + $0x20] sm:$0xff] }
  0x17   : > { %395 = vst [vmem:[#allocation2 + $0x110] sm:$0xff] %v5740_v2  ;;  %396 = vst [vmem:[#allocation2 + $0x118] sm:$0x3] %v5740_v2  ;;  %4931 = vmatpush3.bf16.msra.mxu1 %v5643_v10  ;;  %v4684_v5 = vld [vmem:[%s5832_s2 + $0x48] sm:$0xff]   ;;  %v5667_v6 = vld [vmem:[%s6360_s3 + $0x58] sm:$0xff]  }
  0x18   : > { %397 = vst [vmem:[#allocation2 + $0x120] sm:$0xff] %v5740_v2  ;;  %398 = vst [vmem:[#allocation2 + $0x128] sm:$0xff] %v5740_v2  ;;  %5123 = vmatpush3.bf16.msra.mxu0 %v5644_v11  ;;  %4932 = vmatprep.subr.bf16.mxu1 %v5645_v12  ;;  %v4570_v7 = vunpack.c.l.bf16 %v4684_v5  ;;  %v4571_v8 = vunpack.c.h.bf16 %v4684_v5  ;;  %v4685_v9 = vld [vmem:[%s5832_s2 + $0x50] sm:$0xff]   ;;  %v5673_v30 = vld [vmem:[%s6360_s3 + $0x68] sm:$0xff]  }
  0x19   : > { %399 = vst [vmem:[#allocation2 + $0x130] sm:$0x3] %v5740_v2  ;;  %400 = vst [vmem:[#allocation2 + $0x138] sm:$0xff] %v5740_v2  ;;  %5124 = vmatprep.subr.bf16.mxu0 %v5646_v15  ;;  %v4575_v13 = vunpack.c.h.bf16 %v4685_v9  ;;  %v5932_v26 = vld [vmem:[%s5832_s2 + $0x30] sm:$0xff]  ;;  %v5670_v52 = vld [vmem:[%s6360_s3 + $0x178] sm:$0xff]  }
  0x1a   : > { %401 = vst [vmem:[#allocation2 + $0x140] sm:$0xff] %v5740_v2  ;;  %402 = vst [vmem:[#allocation2 + $0x148] sm:$0x3] %v5740_v2 }
  0x1b   : > { %403 = vst [vmem:[#allocation2 + $0x150] sm:$0xff] %v5740_v2  ;;  %404 = vst [vmem:[#allocation2 + $0x158] sm:$0xff] %v5740_v2  ;;  %4933 = vmatpush3.bf16.msra.mxu1 %v5645_v12  ;;  %v4574_v12 = vunpack.c.l.bf16 %v4685_v9 }
  0x1c   : > { %405 = vst [vmem:[#allocation2 + $0x160] sm:$0x3] %v5740_v2  ;;  %406 = vst [vmem:[#allocation2 + $0x168] sm:$0xff] %v5740_v2  ;;  %5125 = vmatpush3.bf16.msra.mxu0 %v5646_v15  ;;  %4934 = vmatprep.subr.bf16.mxu1 %v5647_v21 }
  0x1d   : > { %407 = vst [vmem:[#allocation2 + $0x170] sm:$0xff] %v5740_v2  ;;  %408 = vst [vmem:[#allocation2 + $0x178] sm:$0x3] %v5740_v2  ;;  %5126 = vmatprep.subr.bf16.mxu0 %v5648_v23 }
  0x1e   : > { %409 = vst [vmem:[#allocation2 + $0x180] sm:$0xff] %v5740_v2  ;;  %410 = vst [vmem:[#allocation2 + $0x188] sm:$0xff] %v5740_v2 }
  0x1f   : > { %411 = vst [vmem:[#allocation2 + $0x190] sm:$0x3] %v5740_v2  ;;  %412 = vst [vmem:[#allocation2 + $0x198] sm:$0xff] %v5740_v2  ;;  %4935 = vmatpush3.bf16.msra.mxu1 %v5647_v21  ;;  %v5926_v21 = vld [vmem:[%s5832_s2 + $0x28] sm:$0xff] }
  0x20   : > { %413 = vst [vmem:[#allocation2 + $0x1a0] sm:$0xff] %v5740_v2  ;;  %414 = vst [vmem:[#allocation2 + $0x1a8] sm:$0x3] %v5740_v2  ;;  %5127 = vmatpush3.bf16.msra.mxu0 %v5648_v23  ;;  %4936 = vmatprep.subr.bf16.mxu1 %v5649_v29  ;;  %v4567_v2 = vunpack.c.h.bf16 %v4683_v62 }
  0x21   : > { %416 = vst [vmem:[#allocation2 + $0x19] sm:$0xff] %v4534_v16  ;;  %417 = vst [vmem:[#allocation2 + $0x21] sm:$0xff] %v4535_v17  ;;  %5128 = vmatprep.subr.bf16.mxu0 %v5650_v31  ;;  %v5664_v17 = vld [vmem:[%s6360_s3 + $0x160] sm:$0xff]  }
  0x22   : > { %418 = vst [vmem:[#allocation2 + $0x31] sm:$0xff] %v4538_v19  ;;  %419 = vst [vmem:[#allocation2 + $0x39] sm:$0xff] %v4539_v20  ;;  %v5671_v19 = vld [vmem:[%s6360_s3 + $0x60] sm:$0xff]   ;;  %v4686_v20 = vld [vmem:[%s5832_s2 + $0x58] sm:$0xff]  }
  0x23   : > { %420 = vst [vmem:[#allocation2 + $0x49] sm:$0xff] %v4542_v24  ;;  %421 = vst [vmem:[#allocation2 + $0x51] sm:$0xff] %v4543_v25  ;;  %4937 = vmatpush3.bf16.msra.mxu1 %v5649_v29  ;;  %v4578_v23 = vunpack.c.l.bf16 %v4686_v20  ;;  %v4579_v24 = vunpack.c.h.bf16 %v4686_v20  ;;  %v4687_v25 = vld [vmem:[%s5832_s2 + $0x60] sm:$0xff]   ;;  %v5665_v29 = vld [vmem:[%s6360_s3 + $0x168] sm:$0xff]  }
  0x24   : > { %422 = vst [vmem:[#allocation2 + $0x61] sm:$0xff] %v4546_v27  ;;  %423 = vst [vmem:[#allocation2 + $0x69] sm:$0xff] %v4547_v28  ;;  %5129 = vmatpush3.bf16.msra.mxu0 %v5650_v31  ;;  %4970 = vmatprep.subr.bf16.mxu1 %v5652_v34  ;;  %v4582_v27 = vunpack.c.l.bf16 %v4687_v25  ;;  %v4583_v28 = vunpack.c.h.bf16 %v4687_v25  ;;  %v4690_v25 = vld [vmem:[%s5832_s2 + $0x78] sm:$0xff]  }
  0x25   : > { %424 = vst [vmem:[#allocation2 + $0x79] sm:$0xff] %v4550_v32  ;;  %425 = vst [vmem:[#allocation2 + $0x81] sm:$0xff] %v4551_v33  ;;  %5162 = vmatprep.subr.bf16.mxu0 %v5654_v37  ;;  %v5669_v33 = vld [vmem:[%s6360_s3 + $0x170] sm:$0xff]  }
  0x26   : > { %426 = vst [vmem:[#allocation2 + $0x91] sm:$0xff] %v4554_v40  ;;  %427 = vst [vmem:[#allocation2 + $0x99] sm:$0xff] %v4555_v41  ;;  %v4689_v41 = vld [vmem:[%s5832_s2 + $0x70] sm:$0xff]  }
  0x27   : > { %428 = vst [vmem:[#allocation2 + $0xa9] sm:$0xff] %v4558_v48  ;;  %429 = vst [vmem:[#allocation2 + $0xb1] sm:$0xff] %v4559_v49  ;;  %5131 = vmatmul.mubr.bf16.vlgmr.msra.gmra.mrb[0].mxu0 %v5869_v44  ;;  %v4590_v45 = vunpack.c.l.bf16 %v4689_v41  ;;  %v5955_v48 = vld [vmem:[%s5832_s2 + $0x38] sm:$0xff] }
  0x28   : > { %v482_v35 = vld [vmem:[#allocation2 + $0x18] sm:$0xff]  ;;  %v483_v36 = vld [vmem:[#allocation2 + $0x20] sm:$0xff]  ;;  %5163 = vmatpush3.bf16.msra.mxu0 %v5654_v37  ;;  %430 = vst [vmem:[#allocation2 + $0xc1] sm:$0xff] %v4562_v55  ;;  %431 = vst [vmem:[#allocation2 + $0xc9] sm:$0xff] %v4563_v56  ;;  %5134 = vmatprep.mubr.bf16.mxu0 %v5878_v50 }
  0x29   : > { %v484_v39 = vld [vmem:[#allocation2 + $0x30] sm:$0xff]  ;;  %v485_v42 = vld [vmem:[#allocation2 + $0x38] sm:$0xff]  ;;  %v513_v43 = vpack.c.bf16 %v483_v36, %v482_v35  ;;  %5164 = vmatprep.subr.bf16.mxu0 %v5655_v46  ;;  %432 = vst [vmem:[#allocation2 + $0xd9] sm:$0xff] %v4566_v1  ;;  %433 = vst [vmem:[#allocation2 + $0xe1] sm:$0xff] %v4567_v2 }
  0x2a   : > { %v5875_v47 = vpack.c.bf16 %v485_v42, %v484_v39  ;;  %v486_v53 = vld [vmem:[#allocation2 + $0x48] sm:$0xff]  ;;  %v487_v57 = vld [vmem:[#allocation2 + $0x50] sm:$0xff]  ;;  %434 = vst [vmem:[#allocation2 + $0xf1] sm:$0xff] %v4570_v7  ;;  %435 = vst [vmem:[#allocation2 + $0xf9] sm:$0xff] %v4571_v8 }
  0x2b   : > { %4939 = vmatmul.mubr.bf16.vlgmr.msra.gmra.mrb[0].mxu1 %v513_v43  ;;  %v488_v58 = vld [vmem:[#allocation2 + $0x60] sm:$0xff]  ;;  %v489_v59 = vld [vmem:[#allocation2 + $0x68] sm:$0xff]  ;;  %v5893_v61 = vpack.c.bf16 %v487_v57, %v486_v53  ;;  %436 = vst [vmem:[#allocation2 + $0x109] sm:$0xff] %v4574_v12  ;;  %437 = vst [vmem:[#allocation2 + $0x111] sm:$0xff] %v4575_v13 }
  0x2c   : > { %4971 = vmatpush3.bf16.msra.mxu1 %v5652_v34  ;;  %4942 = vmatprep.mubr.bf16.mxu1 %v5875_v47  ;;  %v5899_v0 = vpack.c.bf16 %v489_v59, %v488_v58  ;;  %v490_v10 = vld [vmem:[#allocation2 + $0x78] sm:$0xff]  ;;  %v491_v11 = vld [vmem:[#allocation2 + $0x80] sm:$0xff]  ;;  %438 = vst [vmem:[#allocation2 + $0x121] sm:$0xff] %v4578_v23  ;;  %439 = vst [vmem:[#allocation2 + $0x129] sm:$0xff] %v4579_v24 }
  0x2d   : > { %4972 = vmatprep.subr.bf16.mxu1 %v5657_v51  ;;  %5165 = vmatpush3.bf16.msra.mxu0 %v5655_v46  ;;  %v492_v15 = vld [vmem:[#allocation2 + $0x90] sm:$0xff]  ;;  %v493_v16 = vld [vmem:[#allocation2 + $0x98] sm:$0xff]  ;;  %v5919_v18 = vpack.c.bf16 %v491_v11, %v490_v10  ;;  %440 = vst [vmem:[#allocation2 + $0x139] sm:$0xff] %v4582_v27  ;;  %441 = vst [vmem:[#allocation2 + $0x141] sm:$0xff] %v4583_v28  ;;  %v4591_v46 = vunpack.c.h.bf16 %v4689_v41  ;;  %v4594_v28 = vunpack.c.l.bf16 %v4690_v25 }
  0x2e   : > { %5166 = vmatprep.subr.bf16.mxu0 %v5659_v60  ;;  %v5928_v22 = vpack.c.bf16 %v493_v16, %v492_v15  ;;  %v494_v31 = vld [vmem:[#allocation2 + $0xa8] sm:$0xff]  ;;  %v495_v32 = vld [vmem:[#allocation2 + $0xb0] sm:$0xff]  ;;  %v2329_v37 = vld [vmem:[#allocation2 + $0x1a] sm:$0xff]  ;;  %444 = vst [vmem:[#allocation2 + $0x169] sm:$0xff] %v4590_v45 }
  0x2f   : > { %5135 = vmatmul.mubr.bf16.gmra.mrb[4].mxu0 %v5897_v63  ;;  %v4688_v34 = vld [vmem:[%s5832_s2 + $0x68] sm:$0xff]   ;;  %v496_v35 = vld [vmem:[#allocation2 + $0xc0] sm:$0xff]  ;;  %v5949_v42 = vpack.c.bf16 %v495_v32, %v494_v31  ;;  %v5675_v43 = vld [vmem:[%s6360_s3 + $0x70] sm:$0xff]   ;;  %445 = vst [vmem:[#allocation2 + $0x171] sm:$0xff] %v4591_v46 }
  0x30   : > { %4973 = vmatpush3.bf16.msra.mxu1 %v5657_v51  ;;  %5138 = vmatprep.mubr.bf16.mxu0 %v5902_v3  ;;  %v497_v36 = vld [vmem:[#allocation2 + $0xc8] sm:$0xff]  ;;  %v4586_v38 = vunpack.c.l.bf16 %v4688_v34  ;;  %v4587_v39 = vunpack.c.h.bf16 %v4688_v34  ;;  %v498_v53 = vld [vmem:[#allocation2 + $0xd8] sm:$0xff]  ;;  %v499_v57 = vld [vmem:[#allocation2 + $0xe0] sm:$0xff]  ;;  %446 = vst [vmem:[#allocation2 + $0x181] sm:$0xff] %v4594_v28 }
  0x31   : > { %4974 = vmatprep.subr.bf16.mxu1 %v5662_v54  ;;  %5167 = vmatpush3.bf16.msra.mxu0 %v5659_v60  ;;  %v2330_v40 = vld [vmem:[#allocation2 + $0x22] sm:$0xff]  ;;  %v5957_v49 = vpack.c.bf16 %v497_v36, %v496_v35  ;;  %v2332_v55 = vld [vmem:[#allocation2 + $0x3a] sm:$0xff]  ;;  %v500_v59 = vld [vmem:[#allocation2 + $0xf0] sm:$0xff]  ;;  %v5974_v2 = vpack.c.bf16 %v499_v57, %v498_v53 }
  0x32   : > { %5168 = vmatprep.subr.bf16.mxu0 %v5660_v4  ;;  %442 = vst [vmem:[#allocation2 + $0x151] sm:$0xff] %v4586_v38  ;;  %443 = vst [vmem:[#allocation2 + $0x159] sm:$0xff] %v4587_v39  ;;  %v5959_v51 = vpack.c.bf16 %v2330_v40, %v2329_v37  ;;  %v5677_v56 = vld [vmem:[%s6360_s3 + $0x78] sm:$0xff]   ;;  %v5672_v58 = vld [vmem:[%s6360_s3 + $0x180] sm:$0xff]  }
  0x33   : > { %4943 = vmatmul.mubr.bf16.gmra.mrb[4].mxu1 %v5893_v61  ;;  %v501_v60 = vld [vmem:[#allocation2 + $0xf8] sm:$0xff]  ;;  %v2333_v62 = vld [vmem:[#allocation2 + $0x4a] sm:$0xff]  ;;  %v2335_v10 = vld [vmem:[#allocation2 + $0x62] sm:$0xff] }
  0x34   : > { %4946 = vmatprep.mubr.bf16.mxu1 %v5899_v0  ;;  %4975 = vmatpush3.bf16.msra.mxu1 %v5662_v54  ;;  %v2331_v54 = vld [vmem:[#allocation2 + $0x32] sm:$0xff]  ;;  %v5674_v8 = vld [vmem:[%s6360_s3 + $0x188] sm:$0xff]   ;;  %v2337_v13 = vld [vmem:[#allocation2 + $0x7a] sm:$0xff] }
  0x35   : > { %4976 = vmatprep.subr.bf16.mxu1 %v5667_v6  ;;  %5169 = vmatpush3.bf16.msra.mxu0 %v5660_v4  ;;  %v2334_v1 = vld [vmem:[#allocation2 + $0x52] sm:$0xff]  ;;  %v5979_v4 = vld [vmem:[%s6360_s3 + $0x80] sm:$0xff]   ;;  %v5981_v5 = vpack.c.bf16 %v2332_v55, %v2331_v54  ;;  %v502_v9 = vld [vmem:[#allocation2 + $0x108] sm:$0xff] }
  0x36   : > { %5170 = vmatprep.subr.bf16.mxu0 %v5664_v17  ;;  %v5985_v7 = vpack.c.bf16 %v2334_v1, %v2333_v62  ;;  %v2336_v11 = vld [vmem:[#allocation2 + $0x6a] sm:$0xff]  ;;  %v504_v15 = vld [vmem:[#allocation2 + $0x120] sm:$0xff]  ;;  %v506_v31 = vld [vmem:[#allocation2 + $0x138] sm:$0xff] }
  0x37   : > { %5139 = vmatmul.mubr.bf16.gmra.mrb[8].mxu0 %v5926_v21  ;;  %v503_v12 = vld [vmem:[#allocation2 + $0x110] sm:$0xff]  ;;  %v505_v16 = vld [vmem:[#allocation2 + $0x128] sm:$0xff]  ;;  %v6000_v23 = vpack.c.bf16 %v2336_v11, %v2335_v10  ;;  %v507_v34 = vld [vmem:[#allocation2 + $0x140] sm:$0xff] }
  0x38   : > { %4977 = vmatpush3.bf16.msra.mxu1 %v5667_v6  ;;  %5142 = vmatprep.mubr.bf16.mxu0 %v5932_v26  ;;  %v5983_v6 = vpack.c.bf16 %v501_v60, %v500_v59  ;;  %v5998_v20 = vpack.c.bf16 %v503_v12, %v502_v9  ;;  %v6002_v24 = vpack.c.bf16 %v505_v16, %v504_v15  ;;  %v2339_v32 = vld [vmem:[#allocation2 + $0x92] sm:$0xff]  ;;  %v2341_v36 = vld [vmem:[#allocation2 + $0xaa] sm:$0xff]  ;;  %v5680_v39 = vld [vmem:[%s6360_s3 + $0x1a0] sm:$0xff]  }
  0x39   : > { %4978 = vmatprep.subr.bf16.mxu1 %v5671_v19  ;;  %5171 = vmatpush3.bf16.msra.mxu0 %v5664_v17  ;;  %v2338_v17 = vld [vmem:[#allocation2 + $0x82] sm:$0xff]  ;;  %v508_v35 = vld [vmem:[#allocation2 + $0x150] sm:$0xff]  ;;  %v509_v37 = vld [vmem:[#allocation2 + $0x158] sm:$0xff]  ;;  %v6017_v40 = vpack.c.bf16 %v507_v34, %v506_v31 }
  0x3a   : > { %5172 = vmatprep.subr.bf16.mxu0 %v5665_v29  ;;  %v6005_v27 = vpack.c.bf16 %v2338_v17, %v2337_v13  ;;  %v2342_v38 = vld [vmem:[#allocation2 + $0xb2] sm:$0xff]  ;;  %v5682_v46 = vld [vmem:[%s6360_s3 + $0x1a8] sm:$0xff]   ;;  %v2348_v12 = vld [vmem:[#allocation2 + $0xfa] sm:$0xff] }
  0x3b   : > { %4947 = vmatmul.mubr.bf16.gmra.mrb[8].mxu1 %v5919_v18  ;;  %v6023_v45 = vpack.c.bf16 %v2342_v38, %v2341_v36  ;;  %v2344_v53 = vld [vmem:[#allocation2 + $0xca] sm:$0xff]  ;;  %v849_v54 = vld [vmem:[#allocation2 + $0x1] sm:$0xff]  ;;  %v5686_v10 = vld [vmem:[%s6360_s3 + $0x1b8] sm:$0xff]  }
  0x3c   : > { %4950 = vmatprep.mubr.bf16.mxu1 %v5928_v22  ;;  %4979 = vmatpush3.bf16.msra.mxu1 %v5671_v19  ;;  %v5676_v19 = vld [vmem:[%s6360_s3 + $0x190] sm:$0xff]   ;;  %v2346_v59 = vld [vmem:[#allocation2 + $0xe2] sm:$0xff]  ;;  %v2353_v31 = vld [vmem:[#allocation2 + $0x13a] sm:$0xff] }
  0x3d   : > { %4980 = vmatprep.subr.bf16.mxu1 %v5673_v30  ;;  %5173 = vmatpush3.bf16.msra.mxu0 %v5665_v29  ;;  %v4595_v29 = vunpack.c.h.bf16 %v4690_v25  ;;  %v850_v55 = vld [vmem:[#allocation2 + $0x9] sm:$0xff]  ;;  %v2347_v11 = vld [vmem:[#allocation2 + $0xf2] sm:$0xff]  ;;  %v6050_v16 = vld [vmem:[%s6360_s3 + $0x1c0] sm:$0xff]  }
  0x3e   : > { %5174 = vmatprep.subr.bf16.mxu0 %v5669_v33  ;;  %v511_v57 = vld [vmem:[#allocation2 + $0x170] sm:$0xff]  ;;  %v6052_v17 = vpack.c.bf16 %v2348_v12, %v2347_v11  ;;  %v5681_v25 = vld [vmem:[%s6360_s3 + $0x88] sm:$0xff]   ;;  %v2356_v34 = vld [vmem:[#allocation2 + $0x15a] sm:$0xff] }
  0x3f   : > { %5143 = vmatmul.mubr.bf16.gmra.mrb[12].mxu0 %v5955_v48  ;;  %447 = vst [vmem:[#allocation2 + $0x189] sm:$0xff] %v4595_v29  ;;  %v5684_v60 = vld [vmem:[%s6360_s3 + $0x1b0] sm:$0xff]   ;;  %v2351_v28 = vld [vmem:[#allocation2 + $0x122] sm:$0xff] }
  0x40   : > { %4981 = vmatpush3.bf16.msra.mxu1 %v5673_v30  ;;  %5178 = vmatprep.mubr.bf16.mxu0 %v5959_v51  ;;  %v5678_v30 = vld [vmem:[%s6360_s3 + $0x198] sm:$0xff]   ;;  %v2349_v13 = vld [vmem:[#allocation2 + $0x10a] sm:$0xff]  ;;  %v5723_v12 = vld [vmem:[#allocation2] sm:$0xff] }
  0x41   : > { %4982 = vmatprep.subr.bf16.mxu1 %v5675_v43  ;;  %5175 = vmatpush3.bf16.msra.mxu0 %v5669_v33  ;;  %v2340_v33 = vld [vmem:[#allocation2 + $0x9a] sm:$0xff]  ;;  %v2350_v15 = vld [vmem:[#allocation2 + $0x112] sm:$0xff]  ;;  %v2352_v29 = vld [vmem:[#allocation2 + $0x12a] sm:$0xff] }
  0x42   : > { %5176 = vmatprep.subr.bf16.mxu0 %v5670_v52  ;;  %v6019_v41 = vpack.c.bf16 %v2340_v33, %v2339_v32  ;;  %v2354_v32 = vld [vmem:[#allocation2 + $0x142] sm:$0xff]  ;;  %v6068_v33 = vpack.c.bf16 %v2352_v29, %v2351_v28  ;;  %v2358_v36 = vld [vmem:[#allocation2 + $0x172] sm:$0xff] }
  0x43   : > { %4951 = vmatmul.mubr.bf16.gmra.mrb[12].mxu1 %v5949_v42  ;;  %v5704_v11 = vld [vmem:[%s6360_s3 + $0xc8] sm:$0xff]  }
  0x44   : > { %4954 = vmatprep.mubr.bf16.mxu1 %v5957_v49  ;;  %4983 = vmatpush3.bf16.msra.mxu1 %v5675_v43  ;;  %v6021_v43 = vpack.c.bf16 %v509_v37, %v508_v35  ;;  %v2357_v35 = vld [vmem:[#allocation2 + $0x16a] sm:$0xff]  ;;  %v5688_v37 = vld [vmem:[%s6360_s3 + $0xa0] sm:$0xff]  }
  0x45   : > { %4984 = vmatprep.subr.bf16.mxu1 %v5677_v56  ;;  %5177 = vmatpush3.bf16.msra.mxu0 %v5670_v52  ;;  %v2343_v52 = vld [vmem:[#allocation2 + $0xc2] sm:$0xff] }
  0x46   : > { %5210 = vmatprep.subr.bf16.mxu0 %v5672_v58  ;;  %v6037_v1 = vpack.c.bf16 %v2344_v53, %v2343_v52  ;;  %v5696_v52 = vld [vmem:[%s6360_s3 + $0xb0] sm:$0xff]  }
  0x48   : > { %4985 = vmatpush3.bf16.msra.mxu1 %v5677_v56  ;;  %5179 = vmatmul.mubr.bf16.vlgmr.msra.gmra.mrb[0].mxu0 %v5981_v5  ;;  %v510_v56 = vld [vmem:[#allocation2 + $0x168] sm:$0xff] }
  0x49   : > { %5018 = vmatprep.subr.bf16.mxu1 %v5979_v4  ;;  %5211 = vmatpush3.bf16.msra.mxu0 %v5672_v58  ;;  %v2345_v58 = vld [vmem:[#allocation2 + $0xda] sm:$0xff]  ;;  %v6035_v62 = vpack.c.bf16 %v511_v57, %v510_v56 }
  0x4a   : > { %5182 = vmatprep.mubr.bf16.mxu0 %v5985_v7  ;;  %5212 = vmatprep.subr.bf16.mxu0 %v5674_v8  ;;  %v6039_v9 = vpack.c.bf16 %v2346_v59, %v2345_v58  ;;  %v5694_v56 = vld [vmem:[%s5832_s2 + $0x58] sm:$0xff]  ;;  %v5695_v57 = vld [vmem:[%s5832_s2 + $0x60] sm:$0xff]  ;;  %v6128_v58 = vld [vmem:[%s5832_s2 + $0x68] sm:$0xff] }
  0x4b   : > { %4955 = vmatmul.mubr.bf16.gmra.mrb[16].mxu1 %v5974_v2  ;;  %v5705_v59 = vld [vmem:[%s6360_s3 + $0x1e8] sm:$0xff]  }
  0x4c   : > { %4958 = vmatprep.mubr.bf16.mxu1 %v5983_v6 }
  0x4d   : > { %5213 = vmatpush3.bf16.msra.mxu0 %v5674_v8  ;;  %v881_v8 = vpack.c.bf16 %v850_v55, %v849_v54  ;;  %v5687_v54 = vld [vmem:[%s5832_s2 + $0x40] sm:$0xff]  ;;  %v5690_v55 = vld [vmem:[%s5832_s2 + $0x48] sm:$0xff] }
  0x4e   : > { %5214 = vmatprep.subr.bf16.mxu0 %v5676_v19 }
  0x50   : > { %5183 = vmatmul.mubr.bf16.gmra.mrb[4].mxu0 %v6000_v23 }
  0x51   : > { %5186 = vmatprep.mubr.bf16.mxu0 %v6005_v27  ;;  %5215 = vmatpush3.bf16.msra.mxu0 %v5676_v19  ;;  %v6054_v19 = vpack.c.bf16 %v2350_v15, %v2349_v13  ;;  %v2747_v13 = vpack.c.bf16 %v5723_v12, %v5723_v12  ;;  %v5726_v12 = vld [vmem:[%s6360_s3 + $0x110] sm:$0xff]  }
  0x52   : > { %5216 = vmatprep.subr.bf16.mxu0 %v5678_v30 }
  0x53   : > { %4959 = vmatmul.mubr.bf16.gmra.mrb[20].mxu1 %v5998_v20 }
  0x54   : > { %4962 = vmatprep.mubr.bf16.mxu1 %v6002_v24 }
  0x55   : > { %5217 = vmatpush3.bf16.msra.mxu0 %v5678_v30  ;;  %v5683_v30 = vld [vmem:[%s6360_s3 + $0x90] sm:$0xff]  }
  0x56   : > { %5218 = vmatprep.subr.bf16.mxu0 %v5680_v39 }
  0x58   : > { %5187 = vmatmul.mubr.bf16.gmra.mrb[8].mxu0 %v6019_v41 }
  0x59   : > { %5190 = vmatprep.mubr.bf16.mxu0 %v6023_v45  ;;  %5219 = vmatpush3.bf16.msra.mxu0 %v5680_v39  ;;  %v6084_v39 = vpack.c.bf16 %v2358_v36, %v2357_v35  ;;  %v3081_v36 = vld [vmem:[#allocation2 + $0xb1] sm:$0xff] }
  0x5a   : > { %5220 = vmatprep.subr.bf16.mxu0 %v5682_v46 }
  0x5b   : > { %4963 = vmatmul.mubr.bf16.gmra.mrb[24].mxu1 %v6017_v40 }
  0x5c   : > { %4966 = vmatprep.mubr.bf16.mxu1 %v6021_v43 }
  0x5d   : > { %5221 = vmatpush3.bf16.msra.mxu0 %v5682_v46  ;;  %v2360_v46 = vld [vmem:[#allocation2 + $0x18a] sm:$0xff] }
  0x5e   : > { %5222 = vmatprep.subr.bf16.mxu0 %v5684_v60 }
  0x60   : > { %5191 = vmatmul.mubr.bf16.gmra.mrb[12].mxu0 %v6037_v1 }
  0x61   : > { %5194 = vmatprep.mubr.bf16.mxu0 %v6039_v9  ;;  %5223 = vmatpush3.bf16.msra.mxu0 %v5684_v60  ;;  %v5707_v60 = vld [vmem:[%s6360_s3 + $0x1f0] sm:$0xff]  }
  0x62   : > { %5224 = vmatprep.subr.bf16.mxu0 %v5686_v10 }
  0x63   : > { %4967 = vmatmul.mubr.bf16.gmra.mrb[28].mxu1 %v6035_v62 }
  0x64   : > { %4986 = vmatprep.mubr.bf16.mxu1 %v881_v8  ;;  %v6140_v8 = vld [vmem:[%s5832_s2 + $0x70] sm:$0xff] }
  0x65   : > { %5225 = vmatpush3.bf16.msra.mxu0 %v5686_v10 }
  0x66   : > { %5258 = vmatprep.subr.bf16.mxu0 %v6050_v16 }
  0x68   : > { %5195 = vmatmul.mubr.bf16.gmra.mrb[16].mxu0 %v6052_v17 }
  0x69   : > { %5198 = vmatprep.mubr.bf16.mxu0 %v6054_v19 }
  0x6b   : > { %4987 = vmatmul.mubr.bf16.vlgmr.msra.gmra.mrb[0].mxu1 %v5839_v14  ;;  %v6070_v14 = vpack.c.bf16 %v2354_v32, %v2353_v31  ;;  %v3077_v31 = vld [vmem:[#allocation2 + $0x81] sm:$0xff]  ;;  %v3078_v32 = vld [vmem:[#allocation2 + $0x91] sm:$0xff] }
  0x6c   : > { %5019 = vmatpush3.bf16.msra.mxu1 %v5979_v4  ;;  %4990 = vmatprep.mubr.bf16.mxu1 %v5869_v44  ;;  %v5685_v4 = vld [vmem:[%s6360_s3 + $0x98] sm:$0xff]  }
  0x6d   : > { %5020 = vmatprep.subr.bf16.mxu1 %v5681_v25  ;;  %v2355_v44 = vld [vmem:[#allocation2 + $0x152] sm:$0xff] }
  0x6e   : > { %v6082_v38 = vpack.c.bf16 %v2356_v34, %v2355_v44  ;;  %v5715_v44 = vld [vmem:[%s6360_s3 + $0x210] sm:$0xff]  }
  0x70   : > { %5021 = vmatpush3.bf16.msra.mxu1 %v5681_v25  ;;  %5199 = vmatmul.mubr.bf16.gmra.mrb[20].mxu0 %v6068_v33  ;;  %v3075_v25 = vld [vmem:[#allocation2 + $0x69] sm:$0xff] }
  0x71   : > { %5022 = vmatprep.subr.bf16.mxu1 %v5683_v30  ;;  %5202 = vmatprep.mubr.bf16.mxu0 %v6070_v14 }
  0x73   : > { %4991 = vmatmul.mubr.bf16.gmra.mrb[4].mxu1 %v5878_v50  ;;  %v5692_v50 = vld [vmem:[%s6360_s3 + $0xa8] sm:$0xff]  }
  0x74   : > { %4994 = vmatprep.mubr.bf16.mxu1 %v5897_v63  ;;  %5023 = vmatpush3.bf16.msra.mxu1 %v5683_v30  ;;  %v2359_v63 = vld [vmem:[#allocation2 + $0x182] sm:$0xff] }
  0x75   : > { %5024 = vmatprep.subr.bf16.mxu1 %v5685_v4  ;;  %v2376_v53 = vpack.c.bf16 %v2360_v46, %v2359_v63  ;;  %v5713_v30 = vld [vmem:[%s6360_s3 + $0x208] sm:$0xff]   ;;  %v5718_v63 = vld [vmem:[%s6360_s3 + $0x220] sm:$0xff]  }
  0x78   : > { %5025 = vmatpush3.bf16.msra.mxu1 %v5685_v4  ;;  %5203 = vmatmul.mubr.bf16.gmra.mrb[24].mxu0 %v6082_v38  ;;  %v3079_v4 = vld [vmem:[#allocation2 + $0x99] sm:$0xff] }
  0x79   : > { %5026 = vmatprep.subr.bf16.mxu1 %v5688_v37  ;;  %5206 = vmatprep.mubr.bf16.mxu0 %v6084_v39  ;;  %v3106_v35 = vpack.c.bf16 %v3079_v4, %v3078_v32  ;;  %v1606_v32 = vld [vmem:[#allocation2 + $0xe0] sm:$0xff]  ;;  %v3440_v4 = vld [vmem:[#allocation2 + $0x32] sm:$0xff] }
  0x7b   : > { %4995 = vmatmul.mubr.bf16.gmra.mrb[8].mxu1 %v5902_v3  ;;  %v5700_v3 = vld [vmem:[%s6360_s3 + $0xb8] sm:$0xff]  }
  0x7c   : > { %4998 = vmatprep.mubr.bf16.mxu1 %v5926_v21  ;;  %5027 = vmatpush3.bf16.msra.mxu1 %v5688_v37  ;;  %v5702_v21 = vld [vmem:[%s6360_s3 + $0xc0] sm:$0xff]  }
  0x7d   : > { %5028 = vmatprep.subr.bf16.mxu1 %v5692_v50  ;;  %v3082_v37 = vld [vmem:[#allocation2 + $0xc1] sm:$0xff] }
  0x80   : > { %5029 = vmatpush3.bf16.msra.mxu1 %v5692_v50  ;;  %5207 = vmatmul.mubr.bf16.gmra.mrb[28].mxu0 %v2376_v53  ;;  %v3083_v50 = vld [vmem:[#allocation2 + $0xc9] sm:$0xff]  ;;  %v3085_v53 = vld [vmem:[#allocation2 + $0xe1] sm:$0xff] }
  0x81   : > { %5030 = vmatprep.subr.bf16.mxu1 %v5696_v52  ;;  %5226 = vmatprep.mubr.bf16.mxu0 %v5875_v47  ;;  %v5697_v47 = vld [vmem:[%s6360_s3 + $0x1d0] sm:$0xff]  }
  0x83   : > { %4999 = vmatmul.mubr.bf16.gmra.mrb[12].mxu1 %v5932_v26  ;;  %v5693_v26 = vld [vmem:[%s6360_s3 + $0x1c8] sm:$0xff]  }
  0x84   : > { %5002 = vmatprep.mubr.bf16.mxu1 %v5955_v48  ;;  %5031 = vmatpush3.bf16.msra.mxu1 %v5696_v52  ;;  %v5691_v48 = vld [vmem:[%s5832_s2 + $0x50] sm:$0xff]  ;;  %v3108_v52 = vpack.c.bf16 %v3083_v50, %v3082_v37  ;;  %v1608_v50 = vld [vmem:[#allocation2 + $0xf8] sm:$0xff] }
  0x85   : > { %5032 = vmatprep.subr.bf16.mxu1 %v5700_v3  ;;  %v1607_v37 = vld [vmem:[#allocation2 + $0xf0] sm:$0xff] }
  0x88   : > { %5033 = vmatpush3.bf16.msra.mxu1 %v5700_v3  ;;  %5227 = vmatmul.mubr.bf16.vlgmr.msra.gmra.mrb[0].mxu0 %v5893_v61  ;;  %v5701_v61 = vld [vmem:[%s6360_s3 + $0x1d8] sm:$0xff]  }
  0x89   : > { %5066 = vmatprep.subr.bf16.mxu1 %v5702_v21  ;;  %5259 = vmatpush3.bf16.msra.mxu0 %v6050_v16  ;;  %v3074_v16 = vld [vmem:[#allocation2 + $0x61] sm:$0xff]  ;;  %v1589_v3 = vld [vmem:[#allocation2 + $0x18] sm:$0xff] }
  0x8a   : > { %5230 = vmatprep.mubr.bf16.mxu0 %v5899_v0  ;;  %5260 = vmatprep.subr.bf16.mxu0 %v5693_v26  ;;  %v5703_v0 = vld [vmem:[%s6360_s3 + $0x1e0] sm:$0xff]   ;;  %v3104_v29 = vpack.c.bf16 %v3075_v25, %v3074_v16 }
  0x8b   : > { %5003 = vmatmul.mubr.bf16.gmra.mrb[16].mxu1 %v5687_v54  ;;  %v3086_v54 = vld [vmem:[#allocation2 + $0xf1] sm:$0xff] }
  0x8c   : > { %5006 = vmatprep.mubr.bf16.mxu1 %v5690_v55  ;;  %v3087_v55 = vld [vmem:[#allocation2 + $0xf9] sm:$0xff] }
  0x8d   : > { %5261 = vmatpush3.bf16.msra.mxu0 %v5693_v26  ;;  %v5720_v26 = vld [vmem:[%s6360_s3 + $0x230] sm:$0xff]  }
  0x8e   : > { %5262 = vmatprep.subr.bf16.mxu0 %v5697_v47 }
  0x90   : > { %5231 = vmatmul.mubr.bf16.gmra.mrb[4].mxu0 %v5919_v18  ;;  %v1219_v18 = vld [vmem:[#allocation2 + $0x2] sm:$0xff] }
  0x91   : > { %5234 = vmatprep.mubr.bf16.mxu0 %v5928_v22  ;;  %5263 = vmatpush3.bf16.msra.mxu0 %v5697_v47  ;;  %v1220_v22 = vld [vmem:[#allocation2 + $0xa] sm:$0xff] }
  0x92   : > { %5264 = vmatprep.subr.bf16.mxu0 %v5701_v61  ;;  %v1251_v10 = vpack.c.bf16 %v1220_v22, %v1219_v18  ;;  %v1594_v18 = vld [vmem:[#allocation2 + $0x50] sm:$0xff]  ;;  %v3090_v22 = vld [vmem:[#allocation2 + $0x121] sm:$0xff] }
  0x93   : > { %5007 = vmatmul.mubr.bf16.gmra.mrb[20].mxu1 %v5691_v48 }
  0x94   : > { %5010 = vmatprep.mubr.bf16.mxu1 %v5694_v56  ;;  %v1591_v56 = vld [vmem:[#allocation2 + $0x30] sm:$0xff] }
  0x95   : > { %5265 = vmatpush3.bf16.msra.mxu0 %v5701_v61  ;;  %v1592_v61 = vld [vmem:[#allocation2 + $0x38] sm:$0xff] }
  0x96   : > { %5266 = vmatprep.subr.bf16.mxu0 %v5703_v0 }
  0x98   : > { %5235 = vmatmul.mubr.bf16.gmra.mrb[8].mxu0 %v5949_v42  ;;  %v5709_v42 = vld [vmem:[%s6360_s3 + $0x1f8] sm:$0xff]  }
  0x99   : > { %5238 = vmatprep.mubr.bf16.mxu0 %v5957_v49  ;;  %5267 = vmatpush3.bf16.msra.mxu0 %v5703_v0  ;;  %v5711_v49 = vld [vmem:[%s6360_s3 + $0x200] sm:$0xff]   ;;  %v3088_v0 = vld [vmem:[#allocation2 + $0x109] sm:$0xff] }
  0x9a   : > { %5268 = vmatprep.subr.bf16.mxu0 %v5705_v59 }
  0x9b   : > { %5011 = vmatmul.mubr.bf16.gmra.mrb[24].mxu1 %v5695_v57  ;;  %v3089_v57 = vld [vmem:[#allocation2 + $0x111] sm:$0xff] }
  0x9c   : > { %5014 = vmatprep.mubr.bf16.mxu1 %v6128_v58 }
  0x9d   : > { %5269 = vmatpush3.bf16.msra.mxu0 %v5705_v59  ;;  %v1593_v59 = vld [vmem:[#allocation2 + $0x48] sm:$0xff] }
  0x9e   : > { %5270 = vmatprep.subr.bf16.mxu0 %v5707_v60 }
  0xa0   : > { %5239 = vmatmul.mubr.bf16.gmra.mrb[12].mxu0 %v5974_v2  ;;  %v5706_v2 = vld [vmem:[%s6360_s3 + $0xd0] sm:$0xff]  }
  0xa1   : > { %5242 = vmatprep.mubr.bf16.mxu0 %v5983_v6  ;;  %5271 = vmatpush3.bf16.msra.mxu0 %v5707_v60  ;;  %v5708_v6 = vld [vmem:[%s6360_s3 + $0xd8] sm:$0xff]   ;;  %v3091_v60 = vld [vmem:[#allocation2 + $0x129] sm:$0xff] }
  0xa2   : > { %5272 = vmatprep.subr.bf16.mxu0 %v5709_v42 }
  0xa3   : > { %5015 = vmatmul.mubr.bf16.gmra.mrb[28].mxu1 %v6140_v8 }
  0xa4   : > { %5034 = vmatprep.mubr.bf16.mxu1 %v1251_v10  ;;  %v1622_v10 = vpack.c.bf16 %v1592_v61, %v1591_v56  ;;  %v3446_v56 = vld [vmem:[#allocation2 + $0x7a] sm:$0xff]  ;;  %v3447_v61 = vld [vmem:[#allocation2 + $0x82] sm:$0xff] }
  0xa5   : > { %5273 = vmatpush3.bf16.msra.mxu0 %v5709_v42  ;;  %v6228_v42 = vpack.c.bf16 %v3089_v57, %v3088_v0  ;;  %v1613_v0 = vld [vmem:[#allocation2 + $0x138] sm:$0xff]  ;;  %v1614_v57 = vld [vmem:[#allocation2 + $0x140] sm:$0xff] }
  0xa6   : > { %5306 = vmatprep.subr.bf16.mxu0 %v5711_v49 }
  0xa8   : > { %5243 = vmatmul.mubr.bf16.gmra.mrb[16].mxu0 %v5998_v20  ;;  %v5710_v20 = vld [vmem:[%s6360_s3 + $0xe0] sm:$0xff]  }
  0xa9   : > { %5246 = vmatprep.mubr.bf16.mxu0 %v6002_v24 }
  0xab   : > { %5035 = vmatmul.mubr.bf16.vlgmr.msra.gmra.mrb[0].mxu1 %v5959_v51  ;;  %v2728_v51 = vld [vmem:[#allocation2 + $0x180] sm:$0xff] }
  0xac   : > { %5067 = vmatpush3.bf16.msra.mxu1 %v5702_v21  ;;  %5038 = vmatprep.mubr.bf16.mxu1 %v5981_v5  ;;  %v2729_v5 = vld [vmem:[#allocation2 + $0x188] sm:$0xff]  ;;  %v1590_v21 = vld [vmem:[#allocation2 + $0x20] sm:$0xff] }
  0xad   : > { %5068 = vmatprep.subr.bf16.mxu1 %v5704_v11  ;;  %v6171_v24 = vpack.c.bf16 %v2729_v5, %v2728_v51  ;;  %v1621_v48 = vpack.c.bf16 %v1590_v21, %v1589_v3  ;;  %v3093_v51 = vld [vmem:[#allocation2 + $0x141] sm:$0xff]  ;;  %v1597_v5 = vld [vmem:[#allocation2 + $0x78] sm:$0xff]  ;;  %v1630_v21 = vpack.c.bf16 %v1608_v50, %v1607_v37  ;;  %v3469_v37 = vld [vmem:[#allocation2 + $0x18a] sm:$0xff] }
  0xae   : > { %v5731_v3 = vld [vmem:[%s6360_s3 + $0x138] sm:$0xff]  }
  0xb0   : > { %5069 = vmatpush3.bf16.msra.mxu1 %v5704_v11  ;;  %5247 = vmatmul.mubr.bf16.gmra.mrb[20].mxu0 %v6017_v40  ;;  %v3071_v40 = vld [vmem:[#allocation2 + $0x39] sm:$0xff] }
  0xb1   : > { %5070 = vmatprep.subr.bf16.mxu1 %v5706_v2  ;;  %5250 = vmatprep.mubr.bf16.mxu0 %v6021_v43  ;;  %v5714_v43 = vld [vmem:[%s6360_s3 + $0xf0] sm:$0xff]   ;;  %v1595_v11 = vld [vmem:[#allocation2 + $0x60] sm:$0xff] }
  0xb3   : > { %5039 = vmatmul.mubr.bf16.gmra.mrb[4].mxu1 %v5985_v7  ;;  %v5712_v7 = vld [vmem:[%s6360_s3 + $0xe8] sm:$0xff]  }
  0xb4   : > { %5042 = vmatprep.mubr.bf16.mxu1 %v6000_v23  ;;  %5071 = vmatpush3.bf16.msra.mxu1 %v5706_v2  ;;  %v3070_v23 = vld [vmem:[#allocation2 + $0x31] sm:$0xff]  ;;  %v1596_v2 = vld [vmem:[#allocation2 + $0x68] sm:$0xff] }
  0xb5   : > { %5072 = vmatprep.subr.bf16.mxu1 %v5708_v6  ;;  %v3102_v15 = vpack.c.bf16 %v3071_v40, %v3070_v23  ;;  %v1624_v23 = vpack.c.bf16 %v1596_v2, %v1595_v11  ;;  %v1615_v11 = vld [vmem:[#allocation2 + $0x150] sm:$0xff]  ;;  %v1616_v2 = vld [vmem:[#allocation2 + $0x158] sm:$0xff] }
  0xb8   : > { %5073 = vmatpush3.bf16.msra.mxu1 %v5708_v6  ;;  %5251 = vmatmul.mubr.bf16.gmra.mrb[24].mxu0 %v6035_v62  ;;  %v3073_v62 = vld [vmem:[#allocation2 + $0x51] sm:$0xff]  ;;  %v3092_v6 = vld [vmem:[#allocation2 + $0x139] sm:$0xff] }
  0xb9   : > { %5074 = vmatprep.subr.bf16.mxu1 %v5710_v20  ;;  %5254 = vmatprep.mubr.bf16.mxu0 %v6171_v24  ;;  %v6238_v40 = vpack.c.bf16 %v3093_v51, %v3092_v6  ;;  %v3450_v6 = vld [vmem:[#allocation2 + $0xaa] sm:$0xff]  ;;  %v3451_v51 = vld [vmem:[#allocation2 + $0xb2] sm:$0xff] }
  0xbb   : > { %5043 = vmatmul.mubr.bf16.gmra.mrb[8].mxu1 %v6005_v27  ;;  %v5716_v27 = vld [vmem:[%s6360_s3 + $0xf8] sm:$0xff]  }
  0xbc   : > { %5046 = vmatprep.mubr.bf16.mxu1 %v6019_v41  ;;  %5075 = vmatpush3.bf16.msra.mxu1 %v5710_v20  ;;  %v3072_v41 = vld [vmem:[#allocation2 + $0x49] sm:$0xff]  ;;  %v1598_v20 = vld [vmem:[#allocation2 + $0x80] sm:$0xff] }
  0xbd   : > { %5076 = vmatprep.subr.bf16.mxu1 %v5712_v7  ;;  %v3103_v28 = vpack.c.bf16 %v3073_v62, %v3072_v41  ;;  %v1602_v41 = vld [vmem:[#allocation2 + $0xb0] sm:$0xff]  ;;  %v5727_v62 = vld [vmem:[%s6360_s3 + $0x118] sm:$0xff]  }
  0xc0   : > { %5077 = vmatpush3.bf16.msra.mxu1 %v5712_v7  ;;  %5255 = vmatmul.mubr.bf16.gmra.mrb[28].mxu0 %v2747_v13  ;;  %v5725_v7 = vld [vmem:[%s6360_s3 + $0x108] sm:$0xff]   ;;  %v1599_v13 = vld [vmem:[#allocation2 + $0x90] sm:$0xff] }
  0xc1   : > { %5078 = vmatprep.subr.bf16.mxu1 %v5714_v43  ;;  %5274 = vmatprep.mubr.bf16.mxu0 %v3102_v15  ;;  %v1600_v15 = vld [vmem:[#allocation2 + $0x98] sm:$0xff] }
  0xc2   : > { %v1626_v16 = vpack.c.bf16 %v1600_v15, %v1599_v13 }
  0xc3   : > { %5047 = vmatmul.mubr.bf16.gmra.mrb[12].mxu1 %v6023_v45  ;;  %v6194_v45 = vld [vmem:[%s6360_s3 + $0x100] sm:$0xff]  }
  0xc4   : > { %5050 = vmatprep.mubr.bf16.mxu1 %v6037_v1  ;;  %5079 = vmatpush3.bf16.msra.mxu1 %v5714_v43  ;;  %v3076_v1 = vld [vmem:[#allocation2 + $0x79] sm:$0xff]  ;;  %v1625_v43 = vpack.c.bf16 %v1598_v20, %v1597_v5  ;;  %v1617_v5 = vld [vmem:[#allocation2 + $0x168] sm:$0xff]  ;;  %v1618_v20 = vld [vmem:[#allocation2 + $0x170] sm:$0xff] }
  0xc5   : > { %5080 = vmatprep.subr.bf16.mxu1 %v5716_v27  ;;  %v3105_v34 = vpack.c.bf16 %v3077_v31, %v3076_v1  ;;  %v3101_v1 = vld [vmem:[#allocation2 + $0x1a1] sm:$0xff]  ;;  %v1605_v31 = vld [vmem:[#allocation2 + $0xd8] sm:$0xff]  ;;  %v1635_v13 = vpack.c.bf16 %v1618_v20, %v1617_v5 }
  0xc8   : > { %5081 = vmatpush3.bf16.msra.mxu1 %v5716_v27  ;;  %5275 = vmatmul.mubr.bf16.vlgmr.msra.gmra.mrb[0].mxu0 %v3103_v28  ;;  %v1601_v27 = vld [vmem:[#allocation2 + $0xa8] sm:$0xff]  ;;  %v5721_v28 = vld [vmem:[%s5832_s2 + $0x78] sm:$0xff] }
  0xc9   : > { %5354 = vmatprep.subr.bf16.mxu1 %v6194_v45  ;;  %5307 = vmatpush3.bf16.msra.mxu0 %v5711_v49  ;;  %v1623_v49 = vpack.c.bf16 %v1594_v18, %v1593_v59  ;;  %v1627_v25 = vpack.c.bf16 %v1602_v41, %v1601_v27  ;;  %v3448_v59 = vld [vmem:[#allocation2 + $0x92] sm:$0xff]  ;;  %v3449_v18 = vld [vmem:[#allocation2 + $0x9a] sm:$0xff]  ;;  %v3455_v41 = vld [vmem:[#allocation2 + $0xe2] sm:$0xff] }
  0xca   : > { %5278 = vmatprep.mubr.bf16.mxu0 %v3104_v29  ;;  %5308 = vmatprep.subr.bf16.mxu0 %v5713_v30  ;;  %v5728_v29 = vld [vmem:[%s6360_s3 + $0x120] sm:$0xff]  }
  0xcb   : > { %5051 = vmatmul.mubr.bf16.gmra.mrb[16].mxu1 %v6039_v9  ;;  %v5717_v9 = vld [vmem:[%s6360_s3 + $0x218] sm:$0xff]  }
  0xcc   : > { %5054 = vmatprep.mubr.bf16.mxu1 %v6052_v17  ;;  %v3080_v17 = vld [vmem:[#allocation2 + $0xa9] sm:$0xff]  ;;  %v3454_v27 = vld [vmem:[#allocation2 + $0xda] sm:$0xff] }
  0xcd   : > { %5309 = vmatpush3.bf16.msra.mxu0 %v5713_v30  ;;  %v3107_v46 = vpack.c.bf16 %v3081_v36, %v3080_v17  ;;  %v1604_v30 = vld [vmem:[#allocation2 + $0xc8] sm:$0xff]  ;;  %v1629_v17 = vpack.c.bf16 %v1606_v32, %v1605_v31  ;;  %v5730_v36 = vld [vmem:[%s6360_s3 + $0x130] sm:$0xff]   ;;  %v3462_v32 = vld [vmem:[#allocation2 + $0x13a] sm:$0xff] }
  0xce   : > { %5310 = vmatprep.subr.bf16.mxu0 %v5715_v44 }
  0xd0   : > { %5279 = vmatmul.mubr.bf16.gmra.mrb[4].mxu0 %v3105_v34  ;;  %v5729_v34 = vld [vmem:[%s6360_s3 + $0x128] sm:$0xff]  }
  0xd1   : > { %5282 = vmatprep.mubr.bf16.mxu0 %v3106_v35  ;;  %5311 = vmatpush3.bf16.msra.mxu0 %v5715_v44  ;;  %v3441_v44 = vld [vmem:[#allocation2 + $0x3a] sm:$0xff] }
  0xd2   : > { %5312 = vmatprep.subr.bf16.mxu0 %v5717_v9 }
  0xd3   : > { %5055 = vmatmul.mubr.bf16.gmra.mrb[20].mxu1 %v6054_v19  ;;  %v5719_v19 = vld [vmem:[%s6360_s3 + $0x228] sm:$0xff]  }
  0xd4   : > { %5058 = vmatprep.mubr.bf16.mxu1 %v6068_v33  ;;  %v3084_v33 = vld [vmem:[#allocation2 + $0xd9] sm:$0xff] }
  0xd5   : > { %5313 = vmatpush3.bf16.msra.mxu0 %v5717_v9  ;;  %v6218_v47 = vpack.c.bf16 %v3085_v53, %v3084_v33  ;;  %v3444_v33 = vld [vmem:[#allocation2 + $0x62] sm:$0xff]  ;;  %v3445_v53 = vld [vmem:[#allocation2 + $0x6a] sm:$0xff] }
  0xd6   : > { %5314 = vmatprep.subr.bf16.mxu0 %v5718_v63 }
  0xd8   : > { %5283 = vmatmul.mubr.bf16.gmra.mrb[8].mxu0 %v3107_v46  ;;  %v3443_v46 = vld [vmem:[#allocation2 + $0x52] sm:$0xff] }
  0xd9   : > { %5286 = vmatprep.mubr.bf16.mxu0 %v3108_v52  ;;  %5315 = vmatpush3.bf16.msra.mxu0 %v5718_v63  ;;  %v3442_v63 = vld [vmem:[#allocation2 + $0x4a] sm:$0xff] }
  0xda   : > { %5316 = vmatprep.subr.bf16.mxu0 %v5719_v19  ;;  %v1609_v52 = vld [vmem:[#allocation2 + $0x108] sm:$0xff] }
  0xdb   : > { %5059 = vmatmul.mubr.bf16.gmra.mrb[24].mxu1 %v6070_v14  ;;  %v6220_v14 = vpack.c.bf16 %v3087_v55, %v3086_v54  ;;  %v3473_v54 = vpack.c.bf16 %v3443_v46, %v3442_v63 }
  0xdc   : > { %5062 = vmatprep.mubr.bf16.mxu1 %v6082_v38  ;;  %v5722_v38 = vld [vmem:[%s6360_s3 + $0x238] sm:$0xff]  }
  0xdd   : > { %5317 = vmatpush3.bf16.msra.mxu0 %v5719_v19  ;;  %v1610_v19 = vld [vmem:[#allocation2 + $0x110] sm:$0xff] }
  0xde   : > { %5318 = vmatprep.subr.bf16.mxu0 %v5720_v26  ;;  %v1631_v55 = vpack.c.bf16 %v1610_v19, %v1609_v52  ;;  %v1990_v19 = vld [vmem:[#allocation2 + $0x189] sm:$0xff] }
  0xe0   : > { %5287 = vmatmul.mubr.bf16.gmra.mrb[12].mxu0 %v6218_v47 }
  0xe1   : > { %5290 = vmatprep.mubr.bf16.mxu0 %v6220_v14  ;;  %5319 = vmatpush3.bf16.msra.mxu0 %v5720_v26  ;;  %v3474_v26 = vpack.c.bf16 %v3445_v53, %v3444_v33  ;;  %v3471_v33 = vld [vmem:[#allocation2 + $0x1a2] sm:$0xff] }
  0xe2   : > { %5320 = vmatprep.subr.bf16.mxu0 %v5722_v38 }
  0xe3   : > { %5063 = vmatmul.mubr.bf16.gmra.mrb[28].mxu1 %v6084_v39  ;;  %v6230_v39 = vpack.c.bf16 %v3091_v60, %v3090_v22  ;;  %v3475_v60 = vpack.c.bf16 %v3447_v61, %v3446_v56 }
  0xe4   : > { %5082 = vmatprep.mubr.bf16.mxu1 %v1621_v48  ;;  %v1611_v48 = vld [vmem:[#allocation2 + $0x120] sm:$0xff] }
  0xe5   : > { %5321 = vmatpush3.bf16.msra.mxu0 %v5722_v38  ;;  %v1612_v38 = vld [vmem:[#allocation2 + $0x128] sm:$0xff] }
  0xe6   : > { %v1632_v22 = vpack.c.bf16 %v1612_v38, %v1611_v48 }
  0xe8   : > { %5291 = vmatmul.mubr.bf16.gmra.mrb[16].mxu0 %v6228_v42 }
  0xe9   : > { %5294 = vmatprep.mubr.bf16.mxu0 %v6230_v39 }
  0xeb   : > { %5083 = vmatmul.mubr.bf16.vlgmr.msra.gmra.mrb[0].mxu1 %v1622_v10  ;;  %v1633_v10 = vpack.c.bf16 %v1614_v57, %v1613_v0 }
  0xec   : > { %5362 = vmatpush3.bf16.msra.mxu1 %v6194_v45  ;;  %5086 = vmatprep.mubr.bf16.mxu1 %v1623_v49  ;;  %v3100_v45 = vld [vmem:[#allocation2 + $0x199] sm:$0xff]  ;;  %v3476_v49 = vpack.c.bf16 %v3449_v18, %v3448_v59 }
  0xed   : > { %5355 = vmatprep.subr.bf16.mxu1 %v5725_v7  ;;  %v3117_v9 = vpack.c.bf16 %v3101_v1, %v3100_v45  ;;  %v3461_v45 = vld [vmem:[#allocation2 + $0x12a] sm:$0xff] }
  0xf0   : > { %5363 = vmatpush3.bf16.msra.mxu1 %v5725_v7  ;;  %5295 = vmatmul.mubr.bf16.gmra.mrb[20].mxu0 %v6238_v40  ;;  %v3452_v7 = vld [vmem:[#allocation2 + $0xc2] sm:$0xff] }
  0xf1   : > { %5356 = vmatprep.subr.bf16.mxu1 %v5726_v12  ;;  %5298 = vmatprep.mubr.bf16.mxu0 %v6128_v58  ;;  %v1603_v58 = vld [vmem:[#allocation2 + $0xc0] sm:$0xff] }
  0xf2   : > { %v1628_v35 = vpack.c.bf16 %v1604_v30, %v1603_v58  ;;  %v3459_v58 = vld [vmem:[#allocation2 + $0x112] sm:$0xff]  ;;  %v3460_v30 = vld [vmem:[#allocation2 + $0x122] sm:$0xff] }
  0xf3   : > { %5087 = vmatmul.mubr.bf16.gmra.mrb[4].mxu1 %v1624_v23  ;;  %v3453_v23 = vld [vmem:[#allocation2 + $0xca] sm:$0xff]  ;;  %v3482_v31 = vpack.c.bf16 %v3461_v45, %v3460_v30 }
  0xf4   : > { %5090 = vmatprep.mubr.bf16.mxu1 %v1625_v43  ;;  %5364 = vmatpush3.bf16.msra.mxu1 %v5726_v12  ;;  %v1634_v43 = vpack.c.bf16 %v1616_v2, %v1615_v11  ;;  %v3477_v12 = vpack.c.bf16 %v3451_v51, %v3450_v6  ;;  %v3478_v15 = vpack.c.bf16 %v3453_v23, %v3452_v7  ;;  %v6283_v6 = vld [vmem:[%s6361_s4] ss:$0 sm:$0xff] }
  0xf5   : > { %5357 = vmatprep.subr.bf16.mxu1 %v5727_v62 }
  0xf8   : > { %5365 = vmatpush3.bf16.msra.mxu1 %v5727_v62  ;;  %5299 = vmatmul.mubr.bf16.gmra.mrb[24].mxu0 %v6140_v8  ;;  %v3472_v8 = vpack.c.bf16 %v3441_v44, %v3440_v4  ;;  %v3456_v62 = vld [vmem:[#allocation2 + $0xf2] sm:$0xff]  ;;  %v3463_v4 = vld [vmem:[#allocation2 + $0x142] sm:$0xff] }
  0xf9   : > { %5358 = vmatprep.subr.bf16.mxu1 %v5728_v29  ;;  %5302 = vmatprep.mubr.bf16.mxu0 %v5721_v28  ;;  %v3464_v44 = vld [vmem:[#allocation2 + $0x152] sm:$0xff] }
  0xfb   : > { %5091 = vmatmul.mubr.bf16.gmra.mrb[8].mxu1 %v1626_v16  ;;  %v3457_v16 = vld [vmem:[#allocation2 + $0xfa] sm:$0xff] }
  0xfc   : > { %5094 = vmatprep.mubr.bf16.mxu1 %v1627_v25  ;;  %5366 = vmatpush3.bf16.msra.mxu1 %v5728_v29  ;;  %v3479_v25 = vpack.c.bf16 %v3455_v41, %v3454_v27  ;;  %v3480_v28 = vpack.c.bf16 %v3457_v16, %v3456_v62  ;;  %v3458_v29 = vld [vmem:[#allocation2 + $0x10a] sm:$0xff] }
  0xfd   : > { %5359 = vmatprep.subr.bf16.mxu1 %v5729_v34  ;;  %v3481_v1 = vpack.c.bf16 %v3459_v58, %v3458_v29 }
 0x100   : > { %5367 = vmatpush3.bf16.msra.mxu1 %v5729_v34  ;;  %5303 = vmatmul.mubr.bf16.gmra.mrb[28].mxu0 %v3117_v9  ;;  %v3483_v34 = vpack.c.bf16 %v3463_v4, %v3462_v32  ;;  %v1986_v9 = vld [vmem:[#allocation2 + $0x159] sm:$0xff] }
 0x101   : > { %5360 = vmatprep.subr.bf16.mxu1 %v5730_v36  ;;  %5322 = vmatprep.mubr.bf16.mxu0 %v3472_v8  ;;  %v1987_v8 = vld [vmem:[#allocation2 + $0x169] sm:$0xff] }
 0x103   : > { %5095 = vmatmul.mubr.bf16.gmra.mrb[12].mxu1 %v1628_v35 }
 0x104   : > { %5098 = vmatprep.mubr.bf16.mxu1 %v1629_v17  ;;  %5368 = vmatpush3.bf16.msra.mxu1 %v5730_v36  ;;  %v3466_v17 = vld [vmem:[#allocation2 + $0x16a] sm:$0xff] }
 0x105   : > { %5361 = vmatprep.subr.bf16.mxu1 %v5731_v3  ;;  %v1988_v36 = vld [vmem:[#allocation2 + $0x171] sm:$0xff] }
 0x106   : > { %v2005_v46 = vpack.c.bf16 %v1988_v36, %v1987_v8 }
 0x108   : > { %5369 = vmatpush3.bf16.msra.mxu1 %v5731_v3  ;;  %5323 = vmatmul.mubr.bf16.vlgmr.msra.gmra.mrb[0].mxu0 %v3473_v54 }
 0x109   : > { %5326 = vmatprep.mubr.bf16.mxu0 %v3474_v26 }
 0x10b   : > { %5099 = vmatmul.mubr.bf16.gmra.mrb[16].mxu1 %v1630_v21 }
 0x10c   : > { %5102 = vmatprep.mubr.bf16.mxu1 %v1631_v55 }
 0x110   : > { %5327 = vmatmul.mubr.bf16.gmra.mrb[4].mxu0 %v3475_v60 }
 0x111   : > { %5330 = vmatprep.mubr.bf16.mxu0 %v3476_v49 }
 0x113   : > { %5103 = vmatmul.mubr.bf16.gmra.mrb[20].mxu1 %v1632_v22 }
 0x114   : > { %5106 = vmatprep.mubr.bf16.mxu1 %v1633_v10 }
 0x118   : > { %5331 = vmatmul.mubr.bf16.gmra.mrb[8].mxu0 %v3477_v12 }
 0x119   : > { %5334 = vmatprep.mubr.bf16.mxu0 %v3478_v15 }
 0x11b   : > { %5107 = vmatmul.mubr.bf16.gmra.mrb[24].mxu1 %v1634_v43 }
 0x11c   : > { %5110 = vmatprep.mubr.bf16.mxu1 %v1635_v13 }
 0x120   : > { %5335 = vmatmul.mubr.bf16.gmra.mrb[12].mxu0 %v3479_v25 }
 0x121   : > { %5338 = vmatprep.mubr.bf16.mxu0 %v3480_v28 }
 0x123   : > { %5111 = vmatmul.mubr.bf16.gmra.mrb[28].mxu1 %v6171_v24  ;;  %v3465_v24 = vld [vmem:[#allocation2 + $0x15a] sm:$0xff] }
 0x124   : > { %5146 = vmatprep.mubr.bf16.mxu1 %v6218_v47  ;;  %v3484_v35 = vpack.c.bf16 %v3465_v24, %v3464_v44  ;;  %v1985_v47 = vld [vmem:[#allocation2 + $0x151] sm:$0xff] }
 0x125   : > { %v2004_v50 = vpack.c.bf16 %v1986_v9, %v1985_v47 }
 0x128   : > { %5339 = vmatmul.mubr.bf16.gmra.mrb[16].mxu0 %v3481_v1 }
 0x129   : > { %5342 = vmatprep.mubr.bf16.mxu0 %v3482_v31 }
 0x12b   : > { %5147 = vmatmul.mubr.bf16.vlgmr.msra.gmra.mrb[16].mxu1 %v6220_v14  ;;  %v3467_v14 = vld [vmem:[#allocation2 + $0x172] sm:$0xff] }
 0x12c   : > { %5150 = vmatprep.mubr.bf16.mxu1 %v6228_v42  ;;  %v3468_v42 = vld [vmem:[#allocation2 + $0x182] sm:$0xff]  ;;  %v3485_v63 = vpack.c.bf16 %v3467_v14, %v3466_v17 }
 0x12d   : > { %v3486_v52 = vpack.c.bf16 %v3469_v37, %v3468_v42 }
 0x130   : > { %5343 = vmatmul.mubr.bf16.gmra.mrb[20].mxu0 %v3483_v34 }
 0x131   : > { %5346 = vmatprep.mubr.bf16.mxu0 %v3484_v35 }
 0x133   : > { %5151 = vmatmul.mubr.bf16.gmra.mrb[20].mxu1 %v6230_v39  ;;  %v1989_v39 = vld [vmem:[#allocation2 + $0x181] sm:$0xff] }
 0x134   : > { %5154 = vmatprep.mubr.bf16.mxu1 %v6238_v40  ;;  %v3470_v40 = vld [vmem:[#allocation2 + $0x19a] sm:$0xff]  ;;  %v2006_v53 = vpack.c.bf16 %v1990_v19, %v1989_v39 }
 0x135   : > { %v3487_v3 = vpack.c.bf16 %v3471_v33, %v3470_v40 }
 0x138   : > { %5347 = vmatmul.mubr.bf16.gmra.mrb[24].mxu0 %v3485_v63 }
 0x139   : > { %5350 = vmatprep.mubr.bf16.mxu0 %v3486_v52 }
 0x13b   : > { %5155 = vmatmul.mubr.bf16.gmra.mrb[24].mxu1 %v2004_v50 }
 0x13c   : > { %5158 = vmatprep.mubr.bf16.mxu1 %v2005_v46 }
 0x140   : > { %5351 = vmatmul.mubr.bf16.gmra.mrb[28].mxu0 %v3487_v3 }
 0x143   : > { %5159 = vmatmul.mubr.bf16.gmra.mrb[28].mxu1 %v2006_v53 }
 0x1be   : > { %v5084_v21 = vpop.f32.mrb[0].mxu1 }
 0x1bf   : > { %v1768_v54 = vpop.f32.mrb[1].mxu1 }
 0x1c0   : > { %v5085_v55 = vpop.f32.mrb[2].mxu1 }
 0x1c1   : > { %v1771_v26 = vpop.f32.mrb[3].mxu1 }
 0x1c6   : > { %v5088_v48 = vpop.f32.mrb[4].mxu1 }
 0x1c7   : > { %v1784_v38 = vpop.f32.mrb[5].mxu1 }
 0x1c8   : > { %v5089_v56 = vpop.f32.mrb[6].mxu1 }
 0x1c9   : > { %v1787_v61 = vpop.f32.mrb[7].mxu1 }
 0x1ce   : > { %v5092_v0 = vpop.f32.mrb[8].mxu1 }
 0x1cf   : > { %v1800_v57 = vpop.f32.mrb[9].mxu1 }
 0x1d0   : > { %v6268_v59 = vpop.f32.mrb[10].mxu1 }
 0x1d1   : > { %v6270_v18 = vpop.f32.mrb[11].mxu1 }
 0x1d6   : > { %v6272_v22 = vpop.f32.mrb[12].mxu1 }
 0x1d7   : > { %v6274_v60 = vpop.f32.mrb[13].mxu1 }
 0x1d8   : > { %v6276_v10 = vpop.f32.mrb[14].mxu1 }
 0x1d9   : > { %v6278_v49 = vpop.f32.mrb[15].mxu1 }
 0x1db   : > { %v5324_v11 = vpop.f32.mrb[0].mxu0 }
 0x1dc   : > { %v5370_v2 = vadd.f32 %v5324_v11, %v5084_v21  ;;  %v3619_v51 = vpop.f32.mrb[1].mxu0 }
 0x1dd   : > { %v5371_v5 = vadd.f32 %v3619_v51, %v1768_v54  ;;  %v5325_v20 = vpop.f32.mrb[2].mxu0 }
 0x1de   : > { %v5372_v7 = vadd.f32 %v5325_v20, %v5085_v55  ;;  %v3622_v23 = vpop.f32.mrb[3].mxu0  ;;  %v3851_v13 = vadd.f32 %v5370_v2, %v6283_v6 }
 0x1df   : > { %v3849_v43 = vadd.f32 %v5371_v5, %v6283_v6  ;;  %v5373_v12 = vadd.f32 %v3622_v23, %v1771_v26 }
 0x1e0   : > { %v3852_v15 = vadd.f32 %v5372_v7, %v6283_v6  ;;  %v4081_v45 = vmul.f32 %v3851_v13, %v3851_v13 }
 0x1e1   : > { %v3850_v27 = vadd.f32 %v5373_v12, %v6283_v6  ;;  %v4079_v62 = vmul.f32 %v3849_v43, %v3849_v43 }
 0x1e2   : > { %v4604_v41 = vpack.c.bf16 %v3852_v15, %v3851_v13  ;;  %v4082_v44 = vmul.f32 %v3852_v15, %v3852_v15 }
 0x1e3   : > { %v4599_v16 = vpack.c.bf16 %v3850_v27, %v3849_v43  ;;  %v4041_v25 = vadd.f32 %v3850_v27, %v3849_v43  ;;  %v4080_v28 = vmul.f32 %v3850_v27, %v3850_v27  ;;  %v5328_v29 = vpop.f32.mrb[4].mxu0 }
 0x1e4   : > { %4691 = vst [vmem:[%s6293_s20 + $0x8] sm:$0xff] %v4604_v41   ;;  %v5374_v58 = vadd.f32 %v5328_v29, %v5088_v48  ;;  %v3635_v30 = vpop.f32.mrb[5].mxu0 }
 0x1e5   : > { %4600 = vst [vmem:[%s6293_s20] sm:$0xff] %v4599_v16   ;;  %v4042_v1 = vadd.f32 %v4041_v25, %v3851_v13  ;;  %v4111_v31 = vadd.f32 %v4080_v28, %v4079_v62  ;;  %v5375_v32 = vadd.f32 %v3635_v30, %v1784_v38  ;;  %v5329_v4 = vpop.f32.mrb[6].mxu0 }
 0x1e6   : > { %v5376_v24 = vadd.f32 %v5329_v4, %v5089_v56  ;;  %v3638_v34 = vpop.f32.mrb[7].mxu0  ;;  %v3855_v14 = vadd.f32 %v5374_v58, %v6283_v6 }
 0x1e7   : > { %v4112_v35 = vadd.f32 %v4111_v31, %v4081_v45  ;;  %v3853_v47 = vadd.f32 %v5375_v32, %v6283_v6  ;;  %v4043_v9 = vadd.f32 %v4042_v1, %v3852_v15  ;;  %v5377_v17 = vadd.f32 %v3638_v34, %v1787_v61 }
 0x1e8   : > { %v3856_v8 = vadd.f32 %v5376_v24, %v6283_v6  ;;  %v4085_v3 = vmul.f32 %v3855_v14, %v3855_v14 }
 0x1e9   : > { %v4044_v36 = vadd.f32 %v4043_v9, %v3853_v47  ;;  %v4083_v42 = vmul.f32 %v3853_v47, %v3853_v47  ;;  %v4113_v37 = vadd.f32 %v4112_v35, %v4082_v44  ;;  %v3854_v50 = vadd.f32 %v5377_v17, %v6283_v6 }
 0x1ea   : > { %v4614_v63 = vpack.c.bf16 %v3856_v8, %v3855_v14  ;;  %v4086_v48 = vmul.f32 %v3856_v8, %v3856_v8 }
 0x1eb   : > { %v4114_v46 = vadd.f32 %v4113_v37, %v4083_v42  ;;  %v4609_v52 = vpack.c.bf16 %v3854_v50, %v3853_v47  ;;  %v4045_v39 = vadd.f32 %v4044_v36, %v3854_v50  ;;  %v4084_v19 = vmul.f32 %v3854_v50, %v3854_v50  ;;  %v5332_v40 = vpop.f32.mrb[8].mxu0 }
 0x1ec   : > { %4693 = vst [vmem:[%s6293_s20 + $0x18] sm:$0xff] %v4614_v63   ;;  %v5378_v33 = vadd.f32 %v5332_v40, %v5092_v0  ;;  %v3651_v53 = vpop.f32.mrb[9].mxu0 }
 0x1ed   : > { %4692 = vst [vmem:[%s6293_s20 + $0x10] sm:$0xff] %v4609_v52   ;;  %v4046_v21 = vadd.f32 %v4045_v39, %v3855_v14  ;;  %v4115_v54 = vadd.f32 %v4114_v46, %v4084_v19  ;;  %v5379_v55 = vadd.f32 %v3651_v53, %v1800_v57  ;;  %v5333_v26 = vpop.f32.mrb[10].mxu0 }
 0x1ee   : > { %v5380_v38 = vadd.f32 %v5333_v26, %v6268_v59  ;;  %v3654_v56 = vpop.f32.mrb[11].mxu0  ;;  %v3859_v0 = vadd.f32 %v5378_v33, %v6283_v6 }
 0x1ef   : > { %v4116_v61 = vadd.f32 %v4115_v54, %v4085_v3  ;;  %v3857_v11 = vadd.f32 %v5379_v55, %v6283_v6  ;;  %v4047_v2 = vadd.f32 %v4046_v21, %v3856_v8  ;;  %v5381_v51 = vadd.f32 %v3654_v56, %v6270_v18 }
 0x1f0   : > { %v3860_v5 = vadd.f32 %v5380_v38, %v6283_v6  ;;  %v4089_v62 = vmul.f32 %v3859_v0, %v3859_v0 }
 0x1f1   : > { %v4048_v20 = vadd.f32 %v4047_v2, %v3857_v11  ;;  %v4087_v7 = vmul.f32 %v3857_v11, %v3857_v11  ;;  %v4117_v57 = vadd.f32 %v4116_v61, %v4086_v48  ;;  %v3858_v23 = vadd.f32 %v5381_v51, %v6283_v6 }
 0x1f2   : > { %v4624_v43 = vpack.c.bf16 %v3860_v5, %v3859_v0  ;;  %v4090_v58 = vmul.f32 %v3860_v5, %v3860_v5 }
 0x1f3   : > { %v4118_v59 = vadd.f32 %v4117_v57, %v4087_v7  ;;  %v4619_v12 = vpack.c.bf16 %v3858_v23, %v3857_v11  ;;  %v4049_v13 = vadd.f32 %v4048_v20, %v3858_v23  ;;  %v4088_v15 = vmul.f32 %v3858_v23, %v3858_v23  ;;  %v5336_v27 = vpop.f32.mrb[12].mxu0 }
 0x1f4   : > { %4695 = vst [vmem:[%s6293_s20 + $0x28] sm:$0xff] %v4624_v43   ;;  %v5382_v41 = vadd.f32 %v5336_v27, %v6272_v22  ;;  %v3667_v18 = vpop.f32.mrb[13].mxu0 }
 0x1f5   : > { %4694 = vst [vmem:[%s6293_s20 + $0x20] sm:$0xff] %v4619_v12   ;;  %v4050_v16 = vadd.f32 %v4049_v13, %v3859_v0  ;;  %v4119_v25 = vadd.f32 %v4118_v59, %v4088_v15  ;;  %v5383_v28 = vadd.f32 %v3667_v18, %v6274_v60  ;;  %v5337_v29 = vpop.f32.mrb[14].mxu0 }
 0x1f6   : > { %v5384_v30 = vadd.f32 %v5337_v29, %v6276_v10  ;;  %v3670_v45 = vpop.f32.mrb[15].mxu0  ;;  %v3863_v22 = vadd.f32 %v5382_v41, %v6283_v6 }
 0x1f7   : > { %v4120_v1 = vadd.f32 %v4119_v25, %v4089_v62  ;;  %v3861_v31 = vadd.f32 %v5383_v28, %v6283_v6  ;;  %v4051_v32 = vadd.f32 %v4050_v16, %v3860_v5  ;;  %v5385_v4 = vadd.f32 %v3670_v45, %v6278_v49 }
 0x1f8   : > { %v3864_v44 = vadd.f32 %v5384_v30, %v6283_v6  ;;  %v4093_v63 = vmul.f32 %v3863_v22, %v3863_v22 }
 0x1f9   : > { %v4052_v24 = vadd.f32 %v4051_v32, %v3861_v31  ;;  %v4091_v34 = vmul.f32 %v3861_v31, %v3861_v31  ;;  %v4121_v60 = vadd.f32 %v4120_v1, %v4090_v58  ;;  %v3862_v35 = vadd.f32 %v5385_v4, %v6283_v6 }
 0x1fa   : > { %v4634_v47 = vpack.c.bf16 %v3864_v44, %v3863_v22  ;;  %v4094_v33 = vmul.f32 %v3864_v44, %v3864_v44 }
 0x1fb   : > { %v4122_v9 = vadd.f32 %v4121_v60, %v4091_v34  ;;  %v4629_v17 = vpack.c.bf16 %v3862_v35, %v3861_v31  ;;  %v4053_v14 = vadd.f32 %v4052_v24, %v3862_v35  ;;  %v4092_v8 = vmul.f32 %v3862_v35, %v3862_v35  ;;  %v5340_v36 = vpop.f32.mrb[16].mxu0 }
 0x1fc   : > { %4697 = vst [vmem:[%s6293_s20 + $0x38] sm:$0xff] %v4634_v47   ;;  %v3683_v37 = vpop.f32.mrb[17].mxu0 }
 0x1fd   : > { %4696 = vst [vmem:[%s6293_s20 + $0x30] sm:$0xff] %v4629_v17   ;;  %v4054_v46 = vadd.f32 %v4053_v14, %v3863_v22  ;;  %v4123_v52 = vadd.f32 %v4122_v9, %v4092_v8  ;;  %v5341_v19 = vpop.f32.mrb[18].mxu0 }
 0x1fe   : > { %v5148_v10 = vpop.f32.mrb[16].mxu1  ;;  %v3686_v3 = vpop.f32.mrb[19].mxu0 }
 0x1ff   : > { %v2202_v42 = vpop.f32.mrb[17].mxu1  ;;  %v5386_v49 = vadd.f32 %v5340_v36, %v5148_v10  ;;  %v4124_v21 = vadd.f32 %v4123_v52, %v4093_v63  ;;  %v4055_v55 = vadd.f32 %v4054_v46, %v3864_v44 }
 0x200   : > { %v5149_v50 = vpop.f32.mrb[18].mxu1  ;;  %v5387_v39 = vadd.f32 %v3683_v37, %v2202_v42 }
 0x201   : > { %v2205_v40 = vpop.f32.mrb[19].mxu1  ;;  %v5388_v53 = vadd.f32 %v5341_v19, %v5149_v50  ;;  %v3867_v48 = vadd.f32 %v5386_v49, %v6283_v6  ;;  %v4125_v11 = vadd.f32 %v4124_v21, %v4094_v33 }
 0x202   : > { %v3865_v54 = vadd.f32 %v5387_v39, %v6283_v6  ;;  %v5389_v26 = vadd.f32 %v3686_v3, %v2205_v40 }
 0x203   : > { %v3868_v38 = vadd.f32 %v5388_v53, %v6283_v6  ;;  %v5344_v23 = vpop.f32.mrb[20].mxu0  ;;  %v4097_v15 = vmul.f32 %v3867_v48, %v3867_v48 }
 0x204   : > { %v4056_v56 = vadd.f32 %v4055_v55, %v3865_v54  ;;  %v4095_v61 = vmul.f32 %v3865_v54, %v3865_v54  ;;  %v3866_v2 = vadd.f32 %v5389_v26, %v6283_v6  ;;  %v3699_v12 = vpop.f32.mrb[21].mxu0 }
 0x205   : > { %v4644_v51 = vpack.c.bf16 %v3868_v38, %v3867_v48  ;;  %v5345_v62 = vpop.f32.mrb[22].mxu0  ;;  %v4098_v25 = vmul.f32 %v3868_v38, %v3868_v38 }
 0x206   : > { %v5152_v0 = vpop.f32.mrb[20].mxu1  ;;  %v4126_v5 = vadd.f32 %v4125_v11, %v4095_v61  ;;  %v4639_v20 = vpack.c.bf16 %v3866_v2, %v3865_v54  ;;  %v4057_v7 = vadd.f32 %v4056_v56, %v3866_v2  ;;  %v4096_v57 = vmul.f32 %v3866_v2, %v3866_v2  ;;  %v3702_v29 = vpop.f32.mrb[23].mxu0 }
 0x207   : > { %v2218_v43 = vpop.f32.mrb[21].mxu1  ;;  %4699 = vst [vmem:[%s6293_s20 + $0x48] sm:$0xff] %v4644_v51   ;;  %v5390_v59 = vadd.f32 %v5344_v23, %v5152_v0 }
 0x208   : > { %v5153_v13 = vpop.f32.mrb[22].mxu1  ;;  %4698 = vst [vmem:[%s6293_s20 + $0x40] sm:$0xff] %v4639_v20   ;;  %v4058_v27 = vadd.f32 %v4057_v7, %v3867_v48  ;;  %v4127_v41 = vadd.f32 %v4126_v5, %v4096_v57  ;;  %v5391_v18 = vadd.f32 %v3699_v12, %v2218_v43 }
 0x209   : > { %v2221_v16 = vpop.f32.mrb[23].mxu1  ;;  %v5392_v28 = vadd.f32 %v5345_v62, %v5153_v13  ;;  %v3871_v31 = vadd.f32 %v5390_v59, %v6283_v6 }
 0x20a   : > { %v4128_v58 = vadd.f32 %v4127_v41, %v4097_v15  ;;  %v3869_v30 = vadd.f32 %v5391_v18, %v6283_v6  ;;  %v4059_v45 = vadd.f32 %v4058_v27, %v3868_v38  ;;  %v5393_v1 = vadd.f32 %v3702_v29, %v2221_v16 }
 0x20b   : > { %v3872_v32 = vadd.f32 %v5392_v28, %v6283_v6  ;;  %v5348_v17 = vpop.f32.mrb[24].mxu0  ;;  %v4101_v49 = vmul.f32 %v3871_v31, %v3871_v31 }
 0x20c   : > { %v4060_v4 = vadd.f32 %v4059_v45, %v3869_v30  ;;  %v4099_v22 = vmul.f32 %v3869_v30, %v3869_v30  ;;  %v4129_v44 = vadd.f32 %v4128_v58, %v4098_v25  ;;  %v3870_v24 = vadd.f32 %v5393_v1, %v6283_v6  ;;  %v3715_v36 = vpop.f32.mrb[25].mxu0 }
 0x20d   : > { %v4654_v34 = vpack.c.bf16 %v3872_v32, %v3871_v31  ;;  %v5349_v46 = vpop.f32.mrb[26].mxu0  ;;  %v4102_v39 = vmul.f32 %v3872_v32, %v3872_v32 }
 0x20e   : > { %v5156_v60 = vpop.f32.mrb[24].mxu1  ;;  %v4130_v35 = vadd.f32 %v4129_v44, %v4099_v22  ;;  %v4649_v47 = vpack.c.bf16 %v3870_v24, %v3869_v30  ;;  %v4061_v10 = vadd.f32 %v4060_v4, %v3870_v24  ;;  %v4100_v9 = vmul.f32 %v3870_v24, %v3870_v24  ;;  %v3718_v40 = vpop.f32.mrb[27].mxu0 }
 0x20f   : > { %v2234_v14 = vpop.f32.mrb[25].mxu1  ;;  %4701 = vst [vmem:[%s6293_s20 + $0x58] sm:$0xff] %v4654_v34   ;;  %v5394_v8 = vadd.f32 %v5348_v17, %v5156_v60 }
 0x210   : > { %v5157_v42 = vpop.f32.mrb[26].mxu1  ;;  %4700 = vst [vmem:[%s6293_s20 + $0x50] sm:$0xff] %v4649_v47   ;;  %v4062_v37 = vadd.f32 %v4061_v10, %v3871_v31  ;;  %v4131_v50 = vadd.f32 %v4130_v35, %v4100_v9  ;;  %v5395_v63 = vadd.f32 %v3715_v36, %v2234_v14 }
 0x211   : > { %v2237_v52 = vpop.f32.mrb[27].mxu1  ;;  %v5396_v19 = vadd.f32 %v5349_v46, %v5157_v42  ;;  %v3875_v54 = vadd.f32 %v5394_v8, %v6283_v6 }
 0x212   : > { %v4132_v33 = vadd.f32 %v4131_v50, %v4101_v49  ;;  %v3873_v53 = vadd.f32 %v5395_v63, %v6283_v6  ;;  %v4063_v3 = vadd.f32 %v4062_v37, %v3872_v32  ;;  %v5397_v21 = vadd.f32 %v3718_v40, %v2237_v52 }
 0x213   : > { %v3876_v55 = vadd.f32 %v5396_v19, %v6283_v6  ;;  %v5352_v20 = vpop.f32.mrb[28].mxu0  ;;  %v4105_v59 = vmul.f32 %v3875_v54, %v3875_v54 }
 0x214   : > { %v4064_v26 = vadd.f32 %v4063_v3, %v3873_v53  ;;  %v4103_v48 = vmul.f32 %v3873_v53, %v3873_v53  ;;  %v4133_v38 = vadd.f32 %v4132_v33, %v4102_v39  ;;  %v3874_v56 = vadd.f32 %v5397_v21, %v6283_v6  ;;  %v3731_v23 = vpop.f32.mrb[29].mxu0 }
 0x215   : > { %v4664_v61 = vpack.c.bf16 %v3876_v55, %v3875_v54  ;;  %v5353_v27 = vpop.f32.mrb[30].mxu0  ;;  %v4106_v18 = vmul.f32 %v3876_v55, %v3876_v55 }
 0x216   : > { %v5160_v11 = vpop.f32.mrb[28].mxu1  ;;  %v4134_v2 = vadd.f32 %v4133_v38, %v4103_v48  ;;  %v4659_v51 = vpack.c.bf16 %v3874_v56, %v3873_v53  ;;  %v4065_v0 = vadd.f32 %v4064_v26, %v3874_v56  ;;  %v4104_v5 = vmul.f32 %v3874_v56, %v3874_v56  ;;  %v3734_v16 = vpop.f32.mrb[31].mxu0 }
 0x217   : > { %v2250_v7 = vpop.f32.mrb[29].mxu1  ;;  %4703 = vst [vmem:[%s6293_s20 + $0x68] sm:$0xff] %v4664_v61   ;;  %v5398_v57 = vadd.f32 %v5352_v20, %v5160_v11 }
 0x218   : > { %v5161_v43 = vpop.f32.mrb[30].mxu1  ;;  %4702 = vst [vmem:[%s6293_s20 + $0x60] sm:$0xff] %v4659_v51   ;;  %v4066_v12 = vadd.f32 %v4065_v0, %v3875_v54  ;;  %v4135_v13 = vadd.f32 %v4134_v2, %v4104_v5  ;;  %v5399_v15 = vadd.f32 %v3731_v23, %v2250_v7 }
 0x219   : > { %v2253_v41 = vpop.f32.mrb[31].mxu1  ;;  %v5400_v62 = vadd.f32 %v5353_v27, %v5161_v43  ;;  %v3879_v30 = vadd.f32 %v5398_v57, %v6283_v6 }
 0x21a   : > { %v4136_v25 = vadd.f32 %v4135_v13, %v4105_v59  ;;  %v3877_v28 = vadd.f32 %v5399_v15, %v6283_v6  ;;  %v4067_v29 = vadd.f32 %v4066_v12, %v3876_v55  ;;  %v5401_v58 = vadd.f32 %v3734_v16, %v2253_v41 }
 0x21b   : > { %v3880_v45 = vadd.f32 %v5400_v62, %v6283_v6  ;;  %v4109_v35 = vmul.f32 %v3879_v30, %v3879_v30 }
 0x21c   : > { %v4068_v1 = vadd.f32 %v4067_v29, %v3877_v28  ;;  %v4107_v31 = vmul.f32 %v3877_v28, %v3877_v28  ;;  %v4137_v32 = vadd.f32 %v4136_v25, %v4106_v18  ;;  %v3878_v4 = vadd.f32 %v5401_v58, %v6283_v6 }
 0x21d   : > { %v4674_v22 = vpack.c.bf16 %v3880_v45, %v3879_v30  ;;  %v4110_v9 = vmul.f32 %v3880_v45, %v3880_v45 }
 0x21e   : > { %v4138_v44 = vadd.f32 %v4137_v32, %v4107_v31  ;;  %v4669_v24 = vpack.c.bf16 %v3878_v4, %v3877_v28  ;;  %v4069_v34 = vadd.f32 %v4068_v1, %v3878_v4  ;;  %v4108_v60 = vmul.f32 %v3878_v4, %v3878_v4 }
 0x21f   : > { %4705 = vst [vmem:[%s6293_s20 + $0x78] sm:$0xff] %v4674_v22  }
 0x220   : > { %4704 = vst [vmem:[%s6293_s20 + $0x70] sm:$0xff] %v4669_v24   ;;  %v4070_v47 = vadd.f32 %v4069_v34, %v3879_v30  ;;  %v4139_v10 = vadd.f32 %v4138_v44, %v4108_v60 }
 0x222   : > { %v4071_v17 = vadd.f32 %v4070_v47, %v3880_v45  ;;  %v4140_v14 = vadd.f32 %v4139_v10, %v4109_v35 }
 0x224   : > { %v4072_v8 = vrot.slane %v4071_v17, 4  ;;  %v4141_v36 = vadd.f32 %v4140_v14, %v4110_v9 }
 0x226   : > { %v4073_v42 = vadd.f32 %v4072_v8, %v4071_v17  ;;  %v4142_v49 = vrot.slane %v4141_v36, 4 }
 0x228   : > { %v4074_v6 = vrot.slane %v4073_v42, 2  ;;  %v4143_v37 = vadd.f32 %v4142_v49, %v4141_v36 }
 0x22a   : > { %v4075_v50 = vadd.f32 %v4074_v6, %v4073_v42  ;;  %v4144_v63 = vrot.slane %v4143_v37, 2 }
 0x22c   : > { %v4076_v46 = vrot.slane %v4075_v50, 1  ;;  %v4145_v52 = vadd.f32 %v4144_v63, %v4143_v37 }
 0x22e   : > { %v4077_v39 = vadd.f32 %v4076_v46, %v4075_v50  ;;  %v4146_v19 = vrot.slane %v4145_v52, 1 }
 0x230   : > { %4078 = vst [vmem:[%s292_s22] sm:$0x1] %v4077_v39  ;;  %v4147_v40 = vadd.f32 %v4146_v19, %v4145_v52 }
 0x232   : > { %4148 = vst [vmem:[%s295_s26] sm:$0x1] %v4147_v40 }
 0x233 PF: > { %s18_s24 = sadd.s32 1, %s5738_s24  }
 0x234   : > { %p15_p4 = scmp.ge.s32.totalorder %s18_s24, 4  }
 0x236   :  { %17 = sbr.rel (!%p15_p4) target bundleno = 1 (0x1), region = 104 }

</bundles_post_ra>
